<compile_context>
chip_gen: v6e
topology: v6e:2x2x1
jax: 0.10.0
libtpu: 0.0.40
codegen_flags: <defaults>
</compile_context>

<pallas_src>
import jax
import jax.numpy as jnp
from jax import lax
from jax.experimental import pallas as pl
from jax.experimental.pallas import tpu as pltpu

BN_EPS = 1e-5
LANE = 128


def _round_up(x, m):
    return (x + m - 1) // m * m


def _pick_tile(m, max_tile=2048):
    """Largest lane/sublane-friendly row tile that divides m."""
    for c in (2048, 1024, 512, 256, 128, 64, 32, 16, 8):
        if c <= max_tile and m % c == 0:
            return c
    return m  # fallback: single full block (always layout-legal)


# ----------------------------------------------------------------------------
# Kernel A: plain tiled matmul + bias, emitting per-block BN partial stats.
# Used by the small-Cin (one-shot im2col) conv path.
# ----------------------------------------------------------------------------
def _matmul_bias_stats_kernel(lhs_ref, w_ref, b_ref, z_ref, ssum_ref, ssq_ref):
    # lhs_ref : (TM, Kpad)      im2col rows
    # w_ref   : (Kpad, Cpad)    resident weights
    # b_ref   : (1, Cpad)       resident bias (f32)
    # z_ref   : (TM, Cpad)      pre-BN conv output
    # ssum/ssq: (1, 1, Cpad)    per-block BN partial statistics (f32)
    z = jnp.dot(lhs_ref[...], w_ref[...], preferred_element_type=jnp.float32)
    z = z + b_ref[...]
    z_ref[...] = z.astype(z_ref.dtype)
    ssum_ref[0] = jnp.sum(z, axis=0, keepdims=True)
    ssq_ref[0] = jnp.sum(z * z, axis=0, keepdims=True)


# ----------------------------------------------------------------------------
# Kernel B: depth-tap conv. One padded depth slab per step, 9 (kh,kw) taps
# packed into the contraction dim (single dot per kd), f32 accumulator
# resident across the kd reduction axis.
# ----------------------------------------------------------------------------
def _conv_tap_kernel(xp_ref, w_ref, b_ref, z_ref, ssum_ref, ssq_ref, acc_ref):
    # xp_ref  : (1, 1, H+2, W+2, Cin)   padded input slab at depth index d + kd
    # w_ref   : (3, 9*Cin, Cpad)        all taps, VMEM-resident (constant index_map)
    # b_ref   : (1, Cpad)               conv bias (f32), resident
    # z_ref   : (1, 1, H*W, Cpad)       pre-BN conv output (written at kd == 2)
    # ssum/ssq: (1, 1, 1, Cpad)         per-slice partial BN statistics (f32)
    # acc_ref : (H*W, Cpad) f32 scratch accumulator, lives across kd steps
    kd = pl.program_id(2)

    @pl.when(kd == 0)
    def _init():
        acc_ref[...] = jnp.zeros_like(acc_ref)

    slab = xp_ref[0, 0]                       # (H+2, W+2, Cin)
    hp2, wp2, cin = slab.shape
    h, w = hp2 - 2, wp2 - 2

    # Single im2col tile per kd: K packs the 9 (kh, kw) taps * Cin.
    cols = []
    for kh in range(3):                       # static slices (Python ints)
        for kw in range(3):
            cols.append(slab[kh:kh + h, kw:kw + w, :])
    lhs = jnp.concatenate(cols, axis=-1).reshape(h * w, 9 * cin)

    acc_ref[...] += jnp.dot(lhs, w_ref[kd], preferred_element_type=jnp.float32)

    @pl.when(kd == 2)
    def _finalize():
        z = acc_ref[...] + b_ref[...]         # f32, (H*W, Cpad)
        z_ref[0, 0] = z.astype(z_ref.dtype)
        ssum_ref[0, 0] = jnp.sum(z, axis=0, keepdims=True)
        ssq_ref[0, 0] = jnp.sum(z * z, axis=0, keepdims=True)


# ----------------------------------------------------------------------------
# Kernel C: folded BatchNorm (per-channel scale/shift) + ReLU, large row tiles.
# ----------------------------------------------------------------------------
def _bn_relu_kernel(z_ref, scale_ref, shift_ref, o_ref):
    y = z_ref[...].astype(jnp.float32) * scale_ref[...] + shift_ref[...]
    o_ref[...] = jnp.maximum(y, 0.0).astype(o_ref.dtype)


# ----------------------------------------------------------------------------
# One (Conv3d 3x3x3 pad=1 => BN3d(batch stats) => ReLU) stage.
# ----------------------------------------------------------------------------
def conv_bn_relu_stage(xp, w, b, gamma, beta, *, out_dtype, compute_dtype):
    """xp: (N, D+2, H+2, W+2, Cin) spatially padded channels-last input.
    w: (3, 3, 3, Cw_in, Cout) with Cw_in <= Cin (extra input channels of xp are
    zero lanes). Returns (N, D, H, W, Cpad); channels >= Cout are exact zeros."""
    n, dp2, hp2, wp2, cin = xp.shape
    d, h, wdim = dp2 - 2, hp2 - 2, wp2 - 2
    hw = h * wdim
    cw_in, cout = w.shape[3], w.shape[4]
    cpad = _round_up(cout, LANE)
    m_total = n * d * hw

    b_pad = jnp.zeros((1, cpad), jnp.float32).at[:, :cout].set(b.astype(jnp.float32))
    g_pad = jnp.zeros((cpad,), jnp.float32).at[:cout].set(gamma.astype(jnp.float32))
    beta_pad = jnp.zeros((cpad,), jnp.float32).at[:cout].set(beta.astype(jnp.float32))

    # Small-Cin stage: one-shot 3-D im2col (27*Cin contraction) beats the
    # lane-sparse slab path; for larger Cin keep the ~1x-read tap-grid kernel.
    use_im2col = (27 * cw_in) <= 2 * cpad

    if use_im2col:
        k = 27 * cw_in
        kpad = _round_up(k, LANE)
        xs = xp[..., :cw_in].astype(compute_dtype)
        cols = []
        for kd in range(3):
            for kh in range(3):
                for kw in range(3):
                    cols.append(lax.slice(
                        xs, (0, kd, kh, kw, 0),
                        (n, kd + d, kh + h, kw + wdim, cw_in)))
        lhs = jnp.concatenate(cols, axis=-1).reshape(m_total, k)
        if kpad != k:
            lhs = jnp.pad(lhs, ((0, 0), (0, kpad - k)))
        w_mat = jnp.zeros((kpad, cpad), compute_dtype)
        w_mat = w_mat.at[:k, :cout].set(w.reshape(k, cout).astype(compute_dtype))

        tm = _pick_tile(m_total)
        nblk = m_total // tm
        z, ssum, ssq = pl.pallas_call(
            _matmul_bias_stats_kernel,
            out_shape=(
                jax.ShapeDtypeStruct((m_total, cpad), compute_dtype),
                jax.ShapeDtypeStruct((nblk, 1, cpad), jnp.float32),
                jax.ShapeDtypeStruct((nblk, 1, cpad), jnp.float32),
            ),
            grid=(nblk,),
            in_specs=[
                pl.BlockSpec((tm, kpad), lambda i: (i, 0)),
                pl.BlockSpec((kpad, cpad), lambda i: (0, 0)),   # resident weights
                pl.BlockSpec((1, cpad), lambda i: (0, 0)),      # resident bias
            ],
            out_specs=[
                pl.BlockSpec((tm, cpad), lambda i: (i, 0)),
                pl.BlockSpec((1, 1, cpad), lambda i: (i, 0, 0)),
                pl.BlockSpec((1, 1, cpad), lambda i: (i, 0, 0)),
            ],
            compiler_params=pltpu.CompilerParams(
                dimension_semantics=("parallel",)),
        )(lhs, w_mat, b_pad)
    else:
        # Depth-tap reduction grid: K packs the 9 (kh, kw) taps, weights resident.
        w_pad = jnp.zeros((3, 3, 3, cin, cpad), compute_dtype)
        w_pad = w_pad.at[:, :, :, :cw_in, :cout].set(w.astype(compute_dtype))
        w_taps = w_pad.reshape(3, 9 * cin, cpad)   # K order = (kh, kw, cin)

        z, ssum, ssq = pl.pallas_call(
            _conv_tap_kernel,
            out_shape=(
                jax.ShapeDtypeStruct((n, d, hw, cpad), compute_dtype),
                jax.ShapeDtypeStruct((n, d, 1, cpad), jnp.float32),
                jax.ShapeDtypeStruct((n, d, 1, cpad), jnp.float32),
            ),
            grid=(n, d, 3),
            in_specs=[
                # Padded input slab: block size 1 along (D+2), offset by tap kd.
                pl.BlockSpec((1, 1, hp2, wp2, cin),
                             lambda ni, di, kd: (ni, di + kd, 0, 0, 0)),
                # Full weight tensor, constant index_map => loaded once, resident.
                pl.BlockSpec((3, 9 * cin, cpad),
                             lambda ni, di, kd: (0, 0, 0)),
                pl.BlockSpec((1, cpad), lambda ni, di, kd: (0, 0)),
            ],
            out_specs=[
                pl.BlockSpec((1, 1, hw, cpad), lambda ni, di, kd: (ni, di, 0, 0)),
                pl.BlockSpec((1, 1, 1, cpad), lambda ni, di, kd: (ni, di, 0, 0)),
                pl.BlockSpec((1, 1, 1, cpad), lambda ni, di, kd: (ni, di, 0, 0)),
            ],
            scratch_shapes=[pltpu.VMEM((hw, cpad), jnp.float32)],
            compiler_params=pltpu.CompilerParams(
                dimension_semantics=("parallel", "parallel", "arbitrary")),
        )(xp.astype(compute_dtype), w_taps, b_pad)
        z = z.reshape(m_total, cpad)

    # BatchNorm3d training-mode statistics over (N, D, H, W) per channel:
    # tiny O(Cout) reduction + affine fold in plain JAX. Biased variance matches
    # PyTorch's training-mode normalization (intentional).
    s1 = jnp.sum(ssum.reshape(-1, cpad), axis=0)
    s2 = jnp.sum(ssq.reshape(-1, cpad), axis=0)
    mean = s1 / m_total
    var = jnp.maximum(s2 / m_total - mean * mean, 0.0)
    inv_std = lax.rsqrt(var + BN_EPS)
    scale = (g_pad * inv_std).reshape(1, cpad)
    shift = (beta_pad - mean * g_pad * inv_std).reshape(1, cpad)

    # Pass 2: elementwise scale/shift + ReLU over large flattened row tiles.
    tm2 = _pick_tile(m_total)
    act = pl.pallas_call(
        _bn_relu_kernel,
        out_shape=jax.ShapeDtypeStruct((m_total, cpad), out_dtype),
        grid=(m_total // tm2,),
        in_specs=[
            pl.BlockSpec((tm2, cpad), lambda i: (i, 0)),
            pl.BlockSpec((1, cpad), lambda i: (0, 0)),
            pl.BlockSpec((1, cpad), lambda i: (0, 0)),
        ],
        out_specs=pl.BlockSpec((tm2, cpad), lambda i: (i, 0)),
        compiler_params=pltpu.CompilerParams(dimension_semantics=("parallel",)),
    )(z, scale, shift)

    return act.reshape(n, d, h, wdim, cpad)


def double_conv_forward(x_ncdhw, params, compute_dtype=jnp.bfloat16):
    """Forward pass of double_conv. Input/output are NCDHW (PyTorch layout)."""
    x = jnp.transpose(x_ncdhw, (0, 2, 3, 4, 1))          # NCDHW -> NDHWC
    pad = ((0, 0), (1, 1), (1, 1), (1, 1), (0, 0))

    a1 = conv_bn_relu_stage(jnp.pad(x, pad),
                            params["w1"], params["b1"], params["g1"], params["beta1"],
                            out_dtype=compute_dtype, compute_dtype=compute_dtype)
    a2 = conv_bn_relu_stage(jnp.pad(a1, pad),
                            params["w2"], params["b2"], params["g2"], params["beta2"],
                            out_dtype=jnp.float32, compute_dtype=compute_dtype)

    out_ch = params["w2"].shape[-1]
    return jnp.transpose(a2[..., :out_ch], (0, 4, 1, 2, 3))   # NDHWC -> NCDHW


# ----------------------------------------------------------------------------
# Pure-JAX f32 reference (correctness check only).
# ----------------------------------------------------------------------------
def _ref_stage(x_ndhwc, w, b, gamma, beta):
    y = lax.conv_general_dilated(
        x_ndhwc, w, window_strides=(1, 1, 1),
        padding=((1, 1), (1, 1), (1, 1)),
        dimension_numbers=("NDHWC", "DHWIO", "NDHWC"))
    y = y + b.reshape(1, 1, 1, 1, -1)
    mean = jnp.mean(y, axis=(0, 1, 2, 3), keepdims=True)
    var = jnp.mean((y - mean) ** 2, axis=(0, 1, 2, 3), keepdims=True)
    y = (y - mean) / jnp.sqrt(var + BN_EPS)
    y = y * gamma.reshape(1, 1, 1, 1, -1) + beta.reshape(1, 1, 1, 1, -1)
    return jnp.maximum(y, 0.0)


def _ref_forward(x_ncdhw, params):
    x = jnp.transpose(x_ncdhw, (0, 2, 3, 4, 1))
    x = _ref_stage(x, params["w1"], params["b1"], params["g1"], params["beta1"])
    x = _ref_stage(x, params["w2"], params["b2"], params["g2"], params["beta2"])
    return jnp.transpose(x, (0, 4, 1, 2, 3))


# ----------------------------------------------------------------------------
# Deterministic parameter construction (shapes from double_conv.__init__).
# ----------------------------------------------------------------------------
def init_params(key, in_ch, out_ch):
    k1, k2, k3, k4 = jax.random.split(key, 4)
    # Conv weights stored as [kd, kh, kw, Cin, Cout] (channels-last conv layout).
    w1 = 0.1 * jax.random.normal(k1, (3, 3, 3, in_ch, out_ch), jnp.float32)
    b1 = 0.1 * jax.random.normal(k2, (out_ch,), jnp.float32)
    w2 = 0.1 * jax.random.normal(k3, (3, 3, 3, out_ch, out_ch), jnp.float32)
    b2 = 0.1 * jax.random.normal(k4, (out_ch,), jnp.float32)
    # BatchNorm3d defaults: weight = 1, bias = 0.
    return dict(
        w1=w1, b1=b1, g1=jnp.ones((out_ch,), jnp.float32),
        beta1=jnp.zeros((out_ch,), jnp.float32),
        w2=w2, b2=b2, g2=jnp.ones((out_ch,), jnp.float32),
        beta2=jnp.zeros((out_ch,), jnp.float32),
    )


if __name__ == "__main__":
    # out_ch=16 so stage 1 takes the one-shot-im2col path (small Cin) and
    # stage 2 takes the depth-tap path (exercises both kernels).
    in_ch, out_ch = 4, 16
    N, D, H, W = 2, 8, 8, 8

    key = jax.random.PRNGKey(0)
    kx, kp = jax.random.split(key)
    x = jax.random.normal(kx, (N, in_ch, D, H, W), jnp.float32)  # NCDHW, like torch
    params = init_params(kp, in_ch, out_ch)

    fwd = jax.jit(double_conv_forward, static_argnames=("compute_dtype",))

    y_ref = jax.block_until_ready(_ref_forward(x, params))

    # Bit-faithful semantics check with f32 MXU operands.
    y_f32 = jax.block_until_ready(fwd(x, params, compute_dtype=jnp.float32))
    assert y_f32.shape == (N, out_ch, D, H, W), y_f32.shape
    assert jnp.allclose(y_f32, y_ref, rtol=1e-3, atol=1e-3), \
        float(jnp.max(jnp.abs(y_f32 - y_ref)))

    # Default fast path: bf16 MXU operands, f32 accumulation + BN statistics.
    y = jax.block_until_ready(fwd(x, params))
    assert y.shape == (N, out_ch, D, H, W), y.shape
    max_err = float(jnp.max(jnp.abs(y.astype(jnp.float32) - y_ref)))
    assert max_err < 0.15, max_err  # post-BN outputs are O(1)

    print("KERNEL_OK")
</pallas_src>

<mosaic_0001>
module attributes {stable_mosaic.version = 11 : i64} {
  func.func @_matmul_bias_stats_kernel(%arg0: i32, %arg1: memref<1024x128xf32, #tpu.memory_space<vmem>>, %arg2: memref<128x128xf32, #tpu.memory_space<vmem>>, %arg3: memref<1x128xf32, #tpu.memory_space<vmem>>, %arg4: memref<1024x128xf32, #tpu.memory_space<vmem>>, %arg5: memref<1x1x128xf32, #tpu.memory_space<vmem>>, %arg6: memref<1x1x128xf32, #tpu.memory_space<vmem>>) attributes {dimension_semantics = [#tpu.dimension_semantics<parallel>], iteration_bounds = array<i64: 1>, scalar_prefetch = 0 : i64, scratch_operands = 0 : i64, tpu.core_type = #tpu.core_type<tc>, window_params = [{transform_indices = @transform_0, window_bounds = array<i64: 1024, 128>}, {pipeline_mode = #tpu.pipeline_mode<synchronous>, transform_indices = @transform_1, window_bounds = array<i64: 128, 128>}, {pipeline_mode = #tpu.pipeline_mode<synchronous>, transform_indices = @transform_2, window_bounds = array<i64: 1, 128>}, {transform_indices = @transform_3, window_bounds = array<i64: 1024, 128>}, {transform_indices = @transform_4, window_bounds = array<i64: 1, 1, 128>}, {transform_indices = @transform_5, window_bounds = array<i64: 1, 1, 128>}]} {
    %c0 = arith.constant 0 : index
    %c0_0 = arith.constant 0 : index
    %0 = vector.load %arg1[%c0, %c0_0] : memref<1024x128xf32, #tpu.memory_space<vmem>>, vector<1024x128xf32>
    %c0_1 = arith.constant 0 : index
    %c0_2 = arith.constant 0 : index
    %1 = vector.load %arg2[%c0_1, %c0_2] : memref<128x128xf32, #tpu.memory_space<vmem>>, vector<128x128xf32>
    %cst = arith.constant dense<0.000000e+00> : vector<1024x128xf32>
    %2 = tpu.matmul %0, %1, %cst {dimension_numbers = #tpu.dot_dimension_numbers<[1], [0], [0], [1], [0, 0, 1, 1], [], []>} : vector<1024x128xf32>, vector<128x128xf32>, vector<1024x128xf32> -> vector<1024x128xf32>
    %c0_3 = arith.constant 0 : index
    %c0_4 = arith.constant 0 : index
    %3 = vector.load %arg3[%c0_3, %c0_4] : memref<1x128xf32, #tpu.memory_space<vmem>>, vector<1x128xf32>
    %4 = vector.broadcast %3 : vector<1x128xf32> to vector<1024x128xf32>
    %5 = arith.addf %2, %4 : vector<1024x128xf32>
    %c0_5 = arith.constant 0 : index
    %c0_6 = arith.constant 0 : index
    %6 = vector.load %arg4[%c0_5, %c0_6] : memref<1024x128xf32, #tpu.memory_space<vmem>>, vector<1024x128xf32>
    tpu.vector_store %arg4[%c0_5, %c0_6], %5 {strides = array<i32>} : memref<1024x128xf32, #tpu.memory_space<vmem>>, vector<1024x128xf32>,
    %cst_7 = arith.constant dense<0.000000e+00> : vector<128xf32>
    %7 = vector.multi_reduction <add>, %5, %cst_7 [0] : vector<1024x128xf32> to vector<128xf32>
    %8 = vector.shape_cast %7 : vector<128xf32> to vector<1x128xf32>
    %c0_8 = arith.constant 0 : index
    %c0_9 = arith.constant 0 : index
    %c0_10 = arith.constant 0 : index
    %9 = vector.load %arg5[%c0_8, %c0_9, %c0_10] : memref<1x1x128xf32, #tpu.memory_space<vmem>>, vector<1x1x128xf32>
    %10 = vector.shape_cast %9 : vector<1x1x128xf32> to vector<1x128xf32>
    %11 = vector.shape_cast %8 : vector<1x128xf32> to vector<1x1x128xf32>
    tpu.vector_store %arg5[%c0_8, %c0_9, %c0_10], %11 {strides = array<i32>} : memref<1x1x128xf32, #tpu.memory_space<vmem>>, vector<1x1x128xf32>,
    %12 = arith.mulf %5, %5 : vector<1024x128xf32>
    %cst_11 = arith.constant dense<0.000000e+00> : vector<128xf32>
    %13 = vector.multi_reduction <add>, %12, %cst_11 [0] : vector<1024x128xf32> to vector<128xf32>
    %14 = vector.shape_cast %13 : vector<128xf32> to vector<1x128xf32>
    %c0_12 = arith.constant 0 : index
    %c0_13 = arith.constant 0 : index
    %c0_14 = arith.constant 0 : index
    %15 = vector.load %arg6[%c0_12, %c0_13, %c0_14] : memref<1x1x128xf32, #tpu.memory_space<vmem>>, vector<1x1x128xf32>
    %16 = vector.shape_cast %15 : vector<1x1x128xf32> to vector<1x128xf32>
    %17 = vector.shape_cast %14 : vector<1x128xf32> to vector<1x1x128xf32>
    tpu.vector_store %arg6[%c0_12, %c0_13, %c0_14], %17 {strides = array<i32>} : memref<1x1x128xf32, #tpu.memory_space<vmem>>, vector<1x1x128xf32>,
    return
  }
  func.func @transform_0(%arg0: i32) -> (i32, i32) {
    %c0_i32 = arith.constant 0 : i32
    %c0_i32_0 = arith.constant 0 : i32
    return %arg0, %c0_i32 : i32, i32
  }
  func.func @transform_1(%arg0: i32) -> (i32, i32) {
    %c0_i32 = arith.constant 0 : i32
    %c0_i32_0 = arith.constant 0 : i32
    %c0_i32_1 = arith.constant 0 : i32
    return %c0_i32, %c0_i32_0 : i32, i32
  }
  func.func @transform_2(%arg0: i32) -> (i32, i32) {
    %c0_i32 = arith.constant 0 : i32
    %c0_i32_0 = arith.constant 0 : i32
    %c0_i32_1 = arith.constant 0 : i32
    return %c0_i32, %c0_i32_0 : i32, i32
  }
  func.func @transform_3(%arg0: i32) -> (i32, i32) {
    %c0_i32 = arith.constant 0 : i32
    %c0_i32_0 = arith.constant 0 : i32
    return %arg0, %c0_i32 : i32, i32
  }
  func.func @transform_4(%arg0: i32) -> (i32, i32, i32) {
    %c0_i32 = arith.constant 0 : i32
    %c0_i32_0 = arith.constant 0 : i32
    %c0_i32_1 = arith.constant 0 : i32
    return %arg0, %c0_i32, %c0_i32_0 : i32, i32, i32
  }
  func.func @transform_5(%arg0: i32) -> (i32, i32, i32) {
    %c0_i32 = arith.constant 0 : i32
    %c0_i32_0 = arith.constant 0 : i32
    %c0_i32_1 = arith.constant 0 : i32
    return %arg0, %c0_i32, %c0_i32_0 : i32, i32, i32
  }
}

module attributes {stable_mosaic.version = 11 : i64} {
  func.func @_bn_relu_kernel(%arg0: i32, %arg1: memref<1024x128xf32, #tpu.memory_space<vmem>>, %arg2: memref<1x128xf32, #tpu.memory_space<vmem>>, %arg3: memref<1x128xf32, #tpu.memory_space<vmem>>, %arg4: memref<1024x128xf32, #tpu.memory_space<vmem>>) attributes {dimension_semantics = [#tpu.dimension_semantics<parallel>], iteration_bounds = array<i64: 1>, scalar_prefetch = 0 : i64, scratch_operands = 0 : i64, tpu.core_type = #tpu.core_type<tc>, window_params = [{transform_indices = @transform_0, window_bounds = array<i64: 1024, 128>}, {pipeline_mode = #tpu.pipeline_mode<synchronous>, transform_indices = @transform_1, window_bounds = array<i64: 1, 128>}, {pipeline_mode = #tpu.pipeline_mode<synchronous>, transform_indices = @transform_2, window_bounds = array<i64: 1, 128>}, {transform_indices = @transform_3, window_bounds = array<i64: 1024, 128>}]} {
    %c0 = arith.constant 0 : index
    %c0_0 = arith.constant 0 : index
    %0 = vector.load %arg1[%c0, %c0_0] : memref<1024x128xf32, #tpu.memory_space<vmem>>, vector<1024x128xf32>
    %c0_1 = arith.constant 0 : index
    %c0_2 = arith.constant 0 : index
    %1 = vector.load %arg2[%c0_1, %c0_2] : memref<1x128xf32, #tpu.memory_space<vmem>>, vector<1x128xf32>
    %2 = vector.broadcast %1 : vector<1x128xf32> to vector<1024x128xf32>
    %3 = arith.mulf %0, %2 : vector<1024x128xf32>
    %c0_3 = arith.constant 0 : index
    %c0_4 = arith.constant 0 : index
    %4 = vector.load %arg3[%c0_3, %c0_4] : memref<1x128xf32, #tpu.memory_space<vmem>>, vector<1x128xf32>
    %5 = vector.broadcast %4 : vector<1x128xf32> to vector<1024x128xf32>
    %6 = arith.addf %3, %5 : vector<1024x128xf32>
    %cst = arith.constant 0.000000e+00 : f32
    %7 = vector.broadcast %cst : f32 to vector<1024x128xf32>
    %8 = arith.maximumf %6, %7 : vector<1024x128xf32>
    %c0_5 = arith.constant 0 : index
    %c0_6 = arith.constant 0 : index
    %9 = vector.load %arg4[%c0_5, %c0_6] : memref<1024x128xf32, #tpu.memory_space<vmem>>, vector<1024x128xf32>
    tpu.vector_store %arg4[%c0_5, %c0_6], %8 {strides = array<i32>} : memref<1024x128xf32, #tpu.memory_space<vmem>>, vector<1024x128xf32>,
    return
  }
  func.func @transform_0(%arg0: i32) -> (i32, i32) {
    %c0_i32 = arith.constant 0 : i32
    %c0_i32_0 = arith.constant 0 : i32
    return %arg0, %c0_i32 : i32, i32
  }
  func.func @transform_1(%arg0: i32) -> (i32, i32) {
    %c0_i32 = arith.constant 0 : i32
    %c0_i32_0 = arith.constant 0 : i32
    %c0_i32_1 = arith.constant 0 : i32
    return %c0_i32, %c0_i32_0 : i32, i32
  }
  func.func @transform_2(%arg0: i32) -> (i32, i32) {
    %c0_i32 = arith.constant 0 : i32
    %c0_i32_0 = arith.constant 0 : i32
    %c0_i32_1 = arith.constant 0 : i32
    return %c0_i32, %c0_i32_0 : i32, i32
  }
  func.func @transform_3(%arg0: i32) -> (i32, i32) {
    %c0_i32 = arith.constant 0 : i32
    %c0_i32_0 = arith.constant 0 : i32
    return %arg0, %c0_i32 : i32, i32
  }
}

module attributes {stable_mosaic.version = 11 : i64} {
  func.func @_conv_tap_kernel(%arg0: i32, %arg1: i32, %arg2: i32, %arg3: memref<1x1x10x10x128xf32, #tpu.memory_space<vmem>>, %arg4: memref<3x1152x128xf32, #tpu.memory_space<vmem>>, %arg5: memref<1x128xf32, #tpu.memory_space<vmem>>, %arg6: memref<1x1x64x128xf32, #tpu.memory_space<vmem>>, %arg7: memref<1x1x1x128xf32, #tpu.memory_space<vmem>>, %arg8: memref<1x1x1x128xf32, #tpu.memory_space<vmem>>, %arg9: memref<64x128xf32, #tpu.memory_space<vmem>>) attributes {dimension_semantics = [#tpu.dimension_semantics<parallel>, #tpu.dimension_semantics<parallel>, #tpu.dimension_semantics<arbitrary>], iteration_bounds = array<i64: 2, 8, 3>, scalar_prefetch = 0 : i64, scratch_operands = 1 : i64, tpu.core_type = #tpu.core_type<tc>, window_params = [{transform_indices = @transform_0, window_bounds = array<i64: 1, 1, 10, 10, 128>}, {pipeline_mode = #tpu.pipeline_mode<synchronous>, transform_indices = @transform_1, window_bounds = array<i64: 3, 1152, 128>}, {pipeline_mode = #tpu.pipeline_mode<synchronous>, transform_indices = @transform_2, window_bounds = array<i64: 1, 128>}, {transform_indices = @transform_3, window_bounds = array<i64: 1, 1, 64, 128>}, {transform_indices = @transform_4, window_bounds = array<i64: 1, 1, 1, 128>}, {transform_indices = @transform_5, window_bounds = array<i64: 1, 1, 1, 128>}]} {
    %c0_i32 = arith.constant 0 : i32
    %0 = arith.cmpi eq, %arg2, %c0_i32 : i32
    %1 = arith.extui %0 : i1 to i32
    %c0_i32_0 = arith.constant 0 : i32
    %2 = arith.cmpi ne, %1, %c0_i32_0 : i32
    scf.if %2 {
      %cst_12 = arith.constant 0.000000e+00 : f32
      %26 = vector.broadcast %cst_12 : f32 to vector<64x128xf32>
      %c0_13 = arith.constant 0 : index
      %c0_14 = arith.constant 0 : index
      %27 = vector.load %arg9[%c0_13, %c0_14] : memref<64x128xf32, #tpu.memory_space<vmem>>, vector<64x128xf32>
      tpu.vector_store %arg9[%c0_13, %c0_14], %26 {strides = array<i32>} : memref<64x128xf32, #tpu.memory_space<vmem>>, vector<64x128xf32>,
    } else {
    }
    %c0 = arith.constant 0 : index
    %c0_1 = arith.constant 0 : index
    %c0_2 = arith.constant 0 : index
    %c0_3 = arith.constant 0 : index
    %c0_4 = arith.constant 0 : index
    %3 = vector.load %arg3[%c0, %c0_1, %c0_2, %c0_3, %c0_4] : memref<1x1x10x10x128xf32, #tpu.memory_space<vmem>>, vector<1x1x10x10x128xf32>
    %4 = vector.shape_cast %3 : vector<1x1x10x10x128xf32> to vector<10x10x128xf32>
    %5 = vector.extract_strided_slice %4 {offsets = [0, 0, 0], sizes = [8, 8, 128], strides = [1, 1, 1]} : vector<10x10x128xf32> to vector<8x8x128xf32>
    %6 = vector.extract_strided_slice %4 {offsets = [0, 1, 0], sizes = [8, 8, 128], strides = [1, 1, 1]} : vector<10x10x128xf32> to vector<8x8x128xf32>
    %7 = vector.extract_strided_slice %4 {offsets = [0, 2, 0], sizes = [8, 8, 128], strides = [1, 1, 1]} : vector<10x10x128xf32> to vector<8x8x128xf32>
    %8 = vector.extract_strided_slice %4 {offsets = [1, 0, 0], sizes = [8, 8, 128], strides = [1, 1, 1]} : vector<10x10x128xf32> to vector<8x8x128xf32>
    %9 = vector.extract_strided_slice %4 {offsets = [1, 1, 0], sizes = [8, 8, 128], strides = [1, 1, 1]} : vector<10x10x128xf32> to vector<8x8x128xf32>
    %10 = vector.extract_strided_slice %4 {offsets = [1, 2, 0], sizes = [8, 8, 128], strides = [1, 1, 1]} : vector<10x10x128xf32> to vector<8x8x128xf32>
    %11 = vector.extract_strided_slice %4 {offsets = [2, 0, 0], sizes = [8, 8, 128], strides = [1, 1, 1]} : vector<10x10x128xf32> to vector<8x8x128xf32>
    %12 = vector.extract_strided_slice %4 {offsets = [2, 1, 0], sizes = [8, 8, 128], strides = [1, 1, 1]} : vector<10x10x128xf32> to vector<8x8x128xf32>
    %13 = vector.extract_strided_slice %4 {offsets = [2, 2, 0], sizes = [8, 8, 128], strides = [1, 1, 1]} : vector<10x10x128xf32> to vector<8x8x128xf32>
    %14 = tpu.concatenate %5, %6, %7, %8, %9, %10, %11, %12, %13 in 2 : vector<8x8x128xf32>, vector<8x8x128xf32>, vector<8x8x128xf32>, vector<8x8x128xf32>, vector<8x8x128xf32>, vector<8x8x128xf32>, vector<8x8x128xf32>, vector<8x8x128xf32>, vector<8x8x128xf32> -> vector<8x8x1152xf32>
    %15 = vector.shape_cast %14 : vector<8x8x1152xf32> to vector<64x1152xf32>
    %c0_5 = arith.constant 0 : index
    %c0_6 = arith.constant 0 : index
    %16 = vector.load %arg9[%c0_5, %c0_6] : memref<64x128xf32, #tpu.memory_space<vmem>>, vector<64x128xf32>
    %17 = arith.index_cast %arg2 : i32 to index
    %c0_7 = arith.constant 0 : index
    %c0_8 = arith.constant 0 : index
    %18 = vector.load %arg4[%17, %c0_7, %c0_8] : memref<3x1152x128xf32, #tpu.memory_space<vmem>>, vector<1x1152x128xf32>
    %19 = vector.shape_cast %18 : vector<1x1152x128xf32> to vector<1152x128xf32>
    %cst = arith.constant dense<0.000000e+00> : vector<64x128xf32>
    %20 = tpu.matmul %15, %19, %cst {dimension_numbers = #tpu.dot_dimension_numbers<[1], [0], [0], [1], [0, 0, 1, 1], [], []>} : vector<64x1152xf32>, vector<1152x128xf32>, vector<64x128xf32> -> vector<64x128xf32>
    %21 = arith.addf %16, %20 : vector<64x128xf32>
    %c0_9 = arith.constant 0 : index
    %c0_10 = arith.constant 0 : index
    %22 = vector.load %arg9[%c0_9, %c0_10] : memref<64x128xf32, #tpu.memory_space<vmem>>, vector<64x128xf32>
    tpu.vector_store %arg9[%c0_9, %c0_10], %21 {strides = array<i32>} : memref<64x128xf32, #tpu.memory_space<vmem>>, vector<64x128xf32>,
    %c2_i32 = arith.constant 2 : i32
    %23 = arith.cmpi eq, %arg2, %c2_i32 : i32
    %24 = arith.extui %23 : i1 to i32
    %c0_i32_11 = arith.constant 0 : i32
    %25 = arith.cmpi ne, %24, %c0_i32_11 : i32
    scf.if %25 {
      %c0_12 = arith.constant 0 : index
      %c0_13 = arith.constant 0 : index
      %26 = vector.load %arg9[%c0_12, %c0_13] : memref<64x128xf32, #tpu.memory_space<vmem>>, vector<64x128xf32>
      %c0_14 = arith.constant 0 : index
      %c0_15 = arith.constant 0 : index
      %27 = vector.load %arg5[%c0_14, %c0_15] : memref<1x128xf32, #tpu.memory_space<vmem>>, vector<1x128xf32>
      %28 = vector.broadcast %27 : vector<1x128xf32> to vector<64x128xf32>
      %29 = arith.addf %26, %28 : vector<64x128xf32>
      %c0_16 = arith.constant 0 : index
      %c0_17 = arith.constant 0 : index
      %c0_18 = arith.constant 0 : index
      %c0_19 = arith.constant 0 : index
      %30 = vector.load %arg6[%c0_16, %c0_17, %c0_18, %c0_19] : memref<1x1x64x128xf32, #tpu.memory_space<vmem>>, vector<1x1x64x128xf32>
      %31 = vector.shape_cast %30 : vector<1x1x64x128xf32> to vector<64x128xf32>
      %32 = vector.shape_cast %29 : vector<64x128xf32> to vector<1x1x64x128xf32>
      tpu.vector_store %arg6[%c0_16, %c0_17, %c0_18, %c0_19], %32 {strides = array<i32>} : memref<1x1x64x128xf32, #tpu.memory_space<vmem>>, vector<1x1x64x128xf32>,
      %cst_20 = arith.constant dense<0.000000e+00> : vector<128xf32>
      %33 = vector.multi_reduction <add>, %29, %cst_20 [0] : vector<64x128xf32> to vector<128xf32>
      %34 = vector.shape_cast %33 : vector<128xf32> to vector<1x128xf32>
      %c0_21 = arith.constant 0 : index
      %c0_22 = arith.constant 0 : index
      %c0_23 = arith.constant 0 : index
      %c0_24 = arith.constant 0 : index
      %35 = vector.load %arg7[%c0_21, %c0_22, %c0_23, %c0_24] : memref<1x1x1x128xf32, #tpu.memory_space<vmem>>, vector<1x1x1x128xf32>
      %36 = vector.shape_cast %35 : vector<1x1x1x128xf32> to vector<1x128xf32>
      %37 = vector.shape_cast %34 : vector<1x128xf32> to vector<1x1x1x128xf32>
      tpu.vector_store %arg7[%c0_21, %c0_22, %c0_23, %c0_24], %37 {strides = array<i32>} : memref<1x1x1x128xf32, #tpu.memory_space<vmem>>, vector<1x1x1x128xf32>,
      %38 = arith.mulf %29, %29 : vector<64x128xf32>
      %cst_25 = arith.constant dense<0.000000e+00> : vector<128xf32>
      %39 = vector.multi_reduction <add>, %38, %cst_25 [0] : vector<64x128xf32> to vector<128xf32>
      %40 = vector.shape_cast %39 : vector<128xf32> to vector<1x128xf32>
      %c0_26 = arith.constant 0 : index
      %c0_27 = arith.constant 0 : index
      %c0_28 = arith.constant 0 : index
      %c0_29 = arith.constant 0 : index
      %41 = vector.load %arg8[%c0_26, %c0_27, %c0_28, %c0_29] : memref<1x1x1x128xf32, #tpu.memory_space<vmem>>, vector<1x1x1x128xf32>
      %42 = vector.shape_cast %41 : vector<1x1x1x128xf32> to vector<1x128xf32>
      %43 = vector.shape_cast %40 : vector<1x128xf32> to vector<1x1x1x128xf32>
      tpu.vector_store %arg8[%c0_26, %c0_27, %c0_28, %c0_29], %43 {strides = array<i32>} : memref<1x1x1x128xf32, #tpu.memory_space<vmem>>, vector<1x1x1x128xf32>,
    } else {
    }
    return
  }
  func.func @transform_0(%arg0: i32, %arg1: i32, %arg2: i32) -> (i32, i32, i32, i32, i32) {
    %0 = arith.addi %arg1, %arg2 : i32
    %c0_i32 = arith.constant 0 : i32
    %c0_i32_0 = arith.constant 0 : i32
    %c0_i32_1 = arith.constant 0 : i32
    %c0_i32_2 = arith.constant 0 : i32
    return %arg0, %0, %c0_i32, %c0_i32_0, %c0_i32_1 : i32, i32, i32, i32, i32
  }
  func.func @transform_1(%arg0: i32, %arg1: i32, %arg2: i32) -> (i32, i32, i32) {
    %c0_i32 = arith.constant 0 : i32
    %c0_i32_0 = arith.constant 0 : i32
    %c0_i32_1 = arith.constant 0 : i32
    %c0_i32_2 = arith.constant 0 : i32
    return %c0_i32, %c0_i32_0, %c0_i32_1 : i32, i32, i32
  }
  func.func @transform_2(%arg0: i32, %arg1: i32, %arg2: i32) -> (i32, i32) {
    %c0_i32 = arith.constant 0 : i32
    %c0_i32_0 = arith.constant 0 : i32
    %c0_i32_1 = arith.constant 0 : i32
    return %c0_i32, %c0_i32_0 : i32, i32
  }
  func.func @transform_3(%arg0: i32, %arg1: i32, %arg2: i32) -> (i32, i32, i32, i32) {
    %c0_i32 = arith.constant 0 : i32
    %c0_i32_0 = arith.constant 0 : i32
    %c0_i32_1 = arith.constant 0 : i32
    return %arg0, %arg1, %c0_i32, %c0_i32_0 : i32, i32, i32, i32
  }
  func.func @transform_4(%arg0: i32, %arg1: i32, %arg2: i32) -> (i32, i32, i32, i32) {
    %c0_i32 = arith.constant 0 : i32
    %c0_i32_0 = arith.constant 0 : i32
    %c0_i32_1 = arith.constant 0 : i32
    return %arg0, %arg1, %c0_i32, %c0_i32_0 : i32, i32, i32, i32
  }
  func.func @transform_5(%arg0: i32, %arg1: i32, %arg2: i32) -> (i32, i32, i32, i32) {
    %c0_i32 = arith.constant 0 : i32
    %c0_i32_0 = arith.constant 0 : i32
    %c0_i32_1 = arith.constant 0 : i32
    return %arg0, %arg1, %c0_i32, %c0_i32_0 : i32, i32, i32, i32
  }
}

</mosaic_0001>

<bundles_post_ra>
// kernel: double_conv_forward.4
= control target key start
LH: loop header
LB: loop body
LE: loop exit
PB: predicated region body
PF: predicated region fallthrough
CT: control target
= control target key end

     0   :  { %s3152_s1 = inlined_call_operand.vmem [shape: f32[128,128], index: 1, kind: input, shape index: {}]   ;;  %s3153_s0 = inlined_call_operand.vmem [shape: f32[1024,128], index: 0, kind: input, shape index: {}]   ;;  %s3154_s2 = inlined_call_operand.vmem [shape: f32[1,128], index: 2, kind: input, shape index: {}]   ;;  %s3155_s3 = inlined_call_operand.vmem [shape: f32[1024,128], index: 3, kind: output, shape index: {0}]   ;;  %s3156_s4 = inlined_call_operand.vmem [shape: f32[1,1,128], index: 4, kind: output, shape index: {1}]   ;;  %s3157_s5 = inlined_call_operand.vmem [shape: f32[1,1,128], index: 5, kind: output, shape index: {2}]  }
   0x1   :  { %v160_v0 = vld [vmem:[%s3152_s1 + $0x78] sm:$0xff]  ;;  %v159_v1 = vld [vmem:[%s3152_s1 + $0x70] sm:$0xff]  ;;  %v158_v2 = vld [vmem:[%s3152_s1 + $0x68] sm:$0xff] }
   0x2   :  { %1554 = vmatprep.subr.mxu0 %v160_v0  ;;  %1778 = vmatprep.subr.mxu1 %v160_v0  ;;  %v157_v3 = vld [vmem:[%s3152_s1 + $0x60] sm:$0xff]  ;;  %v156_v5 = vld [vmem:[%s3152_s1 + $0x58] sm:$0xff]  ;;  %v155_v6 = vld [vmem:[%s3152_s1 + $0x50] sm:$0xff] }
   0x3   :  { %1555 = vmatpush3.msra.mxu0 %v160_v0  ;;  %1794 = vmatpush3.msra.mxu1 %v160_v0  ;;  %v17_v4 = vld [vmem:[%s3153_s0] sm:$0xff]  ;;  %v154_v7 = vld [vmem:[%s3152_s1 + $0x48] sm:$0xff]  ;;  %v152_v9 = vld [vmem:[%s3152_s1 + $0x38] sm:$0xff] }
   0x4   :  { %1556 = vmatprep.subr.mxu0 %v159_v1  ;;  %1779 = vmatprep.subr.mxu1 %v159_v1  ;;  %v153_v8 = vld [vmem:[%s3152_s1 + $0x40] sm:$0xff]  ;;  %v151_v10 = vld [vmem:[%s3152_s1 + $0x30] sm:$0xff]  ;;  %v150_v11 = vld [vmem:[%s3152_s1 + $0x28] sm:$0xff] }
   0x5   :  { %1557 = vmatpush3.msra.mxu0 %v159_v1  ;;  %1795 = vmatpush3.msra.mxu1 %v159_v1  ;;  %v149_v12 = vld [vmem:[%s3152_s1 + $0x20] sm:$0xff]  ;;  %v148_v13 = vld [vmem:[%s3152_s1 + $0x18] sm:$0xff]  ;;  %v147_v14 = vld [vmem:[%s3152_s1 + $0x10] sm:$0xff] }
   0x6   :  { %1558 = vmatprep.subr.mxu0 %v158_v2  ;;  %1780 = vmatprep.subr.mxu1 %v158_v2  ;;  %v146_v15 = vld [vmem:[%s3152_s1 + $0x8] sm:$0xff]  ;;  %v145_v16 = vld [vmem:[%s3152_s1] sm:$0xff]  ;;  %v19_v18 = vld [vmem:[%s3153_s0 + $0x10] sm:$0xff] }
   0x7   :  { %1559 = vmatpush3.msra.mxu0 %v158_v2  ;;  %1586 = vmatprep.mubr.f32.mxu0 %v17_v4  ;;  %v18_v17 = vld [vmem:[%s3153_s0 + $0x8] sm:$0xff]  ;;  %v81_v19 = vld [vmem:[%s3153_s0 + $0x200] sm:$0xff]  ;;  %v83_v21 = vld [vmem:[%s3153_s0 + $0x210] sm:$0xff] }
   0x8   :  { %1560 = vmatprep.subr.mxu0 %v157_v3  ;;  %1796 = vmatpush3.msra.mxu1 %v158_v2  ;;  %v82_v20 = vld [vmem:[%s3153_s0 + $0x208] sm:$0xff]  ;;  %v20_v22 = vld [vmem:[%s3153_s0 + $0x18] sm:$0xff]  ;;  %v21_v23 = vld [vmem:[%s3153_s0 + $0x20] sm:$0xff] }
   0x9   :  { %1561 = vmatpush3.msra.mxu0 %v157_v3  ;;  %1781 = vmatprep.subr.mxu1 %v157_v3  ;;  %v84_v24 = vld [vmem:[%s3153_s0 + $0x218] sm:$0xff]  ;;  %v85_v25 = vld [vmem:[%s3153_s0 + $0x220] sm:$0xff]  ;;  %v22_v26 = vld [vmem:[%s3153_s0 + $0x28] sm:$0xff] }
   0xa   :  { %1562 = vmatprep.subr.mxu0 %v156_v5  ;;  %1797 = vmatpush3.msra.mxu1 %v157_v3  ;;  %v23_v27 = vld [vmem:[%s3153_s0 + $0x30] sm:$0xff]  ;;  %v86_v28 = vld [vmem:[%s3153_s0 + $0x228] sm:$0xff]  ;;  %v24_v30 = vld [vmem:[%s3153_s0 + $0x38] sm:$0xff] }
   0xb   :  { %1563 = vmatpush3.msra.mxu0 %v156_v5  ;;  %1782 = vmatprep.subr.mxu1 %v156_v5  ;;  %v87_v29 = vld [vmem:[%s3153_s0 + $0x230] sm:$0xff]  ;;  %v25_v31 = vld [vmem:[%s3153_s0 + $0x40] sm:$0xff]  ;;  %v88_v32 = vld [vmem:[%s3153_s0 + $0x238] sm:$0xff] }
   0xc   :  { %1564 = vmatprep.subr.mxu0 %v155_v6  ;;  %1798 = vmatpush3.msra.mxu1 %v156_v5  ;;  %v89_v33 = vld [vmem:[%s3153_s0 + $0x240] sm:$0xff]  ;;  %v26_v34 = vld [vmem:[%s3153_s0 + $0x48] sm:$0xff]  ;;  %v27_v35 = vld [vmem:[%s3153_s0 + $0x50] sm:$0xff] }
   0xd   :  { %1565 = vmatpush3.msra.mxu0 %v155_v6  ;;  %1783 = vmatprep.subr.mxu1 %v155_v6  ;;  %v90_v36 = vld [vmem:[%s3153_s0 + $0x248] sm:$0xff]  ;;  %v91_v37 = vld [vmem:[%s3153_s0 + $0x250] sm:$0xff]  ;;  %v28_v38 = vld [vmem:[%s3153_s0 + $0x58] sm:$0xff] }
   0xe   :  { %1566 = vmatprep.subr.mxu0 %v154_v7  ;;  %1799 = vmatpush3.msra.mxu1 %v155_v6  ;;  %v29_v39 = vld [vmem:[%s3153_s0 + $0x60] sm:$0xff]  ;;  %v92_v40 = vld [vmem:[%s3153_s0 + $0x258] sm:$0xff]  ;;  %v30_v42 = vld [vmem:[%s3153_s0 + $0x68] sm:$0xff] }
   0xf   :  { %1567 = vmatpush3.msra.mxu0 %v154_v7  ;;  %1784 = vmatprep.subr.mxu1 %v154_v7  ;;  %v93_v41 = vld [vmem:[%s3153_s0 + $0x260] sm:$0xff]  ;;  %v31_v43 = vld [vmem:[%s3153_s0 + $0x70] sm:$0xff]  ;;  %v94_v44 = vld [vmem:[%s3153_s0 + $0x268] sm:$0xff] }
  0x10   :  { %1568 = vmatprep.subr.mxu0 %v153_v8  ;;  %1800 = vmatpush3.msra.mxu1 %v154_v7  ;;  %v95_v45 = vld [vmem:[%s3153_s0 + $0x270] sm:$0xff]  ;;  %v32_v46 = vld [vmem:[%s3153_s0 + $0x78] sm:$0xff]  ;;  %v33_v47 = vld [vmem:[%s3153_s0 + $0x80] sm:$0xff] }
  0x11   :  { %1569 = vmatpush3.msra.mxu0 %v153_v8  ;;  %1785 = vmatprep.subr.mxu1 %v153_v8  ;;  %v96_v48 = vld [vmem:[%s3153_s0 + $0x278] sm:$0xff]  ;;  %v97_v49 = vld [vmem:[%s3153_s0 + $0x280] sm:$0xff]  ;;  %v34_v50 = vld [vmem:[%s3153_s0 + $0x88] sm:$0xff] }
  0x12   :  { %1570 = vmatprep.subr.mxu0 %v152_v9  ;;  %1801 = vmatpush3.msra.mxu1 %v153_v8  ;;  %v35_v51 = vld [vmem:[%s3153_s0 + $0x90] sm:$0xff]  ;;  %v98_v52 = vld [vmem:[%s3153_s0 + $0x288] sm:$0xff]  ;;  %v36_v54 = vld [vmem:[%s3153_s0 + $0x98] sm:$0xff] }
  0x13   :  { %1571 = vmatpush3.msra.mxu0 %v152_v9  ;;  %1786 = vmatprep.subr.mxu1 %v152_v9  ;;  %v99_v53 = vld [vmem:[%s3153_s0 + $0x290] sm:$0xff]  ;;  %v37_v55 = vld [vmem:[%s3153_s0 + $0xa0] sm:$0xff]  ;;  %v100_v56 = vld [vmem:[%s3153_s0 + $0x298] sm:$0xff] }
  0x14   :  { %1572 = vmatprep.subr.mxu0 %v151_v10  ;;  %1802 = vmatpush3.msra.mxu1 %v152_v9  ;;  %v101_v57 = vld [vmem:[%s3153_s0 + $0x2a0] sm:$0xff]  ;;  %v38_v58 = vld [vmem:[%s3153_s0 + $0xa8] sm:$0xff]  ;;  %v39_v59 = vld [vmem:[%s3153_s0 + $0xb0] sm:$0xff] }
  0x15   :  { %1573 = vmatpush3.msra.mxu0 %v151_v10  ;;  %1787 = vmatprep.subr.mxu1 %v151_v10  ;;  %v102_v60 = vld [vmem:[%s3153_s0 + $0x2a8] sm:$0xff]  ;;  %v103_v61 = vld [vmem:[%s3153_s0 + $0x2b0] sm:$0xff]  ;;  %v40_v62 = vld [vmem:[%s3153_s0 + $0xb8] sm:$0xff] }
  0x16   :  { %1574 = vmatprep.subr.mxu0 %v150_v11  ;;  %1803 = vmatpush3.msra.mxu1 %v151_v10  ;;  %v41_v63 = vld [vmem:[%s3153_s0 + $0xc0] sm:$0xff]  ;;  %v104_v0 = vld [vmem:[%s3153_s0 + $0x2b8] sm:$0xff]  ;;  %v42_v2 = vld [vmem:[%s3153_s0 + $0xc8] sm:$0xff] }
  0x17   :  { %1575 = vmatpush3.msra.mxu0 %v150_v11  ;;  %1788 = vmatprep.subr.mxu1 %v150_v11  ;;  %v105_v1 = vld [vmem:[%s3153_s0 + $0x2c0] sm:$0xff]  ;;  %v43_v3 = vld [vmem:[%s3153_s0 + $0xd0] sm:$0xff]  ;;  %v106_v4 = vld [vmem:[%s3153_s0 + $0x2c8] sm:$0xff] }
  0x18   :  { %1576 = vmatprep.subr.mxu0 %v149_v12  ;;  %1804 = vmatpush3.msra.mxu1 %v150_v11  ;;  %v107_v5 = vld [vmem:[%s3153_s0 + $0x2d0] sm:$0xff]  ;;  %v44_v6 = vld [vmem:[%s3153_s0 + $0xd8] sm:$0xff]  ;;  %v45_v7 = vld [vmem:[%s3153_s0 + $0xe0] sm:$0xff] }
  0x19   :  { %1577 = vmatpush3.msra.mxu0 %v149_v12  ;;  %1789 = vmatprep.subr.mxu1 %v149_v12  ;;  %v108_v8 = vld [vmem:[%s3153_s0 + $0x2d8] sm:$0xff]  ;;  %v109_v9 = vld [vmem:[%s3153_s0 + $0x2e0] sm:$0xff]  ;;  %v46_v10 = vld [vmem:[%s3153_s0 + $0xe8] sm:$0xff] }
  0x1a   :  { %1578 = vmatprep.subr.mxu0 %v148_v13  ;;  %1805 = vmatpush3.msra.mxu1 %v149_v12  ;;  %v47_v11 = vld [vmem:[%s3153_s0 + $0xf0] sm:$0xff]  ;;  %v110_v12 = vld [vmem:[%s3153_s0 + $0x2e8] sm:$0xff] }
  0x1b   :  { %1579 = vmatpush3.msra.mxu0 %v148_v13  ;;  %1790 = vmatprep.subr.mxu1 %v148_v13 }
  0x1c   :  { %1580 = vmatprep.subr.mxu0 %v147_v14  ;;  %1806 = vmatpush3.msra.mxu1 %v148_v13  ;;  %v111_v13 = vld [vmem:[%s3153_s0 + $0x2f0] sm:$0xff] }
  0x1d   :  { %1581 = vmatpush3.msra.mxu0 %v147_v14  ;;  %1791 = vmatprep.subr.mxu1 %v147_v14 }
  0x1e   :  { %1582 = vmatprep.subr.mxu0 %v146_v15  ;;  %1807 = vmatpush3.msra.mxu1 %v147_v14  ;;  %v48_v14 = vld [vmem:[%s3153_s0 + $0xf8] sm:$0xff] }
  0x1f   :  { %1583 = vmatpush3.msra.mxu0 %v146_v15  ;;  %1792 = vmatprep.subr.mxu1 %v146_v15 }
  0x20   :  { %1584 = vmatprep.subr.mxu0 %v145_v16  ;;  %1808 = vmatpush3.msra.mxu1 %v146_v15  ;;  %v49_v15 = vld [vmem:[%s3153_s0 + $0x100] sm:$0xff] }
  0x21   :  { %1585 = vmatpush3.msra.mxu0 %v145_v16  ;;  %1793 = vmatprep.subr.mxu1 %v145_v16 }
  0x22   :  { %1587 = vmatmul.mubr.f32.vlgmr.msra.gmra.mxu0 %v18_v17  ;;  %1809 = vmatpush3.msra.mxu1 %v145_v16  ;;  %v112_v16 = vld [vmem:[%s3153_s0 + $0x2f8] sm:$0xff]  ;;  %v113_v17 = vld [vmem:[%s3153_s0 + $0x300] sm:$0xff] }
  0x23   :  { %1589 = vmatprep.mubr.f32.mxu0 %v19_v18  ;;  %1682 = vmatprep.mubr.f32.mxu1 %v81_v19  ;;  %v50_v18 = vld [vmem:[%s3153_s0 + $0x108] sm:$0xff]  ;;  %v51_v19 = vld [vmem:[%s3153_s0 + $0x110] sm:$0xff] }
  0x24   :  { %1683 = vmatmul.mubr.f32.vlgmr.msra.gmra.mxu1 %v82_v20  ;;  %v114_v20 = vld [vmem:[%s3153_s0 + $0x308] sm:$0xff] }
  0x25   :  { %1685 = vmatprep.mubr.f32.mxu1 %v83_v21  ;;  %v115_v21 = vld [vmem:[%s3153_s0 + $0x310] sm:$0xff] }
  0x26   :  { %1590 = vmatmul.mubr.f32.gmra.mxu0 %v20_v22  ;;  %v52_v22 = vld [vmem:[%s3153_s0 + $0x118] sm:$0xff] }
  0x27   :  { %1592 = vmatprep.mubr.f32.mxu0 %v21_v23  ;;  %v53_v23 = vld [vmem:[%s3153_s0 + $0x120] sm:$0xff] }
  0x28   :  { %1686 = vmatmul.mubr.f32.gmra.mxu1 %v84_v24  ;;  %v116_v24 = vld [vmem:[%s3153_s0 + $0x318] sm:$0xff] }
  0x29   :  { %1688 = vmatprep.mubr.f32.mxu1 %v85_v25  ;;  %v117_v25 = vld [vmem:[%s3153_s0 + $0x320] sm:$0xff] }
  0x2a   :  { %1593 = vmatmul.mubr.f32.gmra.mxu0 %v22_v26  ;;  %v54_v26 = vld [vmem:[%s3153_s0 + $0x128] sm:$0xff] }
  0x2b   :  { %1595 = vmatprep.mubr.f32.mxu0 %v23_v27  ;;  %v55_v27 = vld [vmem:[%s3153_s0 + $0x130] sm:$0xff] }
  0x2c   :  { %1689 = vmatmul.mubr.f32.gmra.mxu1 %v86_v28  ;;  %v118_v28 = vld [vmem:[%s3153_s0 + $0x328] sm:$0xff] }
  0x2d   :  { %1691 = vmatprep.mubr.f32.mxu1 %v87_v29  ;;  %v119_v29 = vld [vmem:[%s3153_s0 + $0x330] sm:$0xff] }
  0x2e   :  { %1596 = vmatmul.mubr.f32.gmra.mxu0 %v24_v30  ;;  %v56_v30 = vld [vmem:[%s3153_s0 + $0x138] sm:$0xff] }
  0x2f   :  { %1598 = vmatprep.mubr.f32.mxu0 %v25_v31  ;;  %v57_v31 = vld [vmem:[%s3153_s0 + $0x140] sm:$0xff] }
  0x30   :  { %1692 = vmatmul.mubr.f32.gmra.mxu1 %v88_v32  ;;  %v120_v32 = vld [vmem:[%s3153_s0 + $0x338] sm:$0xff] }
  0x31   :  { %1694 = vmatprep.mubr.f32.mxu1 %v89_v33  ;;  %v121_v33 = vld [vmem:[%s3153_s0 + $0x340] sm:$0xff] }
  0x32   :  { %1599 = vmatmul.mubr.f32.gmra.mxu0 %v26_v34  ;;  %v58_v34 = vld [vmem:[%s3153_s0 + $0x148] sm:$0xff] }
  0x33   :  { %1601 = vmatprep.mubr.f32.mxu0 %v27_v35  ;;  %v59_v35 = vld [vmem:[%s3153_s0 + $0x150] sm:$0xff] }
  0x34   :  { %1695 = vmatmul.mubr.f32.gmra.mxu1 %v90_v36  ;;  %v122_v36 = vld [vmem:[%s3153_s0 + $0x348] sm:$0xff] }
  0x35   :  { %1697 = vmatprep.mubr.f32.mxu1 %v91_v37  ;;  %v123_v37 = vld [vmem:[%s3153_s0 + $0x350] sm:$0xff] }
  0x36   :  { %1602 = vmatmul.mubr.f32.gmra.mxu0 %v28_v38  ;;  %v60_v38 = vld [vmem:[%s3153_s0 + $0x158] sm:$0xff] }
  0x37   :  { %1604 = vmatprep.mubr.f32.mxu0 %v29_v39  ;;  %v61_v39 = vld [vmem:[%s3153_s0 + $0x160] sm:$0xff] }
  0x38   :  { %1698 = vmatmul.mubr.f32.gmra.mxu1 %v92_v40  ;;  %v124_v40 = vld [vmem:[%s3153_s0 + $0x358] sm:$0xff] }
  0x39   :  { %1700 = vmatprep.mubr.f32.mxu1 %v93_v41  ;;  %v125_v41 = vld [vmem:[%s3153_s0 + $0x360] sm:$0xff] }
  0x3a   :  { %1605 = vmatmul.mubr.f32.gmra.mxu0 %v30_v42  ;;  %v62_v42 = vld [vmem:[%s3153_s0 + $0x168] sm:$0xff] }
  0x3b   :  { %1607 = vmatprep.mubr.f32.mxu0 %v31_v43  ;;  %v63_v43 = vld [vmem:[%s3153_s0 + $0x170] sm:$0xff] }
  0x3c   :  { %1701 = vmatmul.mubr.f32.gmra.mxu1 %v94_v44  ;;  %v126_v44 = vld [vmem:[%s3153_s0 + $0x368] sm:$0xff] }
  0x3d   :  { %1703 = vmatprep.mubr.f32.mxu1 %v95_v45  ;;  %v127_v45 = vld [vmem:[%s3153_s0 + $0x370] sm:$0xff] }
  0x3e   :  { %1608 = vmatmul.mubr.f32.gmra.mxu0 %v32_v46  ;;  %v64_v46 = vld [vmem:[%s3153_s0 + $0x178] sm:$0xff] }
  0x3f   :  { %1610 = vmatprep.mubr.f32.mxu0 %v33_v47  ;;  %v65_v47 = vld [vmem:[%s3153_s0 + $0x180] sm:$0xff] }
  0x40   :  { %1704 = vmatmul.mubr.f32.gmra.mxu1 %v96_v48  ;;  %v128_v48 = vld [vmem:[%s3153_s0 + $0x378] sm:$0xff] }
  0x41   :  { %1706 = vmatprep.mubr.f32.mxu1 %v97_v49  ;;  %v129_v49 = vld [vmem:[%s3153_s0 + $0x380] sm:$0xff] }
  0x42   :  { %1611 = vmatmul.mubr.f32.gmra.mxu0 %v34_v50  ;;  %v66_v50 = vld [vmem:[%s3153_s0 + $0x188] sm:$0xff] }
  0x43   :  { %1613 = vmatprep.mubr.f32.mxu0 %v35_v51  ;;  %v67_v51 = vld [vmem:[%s3153_s0 + $0x190] sm:$0xff] }
  0x44   :  { %1707 = vmatmul.mubr.f32.gmra.mxu1 %v98_v52  ;;  %v130_v52 = vld [vmem:[%s3153_s0 + $0x388] sm:$0xff] }
  0x45   :  { %1709 = vmatprep.mubr.f32.mxu1 %v99_v53  ;;  %v131_v53 = vld [vmem:[%s3153_s0 + $0x390] sm:$0xff] }
  0x46   :  { %1614 = vmatmul.mubr.f32.gmra.mxu0 %v36_v54  ;;  %v68_v54 = vld [vmem:[%s3153_s0 + $0x198] sm:$0xff] }
  0x47   :  { %1616 = vmatprep.mubr.f32.mxu0 %v37_v55  ;;  %v69_v55 = vld [vmem:[%s3153_s0 + $0x1a0] sm:$0xff] }
  0x48   :  { %1710 = vmatmul.mubr.f32.gmra.mxu1 %v100_v56  ;;  %v132_v56 = vld [vmem:[%s3153_s0 + $0x398] sm:$0xff] }
  0x49   :  { %1712 = vmatprep.mubr.f32.mxu1 %v101_v57  ;;  %v133_v57 = vld [vmem:[%s3153_s0 + $0x3a0] sm:$0xff] }
  0x4a   :  { %1617 = vmatmul.mubr.f32.gmra.mxu0 %v38_v58  ;;  %v70_v58 = vld [vmem:[%s3153_s0 + $0x1a8] sm:$0xff] }
  0x4b   :  { %1619 = vmatprep.mubr.f32.mxu0 %v39_v59  ;;  %v71_v59 = vld [vmem:[%s3153_s0 + $0x1b0] sm:$0xff] }
  0x4c   :  { %1713 = vmatmul.mubr.f32.gmra.mxu1 %v102_v60  ;;  %v134_v60 = vld [vmem:[%s3153_s0 + $0x3a8] sm:$0xff] }
  0x4d   :  { %1715 = vmatprep.mubr.f32.mxu1 %v103_v61  ;;  %v135_v61 = vld [vmem:[%s3153_s0 + $0x3b0] sm:$0xff] }
  0x4e   :  { %1620 = vmatmul.mubr.f32.gmra.mxu0 %v40_v62  ;;  %v72_v62 = vld [vmem:[%s3153_s0 + $0x1b8] sm:$0xff] }
  0x4f   :  { %1622 = vmatprep.mubr.f32.mxu0 %v41_v63  ;;  %v73_v63 = vld [vmem:[%s3153_s0 + $0x1c0] sm:$0xff] }
  0x50   :  { %1716 = vmatmul.mubr.f32.gmra.mxu1 %v104_v0  ;;  %v136_v0 = vld [vmem:[%s3153_s0 + $0x3b8] sm:$0xff] }
  0x51   :  { %1718 = vmatprep.mubr.f32.mxu1 %v105_v1  ;;  %v137_v1 = vld [vmem:[%s3153_s0 + $0x3c0] sm:$0xff] }
  0x52   :  { %1623 = vmatmul.mubr.f32.gmra.mxu0 %v42_v2  ;;  %v74_v2 = vld [vmem:[%s3153_s0 + $0x1c8] sm:$0xff] }
  0x53   :  { %1625 = vmatprep.mubr.f32.mxu0 %v43_v3  ;;  %v75_v3 = vld [vmem:[%s3153_s0 + $0x1d0] sm:$0xff] }
  0x54   :  { %1719 = vmatmul.mubr.f32.gmra.mxu1 %v106_v4  ;;  %v138_v4 = vld [vmem:[%s3153_s0 + $0x3c8] sm:$0xff] }
  0x55   :  { %1721 = vmatprep.mubr.f32.mxu1 %v107_v5  ;;  %v139_v5 = vld [vmem:[%s3153_s0 + $0x3d0] sm:$0xff] }
  0x56   :  { %1626 = vmatmul.mubr.f32.gmra.mxu0 %v44_v6  ;;  %v76_v6 = vld [vmem:[%s3153_s0 + $0x1d8] sm:$0xff] }
  0x57   :  { %1628 = vmatprep.mubr.f32.mxu0 %v45_v7  ;;  %v77_v7 = vld [vmem:[%s3153_s0 + $0x1e0] sm:$0xff] }
  0x58   :  { %1722 = vmatmul.mubr.f32.gmra.mxu1 %v108_v8  ;;  %v140_v8 = vld [vmem:[%s3153_s0 + $0x3d8] sm:$0xff] }
  0x59   :  { %1724 = vmatprep.mubr.f32.mxu1 %v109_v9  ;;  %v141_v9 = vld [vmem:[%s3153_s0 + $0x3e0] sm:$0xff] }
  0x5a   :  { %1629 = vmatmul.mubr.f32.gmra.mxu0 %v46_v10  ;;  %v78_v10 = vld [vmem:[%s3153_s0 + $0x1e8] sm:$0xff] }
  0x5b   :  { %1631 = vmatprep.mubr.f32.mxu0 %v47_v11  ;;  %v79_v11 = vld [vmem:[%s3153_s0 + $0x1f0] sm:$0xff] }
  0x5c   :  { %1725 = vmatmul.mubr.f32.gmra.mxu1 %v110_v12  ;;  %v142_v12 = vld [vmem:[%s3153_s0 + $0x3e8] sm:$0xff] }
  0x5d   :  { %1727 = vmatprep.mubr.f32.mxu1 %v111_v13  ;;  %v143_v13 = vld [vmem:[%s3153_s0 + $0x3f0] sm:$0xff] }
  0x5e   :  { %1632 = vmatmul.mubr.f32.gmra.mxu0 %v48_v14  ;;  %v80_v14 = vld [vmem:[%s3153_s0 + $0x1f8] sm:$0xff] }
  0x5f   :  { %1634 = vmatprep.mubr.f32.mxu0 %v49_v15  ;;  %v144_v15 = vld [vmem:[%s3153_s0 + $0x3f8] sm:$0xff] }
  0x60   :  { %1728 = vmatmul.mubr.f32.gmra.mxu1 %v112_v16  ;;  %v2285_v16 = vld [vmem:[%s3154_s2] ss:$0 sm:$0xff] }
  0x61   :  { %1730 = vmatprep.mubr.f32.mxu1 %v113_v17 }
  0x62   :  { %1635 = vmatmul.mubr.f32.gmra.mxu0 %v50_v18 }
  0x63   :  { %1637 = vmatprep.mubr.f32.mxu0 %v51_v19 }
  0x64   :  { %1731 = vmatmul.mubr.f32.gmra.mxu1 %v114_v20 }
  0x65   :  { %1733 = vmatprep.mubr.f32.mxu1 %v115_v21 }
  0x66   :  { %1638 = vmatmul.mubr.f32.gmra.mxu0 %v52_v22 }
  0x67   :  { %1640 = vmatprep.mubr.f32.mxu0 %v53_v23 }
  0x68   :  { %1734 = vmatmul.mubr.f32.gmra.mxu1 %v116_v24 }
  0x69   :  { %1736 = vmatprep.mubr.f32.mxu1 %v117_v25 }
  0x6a   :  { %1641 = vmatmul.mubr.f32.gmra.mxu0 %v54_v26 }
  0x6b   :  { %1643 = vmatprep.mubr.f32.mxu0 %v55_v27 }
  0x6c   :  { %1737 = vmatmul.mubr.f32.gmra.mxu1 %v118_v28 }
  0x6d   :  { %1739 = vmatprep.mubr.f32.mxu1 %v119_v29 }
  0x6e   :  { %1644 = vmatmul.mubr.f32.gmra.mxu0 %v56_v30 }
  0x6f   :  { %1646 = vmatprep.mubr.f32.mxu0 %v57_v31 }
  0x70   :  { %1740 = vmatmul.mubr.f32.gmra.mxu1 %v120_v32 }
  0x71   :  { %1742 = vmatprep.mubr.f32.mxu1 %v121_v33 }
  0x72   :  { %1647 = vmatmul.mubr.f32.gmra.mxu0 %v58_v34 }
  0x73   :  { %1649 = vmatprep.mubr.f32.mxu0 %v59_v35 }
  0x74   :  { %1743 = vmatmul.mubr.f32.gmra.mxu1 %v122_v36 }
  0x75   :  { %1745 = vmatprep.mubr.f32.mxu1 %v123_v37 }
  0x76   :  { %1650 = vmatmul.mubr.f32.gmra.mxu0 %v60_v38 }
  0x77   :  { %1652 = vmatprep.mubr.f32.mxu0 %v61_v39 }
  0x78   :  { %1746 = vmatmul.mubr.f32.gmra.mxu1 %v124_v40 }
  0x79   :  { %1748 = vmatprep.mubr.f32.mxu1 %v125_v41 }
  0x7a   :  { %1653 = vmatmul.mubr.f32.gmra.mxu0 %v62_v42 }
  0x7b   :  { %1655 = vmatprep.mubr.f32.mxu0 %v63_v43 }
  0x7c   :  { %1749 = vmatmul.mubr.f32.gmra.mxu1 %v126_v44 }
  0x7d   :  { %1751 = vmatprep.mubr.f32.mxu1 %v127_v45 }
  0x7e   :  { %1656 = vmatmul.mubr.f32.gmra.mxu0 %v64_v46 }
  0x7f   :  { %1658 = vmatprep.mubr.f32.mxu0 %v65_v47 }
  0x80   :  { %1752 = vmatmul.mubr.f32.gmra.mxu1 %v128_v48 }
  0x81   :  { %1754 = vmatprep.mubr.f32.mxu1 %v129_v49 }
  0x82   :  { %1659 = vmatmul.mubr.f32.gmra.mxu0 %v66_v50 }
  0x83   :  { %1661 = vmatprep.mubr.f32.mxu0 %v67_v51 }
  0x84   :  { %1755 = vmatmul.mubr.f32.gmra.mxu1 %v130_v52 }
  0x85   :  { %1757 = vmatprep.mubr.f32.mxu1 %v131_v53 }
  0x86   :  { %1662 = vmatmul.mubr.f32.gmra.mxu0 %v68_v54 }
  0x87   :  { %1664 = vmatprep.mubr.f32.mxu0 %v69_v55 }
  0x88   :  { %1758 = vmatmul.mubr.f32.gmra.mxu1 %v132_v56 }
  0x89   :  { %1760 = vmatprep.mubr.f32.mxu1 %v133_v57 }
  0x8a   :  { %1665 = vmatmul.mubr.f32.gmra.mxu0 %v70_v58 }
  0x8b   :  { %1667 = vmatprep.mubr.f32.mxu0 %v71_v59 }
  0x8c   :  { %1761 = vmatmul.mubr.f32.gmra.mxu1 %v134_v60 }
  0x8d   :  { %1763 = vmatprep.mubr.f32.mxu1 %v135_v61 }
  0x8e   :  { %1668 = vmatmul.mubr.f32.gmra.mxu0 %v72_v62 }
  0x8f   :  { %1670 = vmatprep.mubr.f32.mxu0 %v73_v63 }
  0x90   :  { %1764 = vmatmul.mubr.f32.gmra.mxu1 %v136_v0 }
  0x91   :  { %1766 = vmatprep.mubr.f32.mxu1 %v137_v1 }
  0x92   :  { %1671 = vmatmul.mubr.f32.gmra.mxu0 %v74_v2 }
  0x93   :  { %1673 = vmatprep.mubr.f32.mxu0 %v75_v3 }
  0x94   :  { %1767 = vmatmul.mubr.f32.gmra.mxu1 %v138_v4 }
  0x95   :  { %1769 = vmatprep.mubr.f32.mxu1 %v139_v5 }
  0x96   :  { %1674 = vmatmul.mubr.f32.gmra.mxu0 %v76_v6 }
  0x97   :  { %1676 = vmatprep.mubr.f32.mxu0 %v77_v7 }
  0x98   :  { %1770 = vmatmul.mubr.f32.gmra.mxu1 %v140_v8 }
  0x99   :  { %1772 = vmatprep.mubr.f32.mxu1 %v141_v9 }
  0x9a   :  { %1677 = vmatmul.mubr.f32.gmra.mxu0 %v78_v10 }
  0x9b   :  { %1679 = vmatprep.mubr.f32.mxu0 %v79_v11 }
  0x9c   :  { %1773 = vmatmul.mubr.f32.gmra.mxu1 %v142_v12 }
  0x9d   :  { %1775 = vmatprep.mubr.f32.mxu1 %v143_v13 }
  0x9e   :  { %1680 = vmatmul.mubr.f32.gmra.mxu0 %v80_v14 }
  0xa0   :  { %1776 = vmatmul.mubr.f32.gmra.mxu1 %v144_v15 }
  0xe2   :  { %v1588_v17 = vpop.f32.mrf.mxu0 }
  0xe3   :  { %v240_v18 = vadd.f32 %v1588_v17, %v2285_v16 }
  0xe4   :  { %v234_v19 = vpop.f32.mrf.mxu0  ;;  %v1684_v20 = vpop.f32.mrf.mxu1 }
  0xe5   :  { %874 = vst [vmem:[%s3155_s3 + $0x8] sm:$0xff] %v240_v18  ;;  %v235_v21 = vadd.f32 %v2285_v16, %v234_v19  ;;  %v560_v22 = vadd.f32 %v1684_v20, %v2285_v16  ;;  %v1136_v30 = vmul.f32 %v240_v18, %v240_v18 }
  0xe6   :  { %v1591_v23 = vpop.f32.mrf.mxu0  ;;  %v554_v24 = vpop.f32.mrf.mxu1 }
  0xe7   :  { %873 = vst [vmem:[%s3155_s3] sm:$0xff] %v235_v21  ;;  %v1135_v25 = vmul.f32 %v235_v21, %v235_v21  ;;  %v250_v26 = vadd.f32 %v1591_v23, %v2285_v16  ;;  %938 = vst [vmem:[%s3155_s3 + $0x208] sm:$0xff] %v560_v22  ;;  %v555_v28 = vadd.f32 %v2285_v16, %v554_v24 }
  0xe8   :  { %v244_v27 = vpop.f32.mrf.mxu0  ;;  %v1687_v29 = vpop.f32.mrf.mxu1  ;;  %v1001_v31 = vadd.f32 %v240_v18, %v235_v21 }
  0xe9   :  { %876 = vst [vmem:[%s3155_s3 + $0x18] sm:$0xff] %v250_v26  ;;  %v245_v32 = vadd.f32 %v2285_v16, %v244_v27  ;;  %v570_v33 = vadd.f32 %v1687_v29, %v2285_v16  ;;  %937 = vst [vmem:[%s3155_s3 + $0x200] sm:$0xff] %v555_v28  ;;  %v1263_v36 = vadd.f32 %v1136_v30, %v1135_v25 }
  0xea   :  { %v1594_v34 = vpop.f32.mrf.mxu0  ;;  %v564_v35 = vpop.f32.mrf.mxu1  ;;  %v1138_v43 = vmul.f32 %v250_v26, %v250_v26 }
  0xeb   :  { %875 = vst [vmem:[%s3155_s3 + $0x10] sm:$0xff] %v245_v32  ;;  %v1002_v37 = vadd.f32 %v1001_v31, %v245_v32  ;;  %v1137_v38 = vmul.f32 %v245_v32, %v245_v32  ;;  %v260_v39 = vadd.f32 %v1594_v34, %v2285_v16  ;;  %940 = vst [vmem:[%s3155_s3 + $0x218] sm:$0xff] %v570_v33 }
  0xec   :  { %v254_v40 = vpop.f32.mrf.mxu0  ;;  %v565_v41 = vadd.f32 %v2285_v16, %v564_v35  ;;  %v1690_v42 = vpop.f32.mrf.mxu1 }
  0xed   :  { %v1003_v44 = vadd.f32 %v1002_v37, %v250_v26  ;;  %v1264_v45 = vadd.f32 %v1263_v36, %v1137_v38  ;;  %878 = vst [vmem:[%s3155_s3 + $0x28] sm:$0xff] %v260_v39  ;;  %v255_v46 = vadd.f32 %v2285_v16, %v254_v40  ;;  %v580_v48 = vadd.f32 %v1690_v42, %v2285_v16 }
  0xee   :  { %v1597_v47 = vpop.f32.mrf.mxu0  ;;  %939 = vst [vmem:[%s3155_s3 + $0x210] sm:$0xff] %v565_v41  ;;  %v574_v49 = vpop.f32.mrf.mxu1  ;;  %v1140_v57 = vmul.f32 %v260_v39, %v260_v39 }
  0xef   :  { %v1265_v50 = vadd.f32 %v1264_v45, %v1138_v43  ;;  %877 = vst [vmem:[%s3155_s3 + $0x20] sm:$0xff] %v255_v46  ;;  %v1004_v51 = vadd.f32 %v1003_v44, %v255_v46  ;;  %v1139_v52 = vmul.f32 %v255_v46, %v255_v46  ;;  %v270_v53 = vadd.f32 %v1597_v47, %v2285_v16 }
  0xf0   :  { %v264_v54 = vpop.f32.mrf.mxu0  ;;  %942 = vst [vmem:[%s3155_s3 + $0x228] sm:$0xff] %v580_v48  ;;  %v575_v55 = vadd.f32 %v2285_v16, %v574_v49  ;;  %v1693_v56 = vpop.f32.mrf.mxu1 }
  0xf1   :  { %v1005_v58 = vadd.f32 %v1004_v51, %v260_v39  ;;  %v1266_v59 = vadd.f32 %v1265_v50, %v1139_v52  ;;  %880 = vst [vmem:[%s3155_s3 + $0x38] sm:$0xff] %v270_v53  ;;  %v265_v60 = vadd.f32 %v2285_v16, %v264_v54  ;;  %v590_v62 = vadd.f32 %v1693_v56, %v2285_v16 }
  0xf2   :  { %v1600_v61 = vpop.f32.mrf.mxu0  ;;  %941 = vst [vmem:[%s3155_s3 + $0x220] sm:$0xff] %v575_v55  ;;  %v584_v63 = vpop.f32.mrf.mxu1  ;;  %v1142_v7 = vmul.f32 %v270_v53, %v270_v53 }
  0xf3   :  { %v1267_v0 = vadd.f32 %v1266_v59, %v1140_v57  ;;  %879 = vst [vmem:[%s3155_s3 + $0x30] sm:$0xff] %v265_v60  ;;  %v1006_v1 = vadd.f32 %v1005_v58, %v265_v60  ;;  %v1141_v2 = vmul.f32 %v265_v60, %v265_v60  ;;  %v280_v3 = vadd.f32 %v1600_v61, %v2285_v16 }
  0xf4   :  { %v274_v4 = vpop.f32.mrf.mxu0  ;;  %944 = vst [vmem:[%s3155_s3 + $0x238] sm:$0xff] %v590_v62  ;;  %v585_v5 = vadd.f32 %v2285_v16, %v584_v63  ;;  %v1696_v6 = vpop.f32.mrf.mxu1 }
  0xf5   :  { %v1007_v8 = vadd.f32 %v1006_v1, %v270_v53  ;;  %v1268_v9 = vadd.f32 %v1267_v0, %v1141_v2  ;;  %882 = vst [vmem:[%s3155_s3 + $0x48] sm:$0xff] %v280_v3  ;;  %v275_v10 = vadd.f32 %v2285_v16, %v274_v4  ;;  %v600_v12 = vadd.f32 %v1696_v6, %v2285_v16 }
  0xf6   :  { %v1603_v11 = vpop.f32.mrf.mxu0  ;;  %943 = vst [vmem:[%s3155_s3 + $0x230] sm:$0xff] %v585_v5  ;;  %v594_v13 = vpop.f32.mrf.mxu1  ;;  %v1144_v22 = vmul.f32 %v280_v3, %v280_v3 }
  0xf7   :  { %v1269_v14 = vadd.f32 %v1268_v9, %v1142_v7  ;;  %881 = vst [vmem:[%s3155_s3 + $0x40] sm:$0xff] %v275_v10  ;;  %v1008_v15 = vadd.f32 %v1007_v8, %v275_v10  ;;  %v1143_v17 = vmul.f32 %v275_v10, %v275_v10  ;;  %v290_v18 = vadd.f32 %v1603_v11, %v2285_v16 }
  0xf8   :  { %v284_v19 = vpop.f32.mrf.mxu0  ;;  %946 = vst [vmem:[%s3155_s3 + $0x248] sm:$0xff] %v600_v12  ;;  %v2365_v20 = vadd.f32 %v2285_v16, %v594_v13  ;;  %v1699_v21 = vpop.f32.mrf.mxu1 }
  0xf9   :  { %v1009_v23 = vadd.f32 %v1008_v15, %v280_v3  ;;  %v1270_v24 = vadd.f32 %v1269_v14, %v1143_v17  ;;  %884 = vst [vmem:[%s3155_s3 + $0x58] sm:$0xff] %v290_v18  ;;  %v285_v25 = vadd.f32 %v2285_v16, %v284_v19  ;;  %v2376_v27 = vadd.f32 %v1699_v21, %v2285_v16 }
  0xfa   :  { %v1606_v26 = vpop.f32.mrf.mxu0  ;;  %945 = vst [vmem:[%s3155_s3 + $0x240] sm:$0xff] %v2365_v20  ;;  %v604_v28 = vpop.f32.mrf.mxu1  ;;  %v1146_v36 = vmul.f32 %v290_v18, %v290_v18 }
  0xfb   :  { %v1271_v29 = vadd.f32 %v1270_v24, %v1144_v22  ;;  %883 = vst [vmem:[%s3155_s3 + $0x50] sm:$0xff] %v285_v25  ;;  %v1010_v30 = vadd.f32 %v1009_v23, %v285_v25  ;;  %v1145_v31 = vmul.f32 %v285_v25, %v285_v25  ;;  %v300_v32 = vadd.f32 %v1606_v26, %v2285_v16 }
  0xfc   :  { %v294_v33 = vpop.f32.mrf.mxu0  ;;  %948 = vst [vmem:[%s3155_s3 + $0x258] sm:$0xff] %v2376_v27  ;;  %v2387_v34 = vadd.f32 %v2285_v16, %v604_v28  ;;  %v1702_v35 = vpop.f32.mrf.mxu1 }
  0xfd   :  { %v1011_v37 = vadd.f32 %v1010_v30, %v290_v18  ;;  %v1272_v38 = vadd.f32 %v1271_v29, %v1145_v31  ;;  %886 = vst [vmem:[%s3155_s3 + $0x68] sm:$0xff] %v300_v32  ;;  %v295_v39 = vadd.f32 %v2285_v16, %v294_v33  ;;  %v2398_v41 = vadd.f32 %v1702_v35, %v2285_v16 }
  0xfe   :  { %v1609_v40 = vpop.f32.mrf.mxu0  ;;  %947 = vst [vmem:[%s3155_s3 + $0x250] sm:$0xff] %v2387_v34  ;;  %v614_v42 = vpop.f32.mrf.mxu1  ;;  %v1148_v50 = vmul.f32 %v300_v32, %v300_v32 }
  0xff   :  { %v1273_v43 = vadd.f32 %v1272_v38, %v1146_v36  ;;  %885 = vst [vmem:[%s3155_s3 + $0x60] sm:$0xff] %v295_v39  ;;  %v1012_v44 = vadd.f32 %v1011_v37, %v295_v39  ;;  %v1147_v45 = vmul.f32 %v295_v39, %v295_v39  ;;  %v310_v46 = vadd.f32 %v1609_v40, %v2285_v16 }
 0x100   :  { %v304_v47 = vpop.f32.mrf.mxu0  ;;  %950 = vst [vmem:[%s3155_s3 + $0x268] sm:$0xff] %v2398_v41  ;;  %v2409_v48 = vadd.f32 %v2285_v16, %v614_v42  ;;  %v1705_v49 = vpop.f32.mrf.mxu1 }
 0x101   :  { %v1013_v51 = vadd.f32 %v1012_v44, %v300_v32  ;;  %v1274_v52 = vadd.f32 %v1273_v43, %v1147_v45  ;;  %888 = vst [vmem:[%s3155_s3 + $0x78] sm:$0xff] %v310_v46  ;;  %v305_v53 = vadd.f32 %v2285_v16, %v304_v47  ;;  %v2420_v55 = vadd.f32 %v1705_v49, %v2285_v16 }
 0x102   :  { %v1612_v54 = vpop.f32.mrf.mxu0  ;;  %949 = vst [vmem:[%s3155_s3 + $0x260] sm:$0xff] %v2409_v48  ;;  %v624_v56 = vpop.f32.mrf.mxu1  ;;  %v1150_v0 = vmul.f32 %v310_v46, %v310_v46 }
 0x103   :  { %v1275_v57 = vadd.f32 %v1274_v52, %v1148_v50  ;;  %887 = vst [vmem:[%s3155_s3 + $0x70] sm:$0xff] %v305_v53  ;;  %v1014_v58 = vadd.f32 %v1013_v51, %v305_v53  ;;  %v1149_v59 = vmul.f32 %v305_v53, %v305_v53  ;;  %v320_v60 = vadd.f32 %v1612_v54, %v2285_v16 }
 0x104   :  { %v314_v61 = vpop.f32.mrf.mxu0  ;;  %952 = vst [vmem:[%s3155_s3 + $0x278] sm:$0xff] %v2420_v55  ;;  %v2431_v62 = vadd.f32 %v2285_v16, %v624_v56  ;;  %v1708_v63 = vpop.f32.mrf.mxu1 }
 0x105   :  { %v1015_v1 = vadd.f32 %v1014_v58, %v310_v46  ;;  %v1276_v2 = vadd.f32 %v1275_v57, %v1149_v59  ;;  %890 = vst [vmem:[%s3155_s3 + $0x88] sm:$0xff] %v320_v60  ;;  %v315_v3 = vadd.f32 %v2285_v16, %v314_v61  ;;  %v2442_v5 = vadd.f32 %v1708_v63, %v2285_v16 }
 0x106   :  { %v1615_v4 = vpop.f32.mrf.mxu0  ;;  %951 = vst [vmem:[%s3155_s3 + $0x270] sm:$0xff] %v2431_v62  ;;  %v634_v6 = vpop.f32.mrf.mxu1  ;;  %v1152_v14 = vmul.f32 %v320_v60, %v320_v60 }
 0x107   :  { %v1277_v7 = vadd.f32 %v1276_v2, %v1150_v0  ;;  %889 = vst [vmem:[%s3155_s3 + $0x80] sm:$0xff] %v315_v3  ;;  %v1016_v8 = vadd.f32 %v1015_v1, %v315_v3  ;;  %v1151_v9 = vmul.f32 %v315_v3, %v315_v3  ;;  %v330_v10 = vadd.f32 %v1615_v4, %v2285_v16 }
 0x108   :  { %v324_v11 = vpop.f32.mrf.mxu0  ;;  %954 = vst [vmem:[%s3155_s3 + $0x288] sm:$0xff] %v2442_v5  ;;  %v2453_v12 = vadd.f32 %v2285_v16, %v634_v6  ;;  %v1711_v13 = vpop.f32.mrf.mxu1 }
 0x109   :  { %v1017_v15 = vadd.f32 %v1016_v8, %v320_v60  ;;  %v1278_v17 = vadd.f32 %v1277_v7, %v1151_v9  ;;  %892 = vst [vmem:[%s3155_s3 + $0x98] sm:$0xff] %v330_v10  ;;  %v325_v18 = vadd.f32 %v2285_v16, %v324_v11  ;;  %v2464_v21 = vadd.f32 %v1711_v13, %v2285_v16 }
 0x10a   :  { %v1618_v19 = vpop.f32.mrf.mxu0  ;;  %953 = vst [vmem:[%s3155_s3 + $0x280] sm:$0xff] %v2453_v12  ;;  %v644_v22 = vpop.f32.mrf.mxu1  ;;  %v1154_v31 = vmul.f32 %v330_v10, %v330_v10 }
 0x10b   :  { %v1279_v23 = vadd.f32 %v1278_v17, %v1152_v14  ;;  %891 = vst [vmem:[%s3155_s3 + $0x90] sm:$0xff] %v325_v18  ;;  %v1018_v24 = vadd.f32 %v1017_v15, %v325_v18  ;;  %v1153_v25 = vmul.f32 %v325_v18, %v325_v18  ;;  %v340_v26 = vadd.f32 %v1618_v19, %v2285_v16 }
 0x10c   :  { %v334_v28 = vpop.f32.mrf.mxu0  ;;  %956 = vst [vmem:[%s3155_s3 + $0x298] sm:$0xff] %v2464_v21  ;;  %v2475_v29 = vadd.f32 %v2285_v16, %v644_v22  ;;  %v1714_v30 = vpop.f32.mrf.mxu1 }
 0x10d   :  { %v1019_v32 = vadd.f32 %v1018_v24, %v330_v10  ;;  %v1280_v33 = vadd.f32 %v1279_v23, %v1153_v25  ;;  %894 = vst [vmem:[%s3155_s3 + $0xa8] sm:$0xff] %v340_v26  ;;  %v335_v35 = vadd.f32 %v2285_v16, %v334_v28  ;;  %v2486_v37 = vadd.f32 %v1714_v30, %v2285_v16 }
 0x10e   :  { %v1621_v36 = vpop.f32.mrf.mxu0  ;;  %955 = vst [vmem:[%s3155_s3 + $0x290] sm:$0xff] %v2475_v29  ;;  %v654_v38 = vpop.f32.mrf.mxu1  ;;  %v1156_v47 = vmul.f32 %v340_v26, %v340_v26 }
 0x10f   :  { %v1281_v39 = vadd.f32 %v1280_v33, %v1154_v31  ;;  %893 = vst [vmem:[%s3155_s3 + $0xa0] sm:$0xff] %v335_v35  ;;  %v1020_v40 = vadd.f32 %v1019_v32, %v335_v35  ;;  %v1155_v42 = vmul.f32 %v335_v35, %v335_v35  ;;  %v350_v43 = vadd.f32 %v1621_v36, %v2285_v16 }
 0x110   :  { %v344_v44 = vpop.f32.mrf.mxu0  ;;  %958 = vst [vmem:[%s3155_s3 + $0x2a8] sm:$0xff] %v2486_v37  ;;  %v2497_v45 = vadd.f32 %v2285_v16, %v654_v38  ;;  %v1717_v46 = vpop.f32.mrf.mxu1 }
 0x111   :  { %v1021_v49 = vadd.f32 %v1020_v40, %v340_v26  ;;  %v1282_v50 = vadd.f32 %v1281_v39, %v1155_v42  ;;  %896 = vst [vmem:[%s3155_s3 + $0xb8] sm:$0xff] %v350_v43  ;;  %v345_v51 = vadd.f32 %v2285_v16, %v344_v44  ;;  %v2508_v53 = vadd.f32 %v1717_v46, %v2285_v16 }
 0x112   :  { %v1624_v52 = vpop.f32.mrf.mxu0  ;;  %957 = vst [vmem:[%s3155_s3 + $0x2a0] sm:$0xff] %v2497_v45  ;;  %v664_v54 = vpop.f32.mrf.mxu1  ;;  %v1158_v0 = vmul.f32 %v350_v43, %v350_v43 }
 0x113   :  { %v1283_v56 = vadd.f32 %v1282_v50, %v1156_v47  ;;  %895 = vst [vmem:[%s3155_s3 + $0xb0] sm:$0xff] %v345_v51  ;;  %v1022_v57 = vadd.f32 %v1021_v49, %v345_v51  ;;  %v1157_v58 = vmul.f32 %v345_v51, %v345_v51  ;;  %v360_v59 = vadd.f32 %v1624_v52, %v2285_v16 }
 0x114   :  { %v354_v60 = vpop.f32.mrf.mxu0  ;;  %960 = vst [vmem:[%s3155_s3 + $0x2b8] sm:$0xff] %v2508_v53  ;;  %v2519_v61 = vadd.f32 %v2285_v16, %v664_v54  ;;  %v1720_v63 = vpop.f32.mrf.mxu1 }
 0x115   :  { %v1023_v1 = vadd.f32 %v1022_v57, %v350_v43  ;;  %v1284_v2 = vadd.f32 %v1283_v56, %v1157_v58  ;;  %898 = vst [vmem:[%s3155_s3 + $0xc8] sm:$0xff] %v360_v59  ;;  %v355_v3 = vadd.f32 %v2285_v16, %v354_v60  ;;  %v2530_v6 = vadd.f32 %v1720_v63, %v2285_v16 }
 0x116   :  { %v1627_v4 = vpop.f32.mrf.mxu0  ;;  %959 = vst [vmem:[%s3155_s3 + $0x2b0] sm:$0xff] %v2519_v61  ;;  %v674_v7 = vpop.f32.mrf.mxu1  ;;  %v1160_v17 = vmul.f32 %v360_v59, %v360_v59 }
 0x117   :  { %v1285_v8 = vadd.f32 %v1284_v2, %v1158_v0  ;;  %897 = vst [vmem:[%s3155_s3 + $0xc0] sm:$0xff] %v355_v3  ;;  %v1024_v9 = vadd.f32 %v1023_v1, %v355_v3  ;;  %v1159_v10 = vmul.f32 %v355_v3, %v355_v3  ;;  %v370_v11 = vadd.f32 %v1627_v4, %v2285_v16 }
 0x118   :  { %v364_v13 = vpop.f32.mrf.mxu0  ;;  %962 = vst [vmem:[%s3155_s3 + $0x2c8] sm:$0xff] %v2530_v6  ;;  %v2541_v14 = vadd.f32 %v2285_v16, %v674_v7  ;;  %v1723_v15 = vpop.f32.mrf.mxu1 }
 0x119   :  { %v1025_v18 = vadd.f32 %v1024_v9, %v360_v59  ;;  %v1286_v19 = vadd.f32 %v1285_v8, %v1159_v10  ;;  %900 = vst [vmem:[%s3155_s3 + $0xd8] sm:$0xff] %v370_v11  ;;  %v365_v22 = vadd.f32 %v2285_v16, %v364_v13  ;;  %v2552_v24 = vadd.f32 %v1723_v15, %v2285_v16 }
 0x11a   :  { %v1630_v23 = vpop.f32.mrf.mxu0  ;;  %961 = vst [vmem:[%s3155_s3 + $0x2c0] sm:$0xff] %v2541_v14  ;;  %v684_v25 = vpop.f32.mrf.mxu1  ;;  %v1162_v36 = vmul.f32 %v370_v11, %v370_v11 }
 0x11b   :  { %v1287_v26 = vadd.f32 %v1286_v19, %v1160_v17  ;;  %899 = vst [vmem:[%s3155_s3 + $0xd0] sm:$0xff] %v365_v22  ;;  %v1026_v28 = vadd.f32 %v1025_v18, %v365_v22  ;;  %v1161_v30 = vmul.f32 %v365_v22, %v365_v22  ;;  %v380_v31 = vadd.f32 %v1630_v23, %v2285_v16 }
 0x11c   :  { %v374_v32 = vpop.f32.mrf.mxu0  ;;  %964 = vst [vmem:[%s3155_s3 + $0x2d8] sm:$0xff] %v2552_v24  ;;  %v2563_v33 = vadd.f32 %v2285_v16, %v684_v25  ;;  %v1726_v35 = vpop.f32.mrf.mxu1 }
 0x11d   :  { %v1027_v38 = vadd.f32 %v1026_v28, %v370_v11  ;;  %v1288_v39 = vadd.f32 %v1287_v26, %v1161_v30  ;;  %902 = vst [vmem:[%s3155_s3 + $0xe8] sm:$0xff] %v380_v31  ;;  %v375_v40 = vadd.f32 %v2285_v16, %v374_v32  ;;  %v2574_v43 = vadd.f32 %v1726_v35, %v2285_v16 }
 0x11e   :  { %v1633_v42 = vpop.f32.mrf.mxu0  ;;  %963 = vst [vmem:[%s3155_s3 + $0x2d0] sm:$0xff] %v2563_v33  ;;  %v694_v44 = vpop.f32.mrf.mxu1  ;;  %v1164_v56 = vmul.f32 %v380_v31, %v380_v31 }
 0x11f   :  { %v1289_v46 = vadd.f32 %v1288_v39, %v1162_v36  ;;  %901 = vst [vmem:[%s3155_s3 + $0xe0] sm:$0xff] %v375_v40  ;;  %v1028_v47 = vadd.f32 %v1027_v38, %v375_v40  ;;  %v1163_v49 = vmul.f32 %v375_v40, %v375_v40  ;;  %v390_v50 = vadd.f32 %v1633_v42, %v2285_v16 }
 0x120   :  { %v384_v51 = vpop.f32.mrf.mxu0  ;;  %966 = vst [vmem:[%s3155_s3 + $0x2e8] sm:$0xff] %v2574_v43  ;;  %v2585_v52 = vadd.f32 %v2285_v16, %v694_v44  ;;  %v1729_v54 = vpop.f32.mrf.mxu1 }
 0x121   :  { %v1029_v57 = vadd.f32 %v1028_v47, %v380_v31  ;;  %v1290_v58 = vadd.f32 %v1289_v46, %v1163_v49  ;;  %904 = vst [vmem:[%s3155_s3 + $0xf8] sm:$0xff] %v390_v50  ;;  %v385_v59 = vadd.f32 %v2285_v16, %v384_v51  ;;  %v2596_v63 = vadd.f32 %v1729_v54, %v2285_v16 }
 0x122   :  { %v1636_v60 = vpop.f32.mrf.mxu0  ;;  %965 = vst [vmem:[%s3155_s3 + $0x2e0] sm:$0xff] %v2585_v52  ;;  %v704_v0 = vpop.f32.mrf.mxu1  ;;  %v1166_v10 = vmul.f32 %v390_v50, %v390_v50 }
 0x123   :  { %v1291_v1 = vadd.f32 %v1290_v58, %v1164_v56  ;;  %903 = vst [vmem:[%s3155_s3 + $0xf0] sm:$0xff] %v385_v59  ;;  %v1030_v2 = vadd.f32 %v1029_v57, %v385_v59  ;;  %v1165_v3 = vmul.f32 %v385_v59, %v385_v59  ;;  %v400_v4 = vadd.f32 %v1636_v60, %v2285_v16 }
 0x124   :  { %v394_v7 = vpop.f32.mrf.mxu0  ;;  %968 = vst [vmem:[%s3155_s3 + $0x2f8] sm:$0xff] %v2596_v63  ;;  %v2607_v8 = vadd.f32 %v2285_v16, %v704_v0  ;;  %v1732_v9 = vpop.f32.mrf.mxu1 }
 0x125   :  { %v1031_v11 = vadd.f32 %v1030_v2, %v390_v50  ;;  %v1292_v13 = vadd.f32 %v1291_v1, %v1165_v3  ;;  %906 = vst [vmem:[%s3155_s3 + $0x108] sm:$0xff] %v400_v4  ;;  %v395_v15 = vadd.f32 %v2285_v16, %v394_v7  ;;  %v2618_v18 = vadd.f32 %v1732_v9, %v2285_v16 }
 0x126   :  { %v1639_v17 = vpop.f32.mrf.mxu0  ;;  %967 = vst [vmem:[%s3155_s3 + $0x2f0] sm:$0xff] %v2607_v8  ;;  %v714_v19 = vpop.f32.mrf.mxu1  ;;  %v1168_v32 = vmul.f32 %v400_v4, %v400_v4 }
 0x127   :  { %v1293_v22 = vadd.f32 %v1292_v13, %v1166_v10  ;;  %905 = vst [vmem:[%s3155_s3 + $0x100] sm:$0xff] %v395_v15  ;;  %v1032_v23 = vadd.f32 %v1031_v11, %v395_v15  ;;  %v1167_v25 = vmul.f32 %v395_v15, %v395_v15  ;;  %v410_v26 = vadd.f32 %v1639_v17, %v2285_v16 }
 0x128   :  { %v404_v28 = vpop.f32.mrf.mxu0  ;;  %970 = vst [vmem:[%s3155_s3 + $0x308] sm:$0xff] %v2618_v18  ;;  %v2629_v30 = vadd.f32 %v2285_v16, %v714_v19  ;;  %v1735_v31 = vpop.f32.mrf.mxu1 }
 0x129   :  { %v1033_v35 = vadd.f32 %v1032_v23, %v400_v4  ;;  %v1294_v36 = vadd.f32 %v1293_v22, %v1167_v25  ;;  %908 = vst [vmem:[%s3155_s3 + $0x118] sm:$0xff] %v410_v26  ;;  %v405_v38 = vadd.f32 %v2285_v16, %v404_v28  ;;  %v2640_v40 = vadd.f32 %v1735_v31, %v2285_v16 }
 0x12a   :  { %v1642_v39 = vpop.f32.mrf.mxu0  ;;  %969 = vst [vmem:[%s3155_s3 + $0x300] sm:$0xff] %v2629_v30  ;;  %v724_v42 = vpop.f32.mrf.mxu1  ;;  %v1170_v56 = vmul.f32 %v410_v26, %v410_v26 }
 0x12b   :  { %v1295_v44 = vadd.f32 %v1294_v36, %v1168_v32  ;;  %907 = vst [vmem:[%s3155_s3 + $0x110] sm:$0xff] %v405_v38  ;;  %v1034_v46 = vadd.f32 %v1033_v35, %v405_v38  ;;  %v1169_v47 = vmul.f32 %v405_v38, %v405_v38  ;;  %v420_v49 = vadd.f32 %v1642_v39, %v2285_v16 }
 0x12c   :  { %v414_v50 = vpop.f32.mrf.mxu0  ;;  %972 = vst [vmem:[%s3155_s3 + $0x318] sm:$0xff] %v2640_v40  ;;  %v2651_v51 = vadd.f32 %v2285_v16, %v724_v42  ;;  %v1738_v54 = vpop.f32.mrf.mxu1 }
 0x12d   :  { %v1035_v57 = vadd.f32 %v1034_v46, %v410_v26  ;;  %v1296_v58 = vadd.f32 %v1295_v44, %v1169_v47  ;;  %910 = vst [vmem:[%s3155_s3 + $0x128] sm:$0xff] %v420_v49  ;;  %v415_v59 = vadd.f32 %v2285_v16, %v414_v50  ;;  %v2662_v0 = vadd.f32 %v1738_v54, %v2285_v16 }
 0x12e   :  { %v1645_v60 = vpop.f32.mrf.mxu0  ;;  %971 = vst [vmem:[%s3155_s3 + $0x310] sm:$0xff] %v2651_v51  ;;  %v734_v1 = vpop.f32.mrf.mxu1  ;;  %v1172_v13 = vmul.f32 %v420_v49, %v420_v49 }
 0x12f   :  { %v1297_v2 = vadd.f32 %v1296_v58, %v1170_v56  ;;  %909 = vst [vmem:[%s3155_s3 + $0x120] sm:$0xff] %v415_v59  ;;  %v1036_v3 = vadd.f32 %v1035_v57, %v415_v59  ;;  %v1171_v4 = vmul.f32 %v415_v59, %v415_v59  ;;  %v430_v7 = vadd.f32 %v1645_v60, %v2285_v16 }
 0x130   :  { %v424_v9 = vpop.f32.mrf.mxu0  ;;  %974 = vst [vmem:[%s3155_s3 + $0x328] sm:$0xff] %v2662_v0  ;;  %v2673_v10 = vadd.f32 %v2285_v16, %v734_v1  ;;  %v1741_v11 = vpop.f32.mrf.mxu1 }
 0x131   :  { %v1037_v15 = vadd.f32 %v1036_v3, %v420_v49  ;;  %v1298_v17 = vadd.f32 %v1297_v2, %v1171_v4  ;;  %912 = vst [vmem:[%s3155_s3 + $0x138] sm:$0xff] %v430_v7  ;;  %v425_v19 = vadd.f32 %v2285_v16, %v424_v9  ;;  %v2684_v23 = vadd.f32 %v1741_v11, %v2285_v16 }
 0x132   :  { %v1648_v22 = vpop.f32.mrf.mxu0  ;;  %973 = vst [vmem:[%s3155_s3 + $0x320] sm:$0xff] %v2673_v10  ;;  %v744_v25 = vpop.f32.mrf.mxu1  ;;  %v1174_v39 = vmul.f32 %v430_v7, %v430_v7 }
 0x133   :  { %v1299_v26 = vadd.f32 %v1298_v17, %v1172_v13  ;;  %911 = vst [vmem:[%s3155_s3 + $0x130] sm:$0xff] %v425_v19  ;;  %v1038_v28 = vadd.f32 %v1037_v15, %v425_v19  ;;  %v1173_v31 = vmul.f32 %v425_v19, %v425_v19  ;;  %v440_v32 = vadd.f32 %v1648_v22, %v2285_v16 }
 0x134   :  { %v434_v35 = vpop.f32.mrf.mxu0  ;;  %976 = vst [vmem:[%s3155_s3 + $0x338] sm:$0xff] %v2684_v23  ;;  %v2695_v36 = vadd.f32 %v2285_v16, %v744_v25  ;;  %v1744_v38 = vpop.f32.mrf.mxu1 }
 0x135   :  { %v1039_v42 = vadd.f32 %v1038_v28, %v430_v7  ;;  %v1300_v44 = vadd.f32 %v1299_v26, %v1173_v31  ;;  %914 = vst [vmem:[%s3155_s3 + $0x148] sm:$0xff] %v440_v32  ;;  %v435_v46 = vadd.f32 %v2285_v16, %v434_v35  ;;  %v2706_v49 = vadd.f32 %v1744_v38, %v2285_v16 }
 0x136   :  { %v1651_v47 = vpop.f32.mrf.mxu0  ;;  %975 = vst [vmem:[%s3155_s3 + $0x330] sm:$0xff] %v2695_v36  ;;  %v754_v50 = vpop.f32.mrf.mxu1  ;;  %v1176_v2 = vmul.f32 %v440_v32, %v440_v32 }
 0x137   :  { %v1301_v54 = vadd.f32 %v1300_v44, %v1174_v39  ;;  %913 = vst [vmem:[%s3155_s3 + $0x140] sm:$0xff] %v435_v46  ;;  %v1040_v56 = vadd.f32 %v1039_v42, %v435_v46  ;;  %v1175_v57 = vmul.f32 %v435_v46, %v435_v46  ;;  %v450_v58 = vadd.f32 %v1651_v47, %v2285_v16 }
 0x138   :  { %v444_v59 = vpop.f32.mrf.mxu0  ;;  %978 = vst [vmem:[%s3155_s3 + $0x348] sm:$0xff] %v2706_v49  ;;  %v2717_v60 = vadd.f32 %v2285_v16, %v754_v50  ;;  %v1747_v1 = vpop.f32.mrf.mxu1 }
 0x139   :  { %v1041_v3 = vadd.f32 %v1040_v56, %v440_v32  ;;  %v1302_v4 = vadd.f32 %v1301_v54, %v1175_v57  ;;  %916 = vst [vmem:[%s3155_s3 + $0x158] sm:$0xff] %v450_v58  ;;  %v445_v7 = vadd.f32 %v2285_v16, %v444_v59  ;;  %v2728_v11 = vadd.f32 %v1747_v1, %v2285_v16 }
 0x13a   :  { %v1654_v9 = vpop.f32.mrf.mxu0  ;;  %977 = vst [vmem:[%s3155_s3 + $0x340] sm:$0xff] %v2717_v60  ;;  %v764_v13 = vpop.f32.mrf.mxu1  ;;  %v1178_v31 = vmul.f32 %v450_v58, %v450_v58 }
 0x13b   :  { %v1303_v15 = vadd.f32 %v1302_v4, %v1176_v2  ;;  %915 = vst [vmem:[%s3155_s3 + $0x150] sm:$0xff] %v445_v7  ;;  %v1042_v17 = vadd.f32 %v1041_v3, %v445_v7  ;;  %v1177_v19 = vmul.f32 %v445_v7, %v445_v7  ;;  %v460_v22 = vadd.f32 %v1654_v9, %v2285_v16 }
 0x13c   :  { %v454_v25 = vpop.f32.mrf.mxu0  ;;  %980 = vst [vmem:[%s3155_s3 + $0x358] sm:$0xff] %v2728_v11  ;;  %v2739_v26 = vadd.f32 %v2285_v16, %v764_v13  ;;  %v1750_v28 = vpop.f32.mrf.mxu1 }
 0x13d   :  { %v1043_v32 = vadd.f32 %v1042_v17, %v450_v58  ;;  %v1304_v35 = vadd.f32 %v1303_v15, %v1177_v19  ;;  %918 = vst [vmem:[%s3155_s3 + $0x168] sm:$0xff] %v460_v22  ;;  %v455_v38 = vadd.f32 %v2285_v16, %v454_v25  ;;  %v2750_v42 = vadd.f32 %v1750_v28, %v2285_v16 }
 0x13e   :  { %v1657_v39 = vpop.f32.mrf.mxu0  ;;  %979 = vst [vmem:[%s3155_s3 + $0x350] sm:$0xff] %v2739_v26  ;;  %v774_v44 = vpop.f32.mrf.mxu1  ;;  %v1180_v59 = vmul.f32 %v460_v22, %v460_v22 }
 0x13f   :  { %v1305_v46 = vadd.f32 %v1304_v35, %v1178_v31  ;;  %917 = vst [vmem:[%s3155_s3 + $0x160] sm:$0xff] %v455_v38  ;;  %v1044_v47 = vadd.f32 %v1043_v32, %v455_v38  ;;  %v1179_v50 = vmul.f32 %v455_v38, %v455_v38  ;;  %v470_v54 = vadd.f32 %v1657_v39, %v2285_v16 }
 0x140   :  { %v464_v56 = vpop.f32.mrf.mxu0  ;;  %982 = vst [vmem:[%s3155_s3 + $0x368] sm:$0xff] %v2750_v42  ;;  %v2761_v57 = vadd.f32 %v2285_v16, %v774_v44  ;;  %v1753_v58 = vpop.f32.mrf.mxu1 }
 0x141   :  { %v1045_v1 = vadd.f32 %v1044_v47, %v460_v22  ;;  %v1306_v2 = vadd.f32 %v1305_v46, %v1179_v50  ;;  %920 = vst [vmem:[%s3155_s3 + $0x178] sm:$0xff] %v470_v54  ;;  %v465_v3 = vadd.f32 %v2285_v16, %v464_v56  ;;  %v2772_v7 = vadd.f32 %v1753_v58, %v2285_v16 }
 0x142   :  { %v1660_v4 = vpop.f32.mrf.mxu0  ;;  %981 = vst [vmem:[%s3155_s3 + $0x360] sm:$0xff] %v2761_v57  ;;  %v784_v9 = vpop.f32.mrf.mxu1  ;;  %v1182_v31 = vmul.f32 %v470_v54, %v470_v54 }
 0x143   :  { %v1307_v13 = vadd.f32 %v1306_v2, %v1180_v59  ;;  %919 = vst [vmem:[%s3155_s3 + $0x170] sm:$0xff] %v465_v3  ;;  %v1046_v15 = vadd.f32 %v1045_v1, %v465_v3  ;;  %v1181_v17 = vmul.f32 %v465_v3, %v465_v3  ;;  %v480_v19 = vadd.f32 %v1660_v4, %v2285_v16 }
 0x144   :  { %v474_v22 = vpop.f32.mrf.mxu0  ;;  %984 = vst [vmem:[%s3155_s3 + $0x378] sm:$0xff] %v2772_v7  ;;  %v2783_v25 = vadd.f32 %v2285_v16, %v784_v9  ;;  %v1756_v28 = vpop.f32.mrf.mxu1 }
 0x145   :  { %v1047_v32 = vadd.f32 %v1046_v15, %v470_v54  ;;  %v1308_v35 = vadd.f32 %v1307_v13, %v1181_v17  ;;  %922 = vst [vmem:[%s3155_s3 + $0x188] sm:$0xff] %v480_v19  ;;  %v475_v38 = vadd.f32 %v2285_v16, %v474_v22  ;;  %v2794_v44 = vadd.f32 %v1756_v28, %v2285_v16 }
 0x146   :  { %v1663_v39 = vpop.f32.mrf.mxu0  ;;  %983 = vst [vmem:[%s3155_s3 + $0x370] sm:$0xff] %v2783_v25  ;;  %v794_v46 = vpop.f32.mrf.mxu1  ;;  %v1184_v2 = vmul.f32 %v480_v19, %v480_v19 }
 0x147   :  { %v1309_v47 = vadd.f32 %v1308_v35, %v1182_v31  ;;  %921 = vst [vmem:[%s3155_s3 + $0x180] sm:$0xff] %v475_v38  ;;  %v1048_v50 = vadd.f32 %v1047_v32, %v475_v38  ;;  %v1183_v54 = vmul.f32 %v475_v38, %v475_v38  ;;  %v490_v56 = vadd.f32 %v1663_v39, %v2285_v16 }
 0x148   :  { %v484_v58 = vpop.f32.mrf.mxu0  ;;  %986 = vst [vmem:[%s3155_s3 + $0x388] sm:$0xff] %v2794_v44  ;;  %v2805_v59 = vadd.f32 %v2285_v16, %v794_v46  ;;  %v1759_v1 = vpop.f32.mrf.mxu1 }
 0x149   :  { %v1049_v3 = vadd.f32 %v1048_v50, %v480_v19  ;;  %v1310_v4 = vadd.f32 %v1309_v47, %v1183_v54  ;;  %924 = vst [vmem:[%s3155_s3 + $0x198] sm:$0xff] %v490_v56  ;;  %v485_v9 = vadd.f32 %v2285_v16, %v484_v58  ;;  %v2816_v15 = vadd.f32 %v1759_v1, %v2285_v16 }
 0x14a   :  { %v1666_v13 = vpop.f32.mrf.mxu0  ;;  %985 = vst [vmem:[%s3155_s3 + $0x380] sm:$0xff] %v2805_v59  ;;  %v804_v17 = vpop.f32.mrf.mxu1  ;;  %v1186_v39 = vmul.f32 %v490_v56, %v490_v56 }
 0x14b   :  { %v1311_v22 = vadd.f32 %v1310_v4, %v1184_v2  ;;  %923 = vst [vmem:[%s3155_s3 + $0x190] sm:$0xff] %v485_v9  ;;  %v1050_v19 = vadd.f32 %v1049_v3, %v485_v9  ;;  %v1185_v28 = vmul.f32 %v485_v9, %v485_v9  ;;  %v500_v31 = vadd.f32 %v1666_v13, %v2285_v16 }
 0x14c   :  { %v494_v32 = vpop.f32.mrf.mxu0  ;;  %988 = vst [vmem:[%s3155_s3 + $0x398] sm:$0xff] %v2816_v15  ;;  %v2827_v35 = vadd.f32 %v2285_v16, %v804_v17  ;;  %v1762_v38 = vpop.f32.mrf.mxu1 }
 0x14d   :  { %v1051_v46 = vadd.f32 %v1050_v19, %v490_v56  ;;  %v1312_v47 = vadd.f32 %v1311_v22, %v1185_v28  ;;  %926 = vst [vmem:[%s3155_s3 + $0x1a8] sm:$0xff] %v500_v31  ;;  %v495_v50 = vadd.f32 %v2285_v16, %v494_v32  ;;  %v2838_v58 = vadd.f32 %v1762_v38, %v2285_v16 }
 0x14e   :  { %v1669_v54 = vpop.f32.mrf.mxu0  ;;  %987 = vst [vmem:[%s3155_s3 + $0x390] sm:$0xff] %v2827_v35  ;;  %v814_v1 = vpop.f32.mrf.mxu1  ;;  %v1188_v22 = vmul.f32 %v500_v31, %v500_v31 }
 0x14f   :  { %v1313_v2 = vadd.f32 %v1312_v47, %v1186_v39  ;;  %925 = vst [vmem:[%s3155_s3 + $0x1a0] sm:$0xff] %v495_v50  ;;  %v1052_v56 = vadd.f32 %v1051_v46, %v495_v50  ;;  %v1187_v3 = vmul.f32 %v495_v50, %v495_v50  ;;  %v510_v4 = vadd.f32 %v1669_v54, %v2285_v16 }
 0x150   :  { %v504_v9 = vpop.f32.mrf.mxu0  ;;  %990 = vst [vmem:[%s3155_s3 + $0x3a8] sm:$0xff] %v2838_v58  ;;  %v2849_v13 = vadd.f32 %v2285_v16, %v814_v1  ;;  %v1765_v17 = vpop.f32.mrf.mxu1 }
 0x151   :  { %v1053_v19 = vadd.f32 %v1052_v56, %v500_v31  ;;  %v1314_v28 = vadd.f32 %v1313_v2, %v1187_v3  ;;  %928 = vst [vmem:[%s3155_s3 + $0x1b8] sm:$0xff] %v510_v4  ;;  %v505_v32 = vadd.f32 %v2285_v16, %v504_v9  ;;  %v2860_v39 = vadd.f32 %v1765_v17, %v2285_v16 }
 0x152   :  { %v1672_v38 = vpop.f32.mrf.mxu0  ;;  %989 = vst [vmem:[%s3155_s3 + $0x3a0] sm:$0xff] %v2849_v13  ;;  %v824_v46 = vpop.f32.mrf.mxu1  ;;  %v1190_v3 = vmul.f32 %v510_v4, %v510_v4 }
 0x153   :  { %3172 = vst [vmem:[#allocation2_spill] sm:$0xff] %v2860_v39  ;;  %v1315_v47 = vadd.f32 %v1314_v28, %v1188_v22  ;;  %927 = vst [vmem:[%s3155_s3 + $0x1b0] sm:$0xff] %v505_v32  ;;  %v1054_v31 = vadd.f32 %v1053_v19, %v505_v32  ;;  %v1189_v50 = vmul.f32 %v505_v32, %v505_v32 }
 0x154   :  { %v520_v54 = vadd.f32 %v1672_v38, %v2285_v16  ;;  %v514_v1 = vpop.f32.mrf.mxu0  ;;  %992 = vst [vmem:[%s3155_s3 + $0x3b8] sm:$0xff] %v2860_v39  ;;  %v2871_v2 = vadd.f32 %v2285_v16, %v824_v46  ;;  %v1768_v56 = vpop.f32.mrf.mxu1 }
 0x155   :  { %v1055_v9 = vadd.f32 %v1054_v31, %v510_v4  ;;  %v1316_v17 = vadd.f32 %v1315_v47, %v1189_v50  ;;  %v515_v22 = vadd.f32 %v2285_v16, %v514_v1  ;;  %v2882_v28 = vadd.f32 %v1768_v56, %v2285_v16  ;;  %v1810_v47 = vld [vmem:[%s3154_s2] ss:$0 sm:$0xff] }
 0x156   :  { %3173 = vst [vmem:[#allocation3_spill] sm:$0xff] %v2871_v2  ;;  %930 = vst [vmem:[%s3155_s3 + $0x1c8] sm:$0xff] %v520_v54  ;;  %v1675_v19 = vpop.f32.mrf.mxu0  ;;  %v834_v32 = vpop.f32.mrf.mxu1  ;;  %v1192_v56 = vmul.f32 %v520_v54, %v520_v54 }
 0x157   :  { %991 = vst [vmem:[%s3155_s3 + $0x3b0] sm:$0xff] %v2871_v2  ;;  %3174 = vst [vmem:[#allocation4_spill] sm:$0xff] %v2882_v28  ;;  %v1317_v38 = vadd.f32 %v1316_v17, %v1190_v3  ;;  %v1056_v4 = vadd.f32 %v1055_v9, %v515_v22  ;;  %v1191_v46 = vmul.f32 %v515_v22, %v515_v22 }
 0x158   :  { %929 = vst [vmem:[%s3155_s3 + $0x1c0] sm:$0xff] %v515_v22  ;;  %v530_v31 = vadd.f32 %v1810_v47, %v1675_v19  ;;  %v524_v50 = vpop.f32.mrf.mxu0  ;;  %994 = vst [vmem:[%s3155_s3 + $0x3c8] sm:$0xff] %v2882_v28  ;;  %v2894_v16 = vadd.f32 %v1810_v47, %v834_v32  ;;  %v1771_v1 = vpop.f32.mrf.mxu1 }
 0x159   :  { %v1057_v3 = vadd.f32 %v1056_v4, %v520_v54  ;;  %v1318_v17 = vadd.f32 %v1317_v38, %v1191_v46  ;;  %v525_v9 = vadd.f32 %v1810_v47, %v524_v50  ;;  %v2903_v19 = vadd.f32 %v1810_v47, %v1771_v1 }
 0x15a   :  { %3175 = vst [vmem:[#allocation5_spill] sm:$0xff] %v2894_v16  ;;  %932 = vst [vmem:[%s3155_s3 + $0x1d8] sm:$0xff] %v530_v31  ;;  %v1678_v22 = vpop.f32.mrf.mxu0  ;;  %v844_v28 = vpop.f32.mrf.mxu1  ;;  %v1194_v1 = vmul.f32 %v530_v31, %v530_v31 }
 0x15b   :  { %993 = vst [vmem:[%s3155_s3 + $0x3c0] sm:$0xff] %v2894_v16  ;;  %3176 = vst [vmem:[#allocation6_spill] sm:$0xff] %v2903_v19  ;;  %v1319_v32 = vadd.f32 %v1318_v17, %v1192_v56  ;;  %v1058_v54 = vadd.f32 %v1057_v3, %v525_v9  ;;  %v1193_v38 = vmul.f32 %v525_v9, %v525_v9 }
 0x15c   :  { %931 = vst [vmem:[%s3155_s3 + $0x1d0] sm:$0xff] %v525_v9  ;;  %v540_v4 = vadd.f32 %v1810_v47, %v1678_v22  ;;  %v534_v46 = vpop.f32.mrf.mxu0  ;;  %996 = vst [vmem:[%s3155_s3 + $0x3d8] sm:$0xff] %v2903_v19  ;;  %v2912_v50 = vadd.f32 %v1810_v47, %v844_v28  ;;  %v1774_v16 = vpop.f32.mrf.mxu1 }
 0x15d   :  { %v1059_v39 = vadd.f32 %v1058_v54, %v530_v31  ;;  %v1320_v2 = vadd.f32 %v1319_v32, %v1193_v38  ;;  %v535_v56 = vadd.f32 %v1810_v47, %v534_v46  ;;  %v2921_v17 = vadd.f32 %v1810_v47, %v1774_v16 }
 0x15e   :  { %3177 = vst [vmem:[#allocation7_spill] sm:$0xff] %v2912_v50  ;;  %934 = vst [vmem:[%s3155_s3 + $0x1e8] sm:$0xff] %v540_v4  ;;  %v1681_v3 = vpop.f32.mrf.mxu0  ;;  %v854_v9 = vpop.f32.mrf.mxu1  ;;  %v1196_v16 = vmul.f32 %v540_v4, %v540_v4 }
 0x15f   :  { %995 = vst [vmem:[%s3155_s3 + $0x3d0] sm:$0xff] %v2912_v50  ;;  %v1321_v28 = vadd.f32 %v1320_v2, %v1194_v1  ;;  %933 = vst [vmem:[%s3155_s3 + $0x1e0] sm:$0xff] %v535_v56  ;;  %v1060_v31 = vadd.f32 %v1059_v39, %v535_v56  ;;  %v1195_v22 = vmul.f32 %v535_v56, %v535_v56 }
 0x160   :  { %v550_v32 = vadd.f32 %v1810_v47, %v1681_v3  ;;  %v544_v54 = vpop.f32.mrf.mxu0  ;;  %998 = vst [vmem:[%s3155_s3 + $0x3e8] sm:$0xff] %v2921_v17  ;;  %v2930_v38 = vadd.f32 %v1810_v47, %v854_v9  ;;  %v1777_v46 = vpop.f32.mrf.mxu1 }
 0x161   :  { %v1061_v19 = vadd.f32 %v1060_v31, %v540_v4  ;;  %v1322_v50 = vadd.f32 %v1321_v28, %v1195_v22  ;;  %v545_v2 = vadd.f32 %v1810_v47, %v544_v54  ;;  %v2939_v39 = vadd.f32 %v1810_v47, %v1777_v46  ;;  %v1812_v46 = vld [vmem:[%s3155_s3 + $0x208] sm:$0xff] }
 0x162   :  { %936 = vst [vmem:[%s3155_s3 + $0x1f8] sm:$0xff] %v550_v32  ;;  %997 = vst [vmem:[%s3155_s3 + $0x3e0] sm:$0xff] %v2930_v38  ;;  %v864_v1 = vpop.f32.mrf.mxu1  ;;  %v1198_v28 = vmul.f32 %v550_v32, %v550_v32 }
 0x163   :  { %3178 = vst [vmem:[#allocation8_spill] sm:$0xff] %v2939_v39  ;;  %v1323_v56 = vadd.f32 %v1322_v50, %v1196_v16  ;;  %935 = vst [vmem:[%s3155_s3 + $0x1f0] sm:$0xff] %v545_v2  ;;  %v1062_v4 = vadd.f32 %v1061_v19, %v545_v2  ;;  %v1197_v3 = vmul.f32 %v545_v2, %v545_v2  ;;  %v1811_v19 = vld [vmem:[%s3155_s3 + $0x200] sm:$0xff] }
 0x164   :  { %v2944_v9 = vadd.f32 %v1810_v47, %v864_v1  ;;  %1000 = vst [vmem:[%s3155_s3 + $0x3f8] sm:$0xff] %v2939_v39  ;;  %v1199_v54 = vmul.f32 %v1811_v19, %v1811_v19  ;;  %v1200_v16 = vmul.f32 %v1812_v46, %v1812_v46  ;;  %v1815_v39 = vld [vmem:[%s3155_s3 + $0x220] sm:$0xff] }
 0x165   :  { %v1063_v31 = vadd.f32 %v1062_v4, %v550_v32  ;;  %v1324_v22 = vadd.f32 %v1323_v56, %v1197_v3  ;;  %v1813_v56 = vld [vmem:[%s3155_s3 + $0x210] sm:$0xff] }
 0x166   :  { %999 = vst [vmem:[%s3155_s3 + $0x3f0] sm:$0xff] %v2944_v9  ;;  %v1201_v3 = vmul.f32 %v1813_v56, %v1813_v56 }
 0x167   :  { %v1325_v50 = vadd.f32 %v1324_v22, %v1198_v28  ;;  %v1064_v47 = vadd.f32 %v1811_v19, %v1063_v31  ;;  %v1814_v28 = vld [vmem:[%s3155_s3 + $0x218] sm:$0xff] }
 0x168   :  { %v1202_v31 = vmul.f32 %v1814_v28, %v1814_v28 }
 0x169   :  { %v1065_v2 = vadd.f32 %v1812_v46, %v1064_v47  ;;  %v1326_v32 = vadd.f32 %v1325_v50, %v1199_v54  ;;  %v1203_v50 = vmul.f32 %v1815_v39, %v1815_v39  ;;  %v1816_v46 = vld [vmem:[%s3155_s3 + $0x228] sm:$0xff] }
 0x16b   :  { %v1327_v1 = vadd.f32 %v1326_v32, %v1200_v16  ;;  %v1066_v4 = vadd.f32 %v1813_v56, %v1065_v2  ;;  %v1204_v16 = vmul.f32 %v1816_v46, %v1816_v46  ;;  %v1817_v56 = vld [vmem:[%s3155_s3 + $0x230] sm:$0xff] }
 0x16d   :  { %v1328_v22 = vadd.f32 %v1327_v1, %v1201_v3  ;;  %v1067_v19 = vadd.f32 %v1814_v28, %v1066_v4  ;;  %v1205_v4 = vmul.f32 %v1817_v56, %v1817_v56  ;;  %v1818_v28 = vld [vmem:[%s3155_s3 + $0x238] sm:$0xff] }
 0x16f   :  { %v1068_v47 = vadd.f32 %v1815_v39, %v1067_v19  ;;  %v1329_v54 = vadd.f32 %v1328_v22, %v1202_v31  ;;  %v1206_v39 = vmul.f32 %v1818_v28, %v1818_v28 }
 0x171   :  { %v1330_v2 = vadd.f32 %v1329_v54, %v1203_v50  ;;  %v1069_v32 = vadd.f32 %v1816_v46, %v1068_v47  ;;  %v1207_v50 = vmul.f32 %v2365_v20, %v2365_v20  ;;  %v1819_v54 = vld [vmem:[%s3155_s3 + $0x248] sm:$0xff] }
 0x172   :  { %v1208_v46 = vmul.f32 %v1819_v54, %v1819_v54 }
 0x173   :  { %v1070_v1 = vadd.f32 %v1817_v56, %v1069_v32  ;;  %v1331_v3 = vadd.f32 %v1330_v2, %v1204_v16  ;;  %v1209_v56 = vmul.f32 %v2387_v34, %v2387_v34 }
 0x175   :  { %v1332_v31 = vadd.f32 %v1331_v3, %v1205_v4  ;;  %v1071_v22 = vadd.f32 %v1818_v28, %v1070_v1  ;;  %v1210_v1 = vmul.f32 %v2376_v27, %v2376_v27 }
 0x177   :  { %v1072_v19 = vadd.f32 %v1071_v22, %v2365_v20  ;;  %v1333_v47 = vadd.f32 %v1332_v31, %v1206_v39  ;;  %v1211_v39 = vmul.f32 %v2409_v48, %v2409_v48  ;;  %v1212_v22 = vmul.f32 %v2398_v41, %v2398_v41 }
 0x179   :  { %v1334_v32 = vadd.f32 %v1333_v47, %v1207_v50  ;;  %v1073_v16 = vadd.f32 %v1819_v54, %v1072_v19  ;;  %v1213_v47 = vmul.f32 %v2431_v62, %v2431_v62 }
 0x17b   :  { %v1074_v2 = vadd.f32 %v1073_v16, %v2387_v34  ;;  %v1335_v4 = vadd.f32 %v1334_v32, %v1208_v46  ;;  %v1215_v16 = vmul.f32 %v2453_v12, %v2453_v12 }
 0x17d   :  { %v1336_v3 = vadd.f32 %v1335_v4, %v1209_v56  ;;  %v1075_v20 = vadd.f32 %v1074_v2, %v2376_v27  ;;  %v1214_v27 = vmul.f32 %v2420_v55, %v2420_v55 }
 0x17f   :  { %v1076_v28 = vadd.f32 %v1075_v20, %v2409_v48  ;;  %v1337_v31 = vadd.f32 %v1336_v3, %v1210_v1  ;;  %v1217_v1 = vmul.f32 %v2475_v29, %v2475_v29 }
 0x181   :  { %v1338_v19 = vadd.f32 %v1337_v31, %v1211_v39  ;;  %v1077_v50 = vadd.f32 %v1076_v28, %v2398_v41  ;;  %v1216_v41 = vmul.f32 %v2442_v5, %v2442_v5  ;;  %v1219_v39 = vmul.f32 %v2497_v45, %v2497_v45 }
 0x183   :  { %v1078_v34 = vadd.f32 %v1077_v50, %v2431_v62  ;;  %v1339_v54 = vadd.f32 %v1338_v19, %v1212_v22  ;;  %v1221_v50 = vmul.f32 %v2519_v61, %v2519_v61 }
 0x185   :  { %v1340_v46 = vadd.f32 %v1339_v54, %v1213_v47  ;;  %v1079_v32 = vadd.f32 %v1078_v34, %v2420_v55  ;;  %v1218_v55 = vmul.f32 %v2464_v21, %v2464_v21 }
 0x187   :  { %v1080_v48 = vadd.f32 %v1079_v32, %v2453_v12  ;;  %v1341_v2 = vadd.f32 %v1340_v46, %v1214_v27  ;;  %v1223_v27 = vmul.f32 %v2541_v14, %v2541_v14 }
 0x189   :  { %v1342_v56 = vadd.f32 %v1341_v2, %v1215_v16  ;;  %v1081_v4 = vadd.f32 %v1080_v48, %v2442_v5  ;;  %v1220_v5 = vmul.f32 %v2486_v37, %v2486_v37  ;;  %v1225_v16 = vmul.f32 %v2563_v33, %v2563_v33 }
 0x18b   :  { %v1082_v62 = vadd.f32 %v1081_v4, %v2475_v29  ;;  %v1343_v3 = vadd.f32 %v1342_v56, %v1216_v41  ;;  %v1227_v4 = vmul.f32 %v2585_v52, %v2585_v52 }
 0x18d   :  { %v1344_v20 = vadd.f32 %v1343_v3, %v1217_v1  ;;  %v1083_v28 = vadd.f32 %v1082_v62, %v2464_v21  ;;  %v1222_v21 = vmul.f32 %v2508_v53, %v2508_v53 }
 0x18f   :  { %v1084_v12 = vadd.f32 %v1083_v28, %v2497_v45  ;;  %v1345_v31 = vadd.f32 %v1344_v20, %v1218_v55  ;;  %v1229_v55 = vmul.f32 %v2607_v8, %v2607_v8 }
 0x191   :  { %v1346_v22 = vadd.f32 %v1345_v31, %v1219_v39  ;;  %v1085_v19 = vadd.f32 %v1084_v12, %v2486_v37  ;;  %v1224_v37 = vmul.f32 %v2530_v6, %v2530_v6  ;;  %v1231_v39 = vmul.f32 %v2629_v30, %v2629_v30 }
 0x193   :  { %v1086_v29 = vadd.f32 %v1085_v19, %v2519_v61  ;;  %v1347_v34 = vadd.f32 %v1346_v22, %v1220_v5  ;;  %v1233_v19 = vmul.f32 %v2651_v51, %v2651_v51 }
 0x195   :  { %v1348_v47 = vadd.f32 %v1347_v34, %v1221_v50  ;;  %v1087_v54 = vadd.f32 %v1086_v29, %v2508_v53  ;;  %v1226_v53 = vmul.f32 %v2552_v24, %v2552_v24 }
 0x197   :  { %v1088_v45 = vadd.f32 %v1087_v54, %v2541_v14  ;;  %v1349_v46 = vadd.f32 %v1348_v47, %v1222_v21  ;;  %v1235_v21 = vmul.f32 %v2673_v10, %v2673_v10 }
 0x199   :  { %v1350_v32 = vadd.f32 %v1349_v46, %v1223_v27  ;;  %v1089_v48 = vadd.f32 %v1088_v45, %v2530_v6  ;;  %v1228_v6 = vmul.f32 %v2574_v43, %v2574_v43  ;;  %v1237_v27 = vmul.f32 %v2695_v36, %v2695_v36 }
 0x19b   :  { %v1090_v61 = vadd.f32 %v1089_v48, %v2563_v33  ;;  %v1351_v2 = vadd.f32 %v1350_v32, %v1224_v37  ;;  %v1239_v48 = vmul.f32 %v2717_v60, %v2717_v60 }
 0x19d   :  { %v1352_v41 = vadd.f32 %v1351_v2, %v1225_v16  ;;  %v1091_v56 = vadd.f32 %v1090_v61, %v2552_v24  ;;  %v1230_v24 = vmul.f32 %v2596_v63, %v2596_v63 }
 0x19f   :  { %v1092_v14 = vadd.f32 %v1091_v56, %v2585_v52  ;;  %v1353_v62 = vadd.f32 %v1352_v41, %v1226_v53  ;;  %v1241_v53 = vmul.f32 %v2739_v26, %v2739_v26 }
 0x1a1   :  { %v1354_v1 = vadd.f32 %v1353_v62, %v1227_v4  ;;  %v1093_v3 = vadd.f32 %v1092_v14, %v2574_v43  ;;  %v1232_v43 = vmul.f32 %v2618_v18, %v2618_v18  ;;  %v1243_v4 = vmul.f32 %v2761_v57, %v2761_v57 }
 0x1a3   :  { %v1094_v33 = vadd.f32 %v1093_v3, %v2607_v8  ;;  %v1355_v20 = vadd.f32 %v1354_v1, %v1228_v6  ;;  %v1245_v3 = vmul.f32 %v2783_v25, %v2783_v25 }
 0x1a5   :  { %v1356_v28 = vadd.f32 %v1355_v20, %v1229_v55  ;;  %v1095_v12 = vadd.f32 %v1094_v33, %v2596_v63  ;;  %v1234_v63 = vmul.f32 %v2640_v40, %v2640_v40 }
 0x1a7   :  { %v1096_v52 = vadd.f32 %v1095_v12, %v2629_v30  ;;  %v1357_v31 = vadd.f32 %v1356_v28, %v1230_v24  ;;  %v1247_v24 = vmul.f32 %v2805_v59, %v2805_v59 }
 0x1a9   :  { %v1358_v5 = vadd.f32 %v1357_v31, %v1231_v39  ;;  %v1097_v22 = vadd.f32 %v1096_v52, %v2618_v18  ;;  %v1236_v18 = vmul.f32 %v2662_v0, %v2662_v0  ;;  %v1249_v39 = vmul.f32 %v2827_v35, %v2827_v35 }
 0x1ab   :  { %v1098_v8 = vadd.f32 %v1097_v22, %v2651_v51  ;;  %v1359_v29 = vadd.f32 %v1358_v5, %v1232_v43  ;;  %v1251_v22 = vmul.f32 %v2849_v13, %v2849_v13 }
 0x1ad   :  { %v1360_v50 = vadd.f32 %v1359_v29, %v1233_v19  ;;  %v1099_v34 = vadd.f32 %v1098_v8, %v2640_v40  ;;  %v1238_v40 = vmul.f32 %v2684_v23, %v2684_v23 }
 0x1af   :  { %v1100_v30 = vadd.f32 %v1099_v34, %v2673_v10  ;;  %v1361_v47 = vadd.f32 %v1360_v50, %v1234_v63 }
 0x1b1   :  { %v1362_v54 = vadd.f32 %v1361_v47, %v1235_v21  ;;  %v1101_v45 = vadd.f32 %v1100_v30, %v2662_v0  ;;  %v1240_v0 = vmul.f32 %v2706_v49, %v2706_v49  ;;  %v3180_v30 = vld [vmem:[#allocation2_spill] sm:$0xff] }
 0x1b3   :  { %v1102_v51 = vadd.f32 %v1101_v45, %v2695_v36  ;;  %v1363_v46 = vadd.f32 %v1362_v54, %v1236_v18 }
 0x1b5   :  { %v1364_v37 = vadd.f32 %v1363_v46, %v1237_v27  ;;  %v1103_v32 = vadd.f32 %v1102_v51, %v2684_v23  ;;  %v1242_v23 = vmul.f32 %v2728_v11, %v2728_v11  ;;  %v3182_v51 = vld [vmem:[#allocation4_spill] sm:$0xff] }
 0x1b7   :  { %v1104_v10 = vadd.f32 %v1103_v32, %v2717_v60  ;;  %v1365_v61 = vadd.f32 %v1364_v37, %v1238_v40  ;;  %v3183_v40 = vld [vmem:[#allocation7_spill] sm:$0xff] }
 0x1b8   :  { %v1257_v32 = vmul.f32 %v3183_v40, %v3183_v40 }
 0x1b9   :  { %v1366_v16 = vadd.f32 %v1365_v61, %v1239_v48  ;;  %v1105_v2 = vadd.f32 %v1104_v10, %v2706_v49  ;;  %v1244_v49 = vmul.f32 %v2750_v42, %v2750_v42  ;;  %v3184_v48 = vld [vmem:[#allocation6_spill] sm:$0xff] }
 0x1ba   :  { %v1258_v61 = vmul.f32 %v3184_v48, %v3184_v48 }
 0x1bb   :  { %v1106_v36 = vadd.f32 %v1105_v2, %v2739_v26  ;;  %v1367_v41 = vadd.f32 %v1366_v16, %v1240_v0 }
 0x1bd   :  { %v1368_v56 = vadd.f32 %v1367_v41, %v1241_v53  ;;  %v1107_v14 = vadd.f32 %v1106_v36, %v2728_v11  ;;  %v1246_v11 = vmul.f32 %v2772_v7, %v2772_v7  ;;  %v1259_v36 = vmul.f32 %v2930_v38, %v2930_v38 }
 0x1be   :  { %v1260_v41 = vmul.f32 %v2921_v17, %v2921_v17 }
 0x1bf   :  { %v1108_v60 = vadd.f32 %v1107_v14, %v2761_v57  ;;  %v1369_v62 = vadd.f32 %v1368_v56, %v1242_v23 }
 0x1c1   :  { %v1370_v6 = vadd.f32 %v1369_v62, %v1243_v4  ;;  %v1109_v1 = vadd.f32 %v1108_v60, %v2750_v42  ;;  %v1248_v42 = vmul.f32 %v2794_v44, %v2794_v44  ;;  %v1261_v60 = vmul.f32 %v2944_v9, %v2944_v9  ;;  %v3185_v62 = vld [vmem:[#allocation8_spill] sm:$0xff] }
 0x1c3   :  { %v1110_v26 = vadd.f32 %v1109_v1, %v2783_v25  ;;  %v1371_v33 = vadd.f32 %v1370_v6, %v1244_v49  ;;  %v1262_v49 = vmul.f32 %v3185_v62, %v3185_v62 }
 0x1c5   :  { %v1372_v55 = vadd.f32 %v1371_v33, %v1245_v3  ;;  %v1111_v20 = vadd.f32 %v1110_v26, %v2772_v7  ;;  %v1250_v7 = vmul.f32 %v2816_v15, %v2816_v15 }
 0x1c7   :  { %v1112_v57 = vadd.f32 %v1111_v20, %v2805_v59  ;;  %v1373_v28 = vadd.f32 %v1372_v55, %v1246_v11 }
 0x1c9   :  { %v1374_v12 = vadd.f32 %v1373_v28, %v1247_v24  ;;  %v1113_v52 = vadd.f32 %v1112_v57, %v2794_v44  ;;  %v1252_v44 = vmul.f32 %v2838_v58, %v2838_v58 }
 0x1cb   :  { %v1114_v25 = vadd.f32 %v1113_v52, %v2827_v35  ;;  %v1375_v31 = vadd.f32 %v1374_v12, %v1248_v42  ;;  %v3179_v35 = vld [vmem:[#allocation3_spill] sm:$0xff] }
 0x1cc   :  { %v1253_v50 = vmul.f32 %v3179_v35, %v3179_v35 }
 0x1cd   :  { %v1376_v43 = vadd.f32 %v1375_v31, %v1249_v39  ;;  %v1115_v5 = vadd.f32 %v1114_v25, %v2816_v15  ;;  %v1254_v15 = vmul.f32 %v3180_v30, %v3180_v30 }
 0x1cf   :  { %v1116_v59 = vadd.f32 %v1115_v5, %v2849_v13  ;;  %v1377_v8 = vadd.f32 %v1376_v43, %v1250_v7  ;;  %v3181_v13 = vld [vmem:[#allocation5_spill] sm:$0xff] }
 0x1d0   :  { %v1255_v54 = vmul.f32 %v3181_v13, %v3181_v13 }
 0x1d1   :  { %v1378_v19 = vadd.f32 %v1377_v8, %v1251_v22  ;;  %v1117_v29 = vadd.f32 %v1116_v59, %v2838_v58  ;;  %v1256_v58 = vmul.f32 %v3182_v51, %v3182_v51 }
 0x1d3   :  { %v1118_v63 = vadd.f32 %v1117_v29, %v3179_v35  ;;  %v1379_v34 = vadd.f32 %v1378_v19, %v1252_v44 }
 0x1d5   :  { %v1380_v21 = vadd.f32 %v1379_v34, %v1253_v50  ;;  %v1119_v47 = vadd.f32 %v1118_v63, %v3180_v30 }
 0x1d7   :  { %v1120_v18 = vadd.f32 %v1119_v47, %v3181_v13  ;;  %v1381_v45 = vadd.f32 %v1380_v21, %v1254_v15 }
 0x1d9   :  { %v1382_v27 = vadd.f32 %v1381_v45, %v1255_v54  ;;  %v1121_v46 = vadd.f32 %v1120_v18, %v3182_v51 }
 0x1db   :  { %v1122_v37 = vadd.f32 %v1121_v46, %v3183_v40  ;;  %v1383_v10 = vadd.f32 %v1382_v27, %v1256_v58 }
 0x1dd   :  { %v1384_v0 = vadd.f32 %v1383_v10, %v1257_v32  ;;  %v1123_v16 = vadd.f32 %v1122_v37, %v3184_v48 }
 0x1df   :  { %v1124_v2 = vadd.f32 %v1123_v16, %v2930_v38  ;;  %v1385_v53 = vadd.f32 %v1384_v0, %v1258_v61 }
 0x1e1   :  { %v1386_v23 = vadd.f32 %v1385_v53, %v1259_v36  ;;  %v1125_v56 = vadd.f32 %v1124_v2, %v2921_v17 }
 0x1e3   :  { %v1126_v14 = vadd.f32 %v1125_v56, %v2944_v9  ;;  %v1387_v4 = vadd.f32 %v1386_v23, %v1260_v41 }
 0x1e5   :  { %v1127_v6 = vadd.f32 %v1126_v14, %v3185_v62  ;;  %v1388_v1 = vadd.f32 %v1387_v4, %v1261_v60 }
 0x1e7   :  { %v1128_v38 = vrot.slane %v1127_v6, 4  ;;  %v1389_v26 = vadd.f32 %v1388_v1, %v1262_v49 }
 0x1e9   :  { %v1129_v3 = vadd.f32 %v1128_v38, %v1127_v6  ;;  %v1390_v33 = vrot.slane %v1389_v26, 4 }
 0x1eb   :  { %v1130_v11 = vrot.slane %v1129_v3, 2  ;;  %v1391_v55 = vadd.f32 %v1390_v33, %v1389_v26 }
 0x1ed   :  { %v1131_v20 = vadd.f32 %v1130_v11, %v1129_v3  ;;  %v1392_v17 = vrot.slane %v1391_v55, 2 }
 0x1ef   :  { %v1132_v57 = vrot.slane %v1131_v20, 1  ;;  %v1393_v24 = vadd.f32 %v1392_v17, %v1391_v55 }
 0x1f1   :  { %v1133_v28 = vadd.f32 %v1132_v57, %v1131_v20  ;;  %v1394_v42 = vrot.slane %v1393_v24, 1 }
 0x1f3   :  { %1134 = vst [vmem:[%s3156_s4] sm:$0x1] %v1133_v28  ;;  %v1395_v9 = vadd.f32 %v1394_v42, %v1393_v24 }
 0x1f5   :  { %1396 = vst [vmem:[%s3157_s5] sm:$0x1] %v1395_v9 }

// kernel: double_conv_forward.5
= control target key start
LH: loop header
LB: loop body
LE: loop exit
PB: predicated region body
PF: predicated region fallthrough
CT: control target
= control target key end

     0   :  { %s1740_s0 = inlined_call_operand.vmem [shape: f32[1024,128], index: 0, kind: input, shape index: {}]   ;;  %s1741_s1 = inlined_call_operand.vmem [shape: f32[1,128], index: 1, kind: input, shape index: {}]   ;;  %s1742_s2 = inlined_call_operand.vmem [shape: f32[1,128], index: 2, kind: input, shape index: {}]   ;;  %s1743_s3 = inlined_call_operand.vmem [shape: f32[1024,128], index: 3, kind: output, shape index: {}]  }
   0x1   :  { %v14_v0 = vld [vmem:[%s1740_s0] sm:$0xff]  ;;  %v15_v4 = vld [vmem:[%s1740_s0 + $0x8] sm:$0xff]  ;;  %v16_v5 = vld [vmem:[%s1740_s0 + $0x10] sm:$0xff] }
   0x2   :  { %v702_v1 = vld [vmem:[%s1741_s1] ss:$0 sm:$0xff]  ;;  %v17_v6 = vld [vmem:[%s1740_s0 + $0x18] sm:$0xff]  ;;  %v19_v11 = vld [vmem:[%s1740_s0 + $0x28] sm:$0xff] }
   0x3   :  { %v707_v2 = vld [vmem:[%s1742_s2] ss:$0 sm:$0xff]  ;;  %v149_v3 = vmul.f32 %v702_v1, %v14_v0  ;;  %v150_v7 = vmul.f32 %v702_v1, %v15_v4  ;;  %v151_v8 = vmul.f32 %v702_v1, %v16_v5  ;;  %v152_v9 = vmul.f32 %v702_v1, %v17_v6  ;;  %v20_v12 = vld [vmem:[%s1740_s0 + $0x30] sm:$0xff]  ;;  %v21_v17 = vld [vmem:[%s1740_s0 + $0x38] sm:$0xff] }
   0x4   :  { %v18_v10 = vld [vmem:[%s1740_s0 + $0x20] sm:$0xff]  ;;  %v154_v15 = vmul.f32 %v702_v1, %v19_v11  ;;  %v155_v16 = vmul.f32 %v702_v1, %v20_v12  ;;  %v156_v21 = vmul.f32 %v702_v1, %v21_v17  ;;  %v23_v27 = vld [vmem:[%s1740_s0 + $0x48] sm:$0xff]  ;;  %v24_v28 = vld [vmem:[%s1740_s0 + $0x50] sm:$0xff] }
   0x5   :  { %v284_v13 = vadd.f32 %v707_v2, %v149_v3  ;;  %v153_v14 = vmul.f32 %v702_v1, %v18_v10  ;;  %v285_v18 = vadd.f32 %v707_v2, %v150_v7  ;;  %v286_v19 = vadd.f32 %v707_v2, %v151_v8  ;;  %v22_v22 = vld [vmem:[%s1740_s0 + $0x40] sm:$0xff]  ;;  %v25_v29 = vld [vmem:[%s1740_s0 + $0x58] sm:$0xff]  ;;  %v27_v35 = vld [vmem:[%s1740_s0 + $0x68] sm:$0xff] }
   0x6   :  { %v287_v20 = vadd.f32 %v707_v2, %v152_v9  ;;  %v289_v25 = vadd.f32 %v707_v2, %v154_v15  ;;  %v290_v26 = vadd.f32 %v707_v2, %v155_v16  ;;  %v291_v33 = vadd.f32 %v707_v2, %v156_v21  ;;  %v26_v34 = vld [vmem:[%s1740_s0 + $0x60] sm:$0xff]  ;;  %v28_v36 = vld [vmem:[%s1740_s0 + $0x70] sm:$0xff]  ;;  %v29_v41 = vld [vmem:[%s1740_s0 + $0x78] sm:$0xff] }
   0x7   :  { %v412_v23 = vmax.f32 %v284_v13, 0.0  ;;  %v288_v24 = vadd.f32 %v707_v2, %v153_v14  ;;  %v413_v30 = vmax.f32 %v285_v18, 0.0  ;;  %v414_v31 = vmax.f32 %v286_v19, 0.0  ;;  %v30_v54 = vld [vmem:[%s1740_s0 + $0x80] sm:$0xff]  ;;  %v31_v59 = vld [vmem:[%s1740_s0 + $0x88] sm:$0xff]  ;;  %v32_v60 = vld [vmem:[%s1740_s0 + $0x90] sm:$0xff] }
   0x8   :  { %v415_v32 = vmax.f32 %v287_v20, 0.0  ;;  %v417_v38 = vmax.f32 %v289_v25, 0.0  ;;  %v418_v39 = vmax.f32 %v290_v26, 0.0  ;;  %v157_v40 = vmul.f32 %v702_v1, %v22_v22  ;;  %v33_v61 = vld [vmem:[%s1740_s0 + $0x98] sm:$0xff]  ;;  %v34_v4 = vld [vmem:[%s1740_s0 + $0xa0] sm:$0xff]  ;;  %v35_v5 = vld [vmem:[%s1740_s0 + $0xa8] sm:$0xff] }
   0x9   :  { %540 = vst [vmem:[%s1743_s3] sm:$0xff] %v412_v23  ;;  %v416_v37 = vmax.f32 %v288_v24, 0.0  ;;  %541 = vst [vmem:[%s1743_s3 + $0x8] sm:$0xff] %v413_v30  ;;  %v419_v42 = vmax.f32 %v291_v33, 0.0  ;;  %v158_v43 = vmul.f32 %v702_v1, %v23_v27  ;;  %v159_v44 = vmul.f32 %v702_v1, %v24_v28  ;;  %v36_v6 = vld [vmem:[%s1740_s0 + $0xb0] sm:$0xff]  ;;  %v37_v11 = vld [vmem:[%s1740_s0 + $0xb8] sm:$0xff] }
   0xa   :  { %542 = vst [vmem:[%s1743_s3 + $0x10] sm:$0xff] %v414_v31  ;;  %543 = vst [vmem:[%s1743_s3 + $0x18] sm:$0xff] %v415_v32  ;;  %v160_v45 = vmul.f32 %v702_v1, %v25_v29  ;;  %v292_v46 = vadd.f32 %v707_v2, %v157_v40  ;;  %v161_v47 = vmul.f32 %v702_v1, %v26_v34  ;;  %v38_v24 = vld [vmem:[%s1740_s0 + $0xc0] sm:$0xff]  ;;  %v39_v29 = vld [vmem:[%s1740_s0 + $0xc8] sm:$0xff] }
   0xb   :  { %544 = vst [vmem:[%s1743_s3 + $0x20] sm:$0xff] %v416_v37  ;;  %545 = vst [vmem:[%s1743_s3 + $0x28] sm:$0xff] %v417_v38  ;;  %v162_v48 = vmul.f32 %v702_v1, %v27_v35  ;;  %v163_v49 = vmul.f32 %v702_v1, %v28_v36  ;;  %v293_v50 = vadd.f32 %v707_v2, %v158_v43  ;;  %v40_v30 = vld [vmem:[%s1740_s0 + $0xd0] sm:$0xff]  ;;  %v41_v31 = vld [vmem:[%s1740_s0 + $0xd8] sm:$0xff] }
   0xc   :  { %546 = vst [vmem:[%s1743_s3 + $0x30] sm:$0xff] %v418_v39  ;;  %547 = vst [vmem:[%s1743_s3 + $0x38] sm:$0xff] %v419_v42  ;;  %v294_v51 = vadd.f32 %v707_v2, %v159_v44  ;;  %v295_v52 = vadd.f32 %v707_v2, %v160_v45  ;;  %v164_v53 = vmul.f32 %v702_v1, %v29_v41  ;;  %v420_v55 = vmax.f32 %v292_v46, 0.0  ;;  %v42_v36 = vld [vmem:[%s1740_s0 + $0xe0] sm:$0xff]  ;;  %v43_v37 = vld [vmem:[%s1740_s0 + $0xe8] sm:$0xff] }
   0xd   :  { %v296_v56 = vadd.f32 %v707_v2, %v161_v47  ;;  %v297_v57 = vadd.f32 %v707_v2, %v162_v48  ;;  %v298_v58 = vadd.f32 %v707_v2, %v163_v49  ;;  %v421_v62 = vmax.f32 %v293_v50, 0.0  ;;  %v44_v38 = vld [vmem:[%s1740_s0 + $0xf0] sm:$0xff]  ;;  %v45_v43 = vld [vmem:[%s1740_s0 + $0xf8] sm:$0xff] }
   0xe   :  { %v422_v63 = vmax.f32 %v294_v51, 0.0  ;;  %v423_v0 = vmax.f32 %v295_v52, 0.0  ;;  %v299_v3 = vadd.f32 %v707_v2, %v164_v53  ;;  %548 = vst [vmem:[%s1743_s3 + $0x40] sm:$0xff] %v420_v55  ;;  %v165_v10 = vmul.f32 %v702_v1, %v30_v54 }
   0xf   :  { %v424_v7 = vmax.f32 %v296_v56, 0.0  ;;  %v425_v8 = vmax.f32 %v297_v57, 0.0  ;;  %v426_v9 = vmax.f32 %v298_v58, 0.0  ;;  %549 = vst [vmem:[%s1743_s3 + $0x48] sm:$0xff] %v421_v62  ;;  %v166_v13 = vmul.f32 %v702_v1, %v31_v59  ;;  %v46_v56 = vld [vmem:[%s1740_s0 + $0x100] sm:$0xff]  ;;  %v48_v62 = vld [vmem:[%s1740_s0 + $0x110] sm:$0xff] }
  0x10   :  { %550 = vst [vmem:[%s1743_s3 + $0x50] sm:$0xff] %v422_v63  ;;  %551 = vst [vmem:[%s1743_s3 + $0x58] sm:$0xff] %v423_v0  ;;  %v427_v12 = vmax.f32 %v299_v3, 0.0  ;;  %v167_v14 = vmul.f32 %v702_v1, %v32_v60  ;;  %v168_v15 = vmul.f32 %v702_v1, %v33_v61  ;;  %v300_v16 = vadd.f32 %v707_v2, %v165_v10  ;;  %v47_v61 = vld [vmem:[%s1740_s0 + $0x108] sm:$0xff]  ;;  %v49_v63 = vld [vmem:[%s1740_s0 + $0x118] sm:$0xff] }
  0x11   :  { %552 = vst [vmem:[%s1743_s3 + $0x60] sm:$0xff] %v424_v7  ;;  %553 = vst [vmem:[%s1743_s3 + $0x68] sm:$0xff] %v425_v8  ;;  %v169_v17 = vmul.f32 %v702_v1, %v34_v4  ;;  %v170_v18 = vmul.f32 %v702_v1, %v35_v5  ;;  %v171_v19 = vmul.f32 %v702_v1, %v36_v6  ;;  %v50_v6 = vld [vmem:[%s1740_s0 + $0x120] sm:$0xff]  ;;  %v51_v7 = vld [vmem:[%s1740_s0 + $0x128] sm:$0xff] }
  0x12   :  { %554 = vst [vmem:[%s1743_s3 + $0x70] sm:$0xff] %v426_v9  ;;  %555 = vst [vmem:[%s1743_s3 + $0x78] sm:$0xff] %v427_v12  ;;  %v301_v20 = vadd.f32 %v707_v2, %v166_v13  ;;  %v302_v21 = vadd.f32 %v707_v2, %v167_v14  ;;  %v303_v22 = vadd.f32 %v707_v2, %v168_v15  ;;  %v428_v25 = vmax.f32 %v300_v16, 0.0  ;;  %v52_v8 = vld [vmem:[%s1740_s0 + $0x130] sm:$0xff]  ;;  %v53_v13 = vld [vmem:[%s1740_s0 + $0x138] sm:$0xff] }
  0x13   :  { %v172_v23 = vmul.f32 %v702_v1, %v37_v11  ;;  %v304_v26 = vadd.f32 %v707_v2, %v169_v17  ;;  %v305_v27 = vadd.f32 %v707_v2, %v170_v18  ;;  %v306_v28 = vadd.f32 %v707_v2, %v171_v19 }
  0x14   :  { %v429_v32 = vmax.f32 %v301_v20, 0.0  ;;  %v430_v33 = vmax.f32 %v302_v21, 0.0  ;;  %v431_v34 = vmax.f32 %v303_v22, 0.0  ;;  %556 = vst [vmem:[%s1743_s3 + $0x80] sm:$0xff] %v428_v25  ;;  %v173_v42 = vmul.f32 %v702_v1, %v38_v24 }
  0x15   :  { %v307_v35 = vadd.f32 %v707_v2, %v172_v23  ;;  %v432_v39 = vmax.f32 %v304_v26, 0.0  ;;  %v433_v40 = vmax.f32 %v305_v27, 0.0  ;;  %v434_v41 = vmax.f32 %v306_v28, 0.0  ;;  %v54_v26 = vld [vmem:[%s1740_s0 + $0x140] sm:$0xff] }
  0x16   :  { %557 = vst [vmem:[%s1743_s3 + $0x88] sm:$0xff] %v429_v32  ;;  %558 = vst [vmem:[%s1743_s3 + $0x90] sm:$0xff] %v430_v33  ;;  %v174_v45 = vmul.f32 %v702_v1, %v39_v29  ;;  %v175_v46 = vmul.f32 %v702_v1, %v40_v30  ;;  %v176_v47 = vmul.f32 %v702_v1, %v41_v31  ;;  %v55_v31 = vld [vmem:[%s1740_s0 + $0x148] sm:$0xff]  ;;  %v56_v32 = vld [vmem:[%s1740_s0 + $0x150] sm:$0xff] }
  0x17   :  { %559 = vst [vmem:[%s1743_s3 + $0x98] sm:$0xff] %v431_v34  ;;  %v435_v44 = vmax.f32 %v307_v35, 0.0  ;;  %560 = vst [vmem:[%s1743_s3 + $0xa0] sm:$0xff] %v432_v39  ;;  %v308_v48 = vadd.f32 %v707_v2, %v173_v42  ;;  %v177_v49 = vmul.f32 %v702_v1, %v42_v36  ;;  %v178_v50 = vmul.f32 %v702_v1, %v43_v37  ;;  %v57_v33 = vld [vmem:[%s1740_s0 + $0x158] sm:$0xff]  ;;  %v59_v39 = vld [vmem:[%s1740_s0 + $0x168] sm:$0xff] }
  0x18   :  { %561 = vst [vmem:[%s1743_s3 + $0xa8] sm:$0xff] %v433_v40  ;;  %562 = vst [vmem:[%s1743_s3 + $0xb0] sm:$0xff] %v434_v41  ;;  %v179_v51 = vmul.f32 %v702_v1, %v44_v38  ;;  %v309_v52 = vadd.f32 %v707_v2, %v174_v45  ;;  %v310_v53 = vadd.f32 %v707_v2, %v175_v46  ;;  %v58_v38 = vld [vmem:[%s1740_s0 + $0x160] sm:$0xff]  ;;  %v60_v40 = vld [vmem:[%s1740_s0 + $0x170] sm:$0xff] }
  0x19   :  { %563 = vst [vmem:[%s1743_s3 + $0xb8] sm:$0xff] %v435_v44  ;;  %v311_v54 = vadd.f32 %v707_v2, %v176_v47  ;;  %v180_v55 = vmul.f32 %v702_v1, %v45_v43  ;;  %v436_v57 = vmax.f32 %v308_v48, 0.0  ;;  %v312_v58 = vadd.f32 %v707_v2, %v177_v49  ;;  %v61_v45 = vld [vmem:[%s1740_s0 + $0x178] sm:$0xff] }
  0x1a   :  { %v313_v59 = vadd.f32 %v707_v2, %v178_v50  ;;  %v314_v60 = vadd.f32 %v707_v2, %v179_v51  ;;  %v437_v0 = vmax.f32 %v309_v52, 0.0  ;;  %v438_v3 = vmax.f32 %v310_v53, 0.0 }
  0x1b   :  { %v439_v4 = vmax.f32 %v311_v54, 0.0  ;;  %v315_v5 = vadd.f32 %v707_v2, %v180_v55  ;;  %564 = vst [vmem:[%s1743_s3 + $0xc0] sm:$0xff] %v436_v57  ;;  %v440_v9 = vmax.f32 %v312_v58, 0.0  ;;  %v181_v12 = vmul.f32 %v702_v1, %v46_v56  ;;  %v62_v58 = vld [vmem:[%s1740_s0 + $0x180] sm:$0xff] }
  0x1c   :  { %v441_v10 = vmax.f32 %v313_v59, 0.0  ;;  %v442_v11 = vmax.f32 %v314_v60, 0.0  ;;  %565 = vst [vmem:[%s1743_s3 + $0xc8] sm:$0xff] %v437_v0  ;;  %566 = vst [vmem:[%s1743_s3 + $0xd0] sm:$0xff] %v438_v3  ;;  %v182_v15 = vmul.f32 %v702_v1, %v47_v61  ;;  %v183_v16 = vmul.f32 %v702_v1, %v48_v62  ;;  %v64_v0 = vld [vmem:[%s1740_s0 + $0x190] sm:$0xff]  ;;  %v65_v3 = vld [vmem:[%s1740_s0 + $0x198] sm:$0xff] }
  0x1d   :  { %567 = vst [vmem:[%s1743_s3 + $0xd8] sm:$0xff] %v439_v4  ;;  %v443_v14 = vmax.f32 %v315_v5, 0.0  ;;  %v184_v17 = vmul.f32 %v702_v1, %v49_v63  ;;  %568 = vst [vmem:[%s1743_s3 + $0xe0] sm:$0xff] %v440_v9  ;;  %v316_v18 = vadd.f32 %v707_v2, %v181_v12  ;;  %v185_v19 = vmul.f32 %v702_v1, %v50_v6  ;;  %v63_v63 = vld [vmem:[%s1740_s0 + $0x188] sm:$0xff] }
  0x1e   :  { %569 = vst [vmem:[%s1743_s3 + $0xe8] sm:$0xff] %v441_v10  ;;  %570 = vst [vmem:[%s1743_s3 + $0xf0] sm:$0xff] %v442_v11  ;;  %v186_v20 = vmul.f32 %v702_v1, %v51_v7  ;;  %v187_v21 = vmul.f32 %v702_v1, %v52_v8  ;;  %v317_v22 = vadd.f32 %v707_v2, %v182_v15  ;;  %v66_v8 = vld [vmem:[%s1740_s0 + $0x1a0] sm:$0xff]  ;;  %v67_v9 = vld [vmem:[%s1740_s0 + $0x1a8] sm:$0xff] }
  0x1f   :  { %571 = vst [vmem:[%s1743_s3 + $0xf8] sm:$0xff] %v443_v14  ;;  %v318_v23 = vadd.f32 %v707_v2, %v183_v16  ;;  %v319_v24 = vadd.f32 %v707_v2, %v184_v17  ;;  %v188_v25 = vmul.f32 %v702_v1, %v53_v13  ;;  %v444_v27 = vmax.f32 %v316_v18, 0.0  ;;  %v68_v10 = vld [vmem:[%s1740_s0 + $0x1b0] sm:$0xff]  ;;  %v69_v15 = vld [vmem:[%s1740_s0 + $0x1b8] sm:$0xff] }
  0x20   :  { %v320_v28 = vadd.f32 %v707_v2, %v185_v19  ;;  %v321_v29 = vadd.f32 %v707_v2, %v186_v20  ;;  %v322_v30 = vadd.f32 %v707_v2, %v187_v21  ;;  %v445_v34 = vmax.f32 %v317_v22, 0.0 }
  0x21   :  { %v446_v35 = vmax.f32 %v318_v23, 0.0  ;;  %v447_v36 = vmax.f32 %v319_v24, 0.0  ;;  %v323_v37 = vadd.f32 %v707_v2, %v188_v25  ;;  %572 = vst [vmem:[%s1743_s3 + $0x100] sm:$0xff] %v444_v27  ;;  %v189_v44 = vmul.f32 %v702_v1, %v54_v26 }
  0x22   :  { %v448_v41 = vmax.f32 %v320_v28, 0.0  ;;  %v449_v42 = vmax.f32 %v321_v29, 0.0  ;;  %v450_v43 = vmax.f32 %v322_v30, 0.0  ;;  %573 = vst [vmem:[%s1743_s3 + $0x108] sm:$0xff] %v445_v34  ;;  %v190_v47 = vmul.f32 %v702_v1, %v55_v31  ;;  %v70_v28 = vld [vmem:[%s1740_s0 + $0x1c0] sm:$0xff]  ;;  %v72_v34 = vld [vmem:[%s1740_s0 + $0x1d0] sm:$0xff] }
  0x23   :  { %574 = vst [vmem:[%s1743_s3 + $0x110] sm:$0xff] %v446_v35  ;;  %575 = vst [vmem:[%s1743_s3 + $0x118] sm:$0xff] %v447_v36  ;;  %v451_v46 = vmax.f32 %v323_v37, 0.0  ;;  %v191_v48 = vmul.f32 %v702_v1, %v56_v32  ;;  %v192_v49 = vmul.f32 %v702_v1, %v57_v33  ;;  %v324_v50 = vadd.f32 %v707_v2, %v189_v44  ;;  %v71_v33 = vld [vmem:[%s1740_s0 + $0x1c8] sm:$0xff]  ;;  %v73_v35 = vld [vmem:[%s1740_s0 + $0x1d8] sm:$0xff] }
  0x24   :  { %576 = vst [vmem:[%s1743_s3 + $0x120] sm:$0xff] %v448_v41  ;;  %577 = vst [vmem:[%s1743_s3 + $0x128] sm:$0xff] %v449_v42  ;;  %v193_v51 = vmul.f32 %v702_v1, %v58_v38  ;;  %v194_v52 = vmul.f32 %v702_v1, %v59_v39  ;;  %v195_v53 = vmul.f32 %v702_v1, %v60_v40  ;;  %v74_v40 = vld [vmem:[%s1740_s0 + $0x1e0] sm:$0xff]  ;;  %v75_v41 = vld [vmem:[%s1740_s0 + $0x1e8] sm:$0xff] }
  0x25   :  { %578 = vst [vmem:[%s1743_s3 + $0x130] sm:$0xff] %v450_v43  ;;  %579 = vst [vmem:[%s1743_s3 + $0x138] sm:$0xff] %v451_v46  ;;  %v325_v54 = vadd.f32 %v707_v2, %v190_v47  ;;  %v326_v55 = vadd.f32 %v707_v2, %v191_v48  ;;  %v327_v56 = vadd.f32 %v707_v2, %v192_v49  ;;  %v452_v59 = vmax.f32 %v324_v50, 0.0  ;;  %v76_v42 = vld [vmem:[%s1740_s0 + $0x1f0] sm:$0xff]  ;;  %v77_v47 = vld [vmem:[%s1740_s0 + $0x1f8] sm:$0xff] }
  0x26   :  { %v196_v57 = vmul.f32 %v702_v1, %v61_v45  ;;  %v328_v60 = vadd.f32 %v707_v2, %v193_v51  ;;  %v329_v61 = vadd.f32 %v707_v2, %v194_v52  ;;  %v330_v62 = vadd.f32 %v707_v2, %v195_v53 }
  0x27   :  { %v453_v4 = vmax.f32 %v325_v54, 0.0  ;;  %v454_v5 = vmax.f32 %v326_v55, 0.0  ;;  %v455_v6 = vmax.f32 %v327_v56, 0.0  ;;  %580 = vst [vmem:[%s1743_s3 + $0x140] sm:$0xff] %v452_v59  ;;  %v197_v14 = vmul.f32 %v702_v1, %v62_v58 }
  0x28   :  { %v331_v7 = vadd.f32 %v707_v2, %v196_v57  ;;  %v456_v11 = vmax.f32 %v328_v60, 0.0  ;;  %v457_v12 = vmax.f32 %v329_v61, 0.0  ;;  %v458_v13 = vmax.f32 %v330_v62, 0.0  ;;  %v78_v60 = vld [vmem:[%s1740_s0 + $0x200] sm:$0xff] }
  0x29   :  { %581 = vst [vmem:[%s1743_s3 + $0x148] sm:$0xff] %v453_v4  ;;  %582 = vst [vmem:[%s1743_s3 + $0x150] sm:$0xff] %v454_v5  ;;  %v198_v17 = vmul.f32 %v702_v1, %v63_v63  ;;  %v199_v18 = vmul.f32 %v702_v1, %v64_v0  ;;  %v200_v19 = vmul.f32 %v702_v1, %v65_v3  ;;  %v79_v3 = vld [vmem:[%s1740_s0 + $0x208] sm:$0xff]  ;;  %v80_v4 = vld [vmem:[%s1740_s0 + $0x210] sm:$0xff] }
  0x2a   :  { %583 = vst [vmem:[%s1743_s3 + $0x158] sm:$0xff] %v455_v6  ;;  %v459_v16 = vmax.f32 %v331_v7, 0.0  ;;  %584 = vst [vmem:[%s1743_s3 + $0x160] sm:$0xff] %v456_v11  ;;  %v332_v20 = vadd.f32 %v707_v2, %v197_v14  ;;  %v201_v21 = vmul.f32 %v702_v1, %v66_v8  ;;  %v202_v22 = vmul.f32 %v702_v1, %v67_v9  ;;  %v81_v5 = vld [vmem:[%s1740_s0 + $0x218] sm:$0xff]  ;;  %v83_v11 = vld [vmem:[%s1740_s0 + $0x228] sm:$0xff] }
  0x2b   :  { %585 = vst [vmem:[%s1743_s3 + $0x168] sm:$0xff] %v457_v12  ;;  %586 = vst [vmem:[%s1743_s3 + $0x170] sm:$0xff] %v458_v13  ;;  %v203_v23 = vmul.f32 %v702_v1, %v68_v10  ;;  %v333_v24 = vadd.f32 %v707_v2, %v198_v17  ;;  %v334_v25 = vadd.f32 %v707_v2, %v199_v18  ;;  %v82_v10 = vld [vmem:[%s1740_s0 + $0x220] sm:$0xff]  ;;  %v84_v12 = vld [vmem:[%s1740_s0 + $0x230] sm:$0xff] }
  0x2c   :  { %587 = vst [vmem:[%s1743_s3 + $0x178] sm:$0xff] %v459_v16  ;;  %v335_v26 = vadd.f32 %v707_v2, %v200_v19  ;;  %v204_v27 = vmul.f32 %v702_v1, %v69_v15  ;;  %v460_v29 = vmax.f32 %v332_v20, 0.0  ;;  %v336_v30 = vadd.f32 %v707_v2, %v201_v21  ;;  %v85_v17 = vld [vmem:[%s1740_s0 + $0x238] sm:$0xff] }
  0x2d   :  { %v337_v31 = vadd.f32 %v707_v2, %v202_v22  ;;  %v338_v32 = vadd.f32 %v707_v2, %v203_v23  ;;  %v461_v36 = vmax.f32 %v333_v24, 0.0  ;;  %v462_v37 = vmax.f32 %v334_v25, 0.0 }
  0x2e   :  { %v463_v38 = vmax.f32 %v335_v26, 0.0  ;;  %v339_v39 = vadd.f32 %v707_v2, %v204_v27  ;;  %588 = vst [vmem:[%s1743_s3 + $0x180] sm:$0xff] %v460_v29  ;;  %v464_v43 = vmax.f32 %v336_v30, 0.0  ;;  %v205_v46 = vmul.f32 %v702_v1, %v70_v28  ;;  %v86_v30 = vld [vmem:[%s1740_s0 + $0x240] sm:$0xff] }
  0x2f   :  { %v465_v44 = vmax.f32 %v337_v31, 0.0  ;;  %v466_v45 = vmax.f32 %v338_v32, 0.0  ;;  %589 = vst [vmem:[%s1743_s3 + $0x188] sm:$0xff] %v461_v36  ;;  %590 = vst [vmem:[%s1743_s3 + $0x190] sm:$0xff] %v462_v37  ;;  %v206_v49 = vmul.f32 %v702_v1, %v71_v33  ;;  %v207_v50 = vmul.f32 %v702_v1, %v72_v34  ;;  %v88_v36 = vld [vmem:[%s1740_s0 + $0x250] sm:$0xff]  ;;  %v89_v37 = vld [vmem:[%s1740_s0 + $0x258] sm:$0xff] }
  0x30   :  { %591 = vst [vmem:[%s1743_s3 + $0x198] sm:$0xff] %v463_v38  ;;  %v467_v48 = vmax.f32 %v339_v39, 0.0  ;;  %v208_v51 = vmul.f32 %v702_v1, %v73_v35  ;;  %592 = vst [vmem:[%s1743_s3 + $0x1a0] sm:$0xff] %v464_v43  ;;  %v340_v52 = vadd.f32 %v707_v2, %v205_v46  ;;  %v209_v53 = vmul.f32 %v702_v1, %v74_v40  ;;  %v87_v35 = vld [vmem:[%s1740_s0 + $0x248] sm:$0xff] }
  0x31   :  { %593 = vst [vmem:[%s1743_s3 + $0x1a8] sm:$0xff] %v465_v44  ;;  %594 = vst [vmem:[%s1743_s3 + $0x1b0] sm:$0xff] %v466_v45  ;;  %v210_v54 = vmul.f32 %v702_v1, %v75_v41  ;;  %v211_v55 = vmul.f32 %v702_v1, %v76_v42  ;;  %v341_v56 = vadd.f32 %v707_v2, %v206_v49  ;;  %v90_v42 = vld [vmem:[%s1740_s0 + $0x260] sm:$0xff]  ;;  %v91_v43 = vld [vmem:[%s1740_s0 + $0x268] sm:$0xff] }
  0x32   :  { %595 = vst [vmem:[%s1743_s3 + $0x1b8] sm:$0xff] %v467_v48  ;;  %v342_v57 = vadd.f32 %v707_v2, %v207_v50  ;;  %v343_v58 = vadd.f32 %v707_v2, %v208_v51  ;;  %v212_v59 = vmul.f32 %v702_v1, %v77_v47  ;;  %v468_v61 = vmax.f32 %v340_v52, 0.0  ;;  %v92_v44 = vld [vmem:[%s1740_s0 + $0x270] sm:$0xff]  ;;  %v93_v49 = vld [vmem:[%s1740_s0 + $0x278] sm:$0xff] }
  0x33   :  { %v344_v62 = vadd.f32 %v707_v2, %v209_v53  ;;  %v345_v63 = vadd.f32 %v707_v2, %v210_v54  ;;  %v346_v0 = vadd.f32 %v707_v2, %v211_v55  ;;  %v469_v6 = vmax.f32 %v341_v56, 0.0 }
  0x34   :  { %v470_v7 = vmax.f32 %v342_v57, 0.0  ;;  %v471_v8 = vmax.f32 %v343_v58, 0.0  ;;  %v347_v9 = vadd.f32 %v707_v2, %v212_v59  ;;  %596 = vst [vmem:[%s1743_s3 + $0x1c0] sm:$0xff] %v468_v61  ;;  %v213_v16 = vmul.f32 %v702_v1, %v78_v60 }
  0x35   :  { %v472_v13 = vmax.f32 %v344_v62, 0.0  ;;  %v473_v14 = vmax.f32 %v345_v63, 0.0  ;;  %v474_v15 = vmax.f32 %v346_v0, 0.0  ;;  %597 = vst [vmem:[%s1743_s3 + $0x1c8] sm:$0xff] %v469_v6  ;;  %v214_v19 = vmul.f32 %v702_v1, %v79_v3  ;;  %v94_v62 = vld [vmem:[%s1740_s0 + $0x280] sm:$0xff]  ;;  %v96_v6 = vld [vmem:[%s1740_s0 + $0x290] sm:$0xff] }
  0x36   :  { %598 = vst [vmem:[%s1743_s3 + $0x1d0] sm:$0xff] %v470_v7  ;;  %599 = vst [vmem:[%s1743_s3 + $0x1d8] sm:$0xff] %v471_v8  ;;  %v475_v18 = vmax.f32 %v347_v9, 0.0  ;;  %v215_v20 = vmul.f32 %v702_v1, %v80_v4  ;;  %v216_v21 = vmul.f32 %v702_v1, %v81_v5  ;;  %v348_v22 = vadd.f32 %v707_v2, %v213_v16  ;;  %v95_v5 = vld [vmem:[%s1740_s0 + $0x288] sm:$0xff]  ;;  %v97_v7 = vld [vmem:[%s1740_s0 + $0x298] sm:$0xff] }
  0x37   :  { %600 = vst [vmem:[%s1743_s3 + $0x1e0] sm:$0xff] %v472_v13  ;;  %601 = vst [vmem:[%s1743_s3 + $0x1e8] sm:$0xff] %v473_v14  ;;  %v217_v23 = vmul.f32 %v702_v1, %v82_v10  ;;  %v218_v24 = vmul.f32 %v702_v1, %v83_v11  ;;  %v219_v25 = vmul.f32 %v702_v1, %v84_v12  ;;  %v98_v12 = vld [vmem:[%s1740_s0 + $0x2a0] sm:$0xff]  ;;  %v99_v13 = vld [vmem:[%s1740_s0 + $0x2a8] sm:$0xff] }
  0x38   :  { %602 = vst [vmem:[%s1743_s3 + $0x1f0] sm:$0xff] %v474_v15  ;;  %603 = vst [vmem:[%s1743_s3 + $0x1f8] sm:$0xff] %v475_v18  ;;  %v349_v26 = vadd.f32 %v707_v2, %v214_v19  ;;  %v350_v27 = vadd.f32 %v707_v2, %v215_v20  ;;  %v351_v28 = vadd.f32 %v707_v2, %v216_v21  ;;  %v476_v31 = vmax.f32 %v348_v22, 0.0  ;;  %v100_v14 = vld [vmem:[%s1740_s0 + $0x2b0] sm:$0xff]  ;;  %v101_v19 = vld [vmem:[%s1740_s0 + $0x2b8] sm:$0xff] }
  0x39   :  { %v220_v29 = vmul.f32 %v702_v1, %v85_v17  ;;  %v352_v32 = vadd.f32 %v707_v2, %v217_v23  ;;  %v353_v33 = vadd.f32 %v707_v2, %v218_v24  ;;  %v354_v34 = vadd.f32 %v707_v2, %v219_v25 }
  0x3a   :  { %v477_v38 = vmax.f32 %v349_v26, 0.0  ;;  %v478_v39 = vmax.f32 %v350_v27, 0.0  ;;  %v479_v40 = vmax.f32 %v351_v28, 0.0  ;;  %604 = vst [vmem:[%s1743_s3 + $0x200] sm:$0xff] %v476_v31  ;;  %v221_v48 = vmul.f32 %v702_v1, %v86_v30 }
  0x3b   :  { %v355_v41 = vadd.f32 %v707_v2, %v220_v29  ;;  %v480_v45 = vmax.f32 %v352_v32, 0.0  ;;  %v481_v46 = vmax.f32 %v353_v33, 0.0  ;;  %v482_v47 = vmax.f32 %v354_v34, 0.0  ;;  %v102_v32 = vld [vmem:[%s1740_s0 + $0x2c0] sm:$0xff] }
  0x3c   :  { %605 = vst [vmem:[%s1743_s3 + $0x208] sm:$0xff] %v477_v38  ;;  %606 = vst [vmem:[%s1743_s3 + $0x210] sm:$0xff] %v478_v39  ;;  %v222_v51 = vmul.f32 %v702_v1, %v87_v35  ;;  %v223_v52 = vmul.f32 %v702_v1, %v88_v36  ;;  %v224_v53 = vmul.f32 %v702_v1, %v89_v37  ;;  %v103_v37 = vld [vmem:[%s1740_s0 + $0x2c8] sm:$0xff]  ;;  %v104_v38 = vld [vmem:[%s1740_s0 + $0x2d0] sm:$0xff] }
  0x3d   :  { %607 = vst [vmem:[%s1743_s3 + $0x218] sm:$0xff] %v479_v40  ;;  %v483_v50 = vmax.f32 %v355_v41, 0.0  ;;  %608 = vst [vmem:[%s1743_s3 + $0x220] sm:$0xff] %v480_v45  ;;  %v356_v54 = vadd.f32 %v707_v2, %v221_v48  ;;  %v225_v55 = vmul.f32 %v702_v1, %v90_v42  ;;  %v226_v56 = vmul.f32 %v702_v1, %v91_v43  ;;  %v105_v39 = vld [vmem:[%s1740_s0 + $0x2d8] sm:$0xff]  ;;  %v107_v45 = vld [vmem:[%s1740_s0 + $0x2e8] sm:$0xff] }
  0x3e   :  { %609 = vst [vmem:[%s1743_s3 + $0x228] sm:$0xff] %v481_v46  ;;  %610 = vst [vmem:[%s1743_s3 + $0x230] sm:$0xff] %v482_v47  ;;  %v227_v57 = vmul.f32 %v702_v1, %v92_v44  ;;  %v357_v58 = vadd.f32 %v707_v2, %v222_v51  ;;  %v358_v59 = vadd.f32 %v707_v2, %v223_v52  ;;  %v106_v44 = vld [vmem:[%s1740_s0 + $0x2e0] sm:$0xff]  ;;  %v108_v46 = vld [vmem:[%s1740_s0 + $0x2f0] sm:$0xff] }
  0x3f   :  { %611 = vst [vmem:[%s1743_s3 + $0x238] sm:$0xff] %v483_v50  ;;  %v359_v60 = vadd.f32 %v707_v2, %v224_v53  ;;  %v228_v61 = vmul.f32 %v702_v1, %v93_v49  ;;  %v484_v63 = vmax.f32 %v356_v54, 0.0  ;;  %v360_v0 = vadd.f32 %v707_v2, %v225_v55  ;;  %v109_v51 = vld [vmem:[%s1740_s0 + $0x2f8] sm:$0xff] }
  0x40   :  { %v361_v3 = vadd.f32 %v707_v2, %v226_v56  ;;  %v362_v4 = vadd.f32 %v707_v2, %v227_v57  ;;  %v485_v8 = vmax.f32 %v357_v58, 0.0  ;;  %v486_v9 = vmax.f32 %v358_v59, 0.0 }
  0x41   :  { %v487_v10 = vmax.f32 %v359_v60, 0.0  ;;  %v363_v11 = vadd.f32 %v707_v2, %v228_v61  ;;  %612 = vst [vmem:[%s1743_s3 + $0x240] sm:$0xff] %v484_v63  ;;  %v488_v15 = vmax.f32 %v360_v0, 0.0  ;;  %v229_v18 = vmul.f32 %v702_v1, %v94_v62  ;;  %v110_v0 = vld [vmem:[%s1740_s0 + $0x300] sm:$0xff] }
  0x42   :  { %v489_v16 = vmax.f32 %v361_v3, 0.0  ;;  %v490_v17 = vmax.f32 %v362_v4, 0.0  ;;  %613 = vst [vmem:[%s1743_s3 + $0x248] sm:$0xff] %v485_v8  ;;  %614 = vst [vmem:[%s1743_s3 + $0x250] sm:$0xff] %v486_v9  ;;  %v230_v21 = vmul.f32 %v702_v1, %v95_v5  ;;  %v231_v22 = vmul.f32 %v702_v1, %v96_v6  ;;  %v112_v8 = vld [vmem:[%s1740_s0 + $0x310] sm:$0xff]  ;;  %v113_v9 = vld [vmem:[%s1740_s0 + $0x318] sm:$0xff] }
  0x43   :  { %615 = vst [vmem:[%s1743_s3 + $0x258] sm:$0xff] %v487_v10  ;;  %v491_v20 = vmax.f32 %v363_v11, 0.0  ;;  %v232_v23 = vmul.f32 %v702_v1, %v97_v7  ;;  %616 = vst [vmem:[%s1743_s3 + $0x260] sm:$0xff] %v488_v15  ;;  %v364_v24 = vadd.f32 %v707_v2, %v229_v18  ;;  %v233_v25 = vmul.f32 %v702_v1, %v98_v12  ;;  %v111_v7 = vld [vmem:[%s1740_s0 + $0x308] sm:$0xff] }
  0x44   :  { %617 = vst [vmem:[%s1743_s3 + $0x268] sm:$0xff] %v489_v16  ;;  %618 = vst [vmem:[%s1743_s3 + $0x270] sm:$0xff] %v490_v17  ;;  %v234_v26 = vmul.f32 %v702_v1, %v99_v13  ;;  %v235_v27 = vmul.f32 %v702_v1, %v100_v14  ;;  %v365_v28 = vadd.f32 %v707_v2, %v230_v21  ;;  %v114_v14 = vld [vmem:[%s1740_s0 + $0x320] sm:$0xff]  ;;  %v115_v15 = vld [vmem:[%s1740_s0 + $0x328] sm:$0xff] }
  0x45   :  { %619 = vst [vmem:[%s1743_s3 + $0x278] sm:$0xff] %v491_v20  ;;  %v366_v29 = vadd.f32 %v707_v2, %v231_v22  ;;  %v367_v30 = vadd.f32 %v707_v2, %v232_v23  ;;  %v236_v31 = vmul.f32 %v702_v1, %v101_v19  ;;  %v492_v33 = vmax.f32 %v364_v24, 0.0  ;;  %v116_v16 = vld [vmem:[%s1740_s0 + $0x330] sm:$0xff]  ;;  %v117_v21 = vld [vmem:[%s1740_s0 + $0x338] sm:$0xff] }
  0x46   :  { %v368_v34 = vadd.f32 %v707_v2, %v233_v25  ;;  %v369_v35 = vadd.f32 %v707_v2, %v234_v26  ;;  %v370_v36 = vadd.f32 %v707_v2, %v235_v27  ;;  %v493_v40 = vmax.f32 %v365_v28, 0.0 }
  0x47   :  { %v494_v41 = vmax.f32 %v366_v29, 0.0  ;;  %v495_v42 = vmax.f32 %v367_v30, 0.0  ;;  %v371_v43 = vadd.f32 %v707_v2, %v236_v31  ;;  %620 = vst [vmem:[%s1743_s3 + $0x280] sm:$0xff] %v492_v33  ;;  %v237_v50 = vmul.f32 %v702_v1, %v102_v32 }
  0x48   :  { %v496_v47 = vmax.f32 %v368_v34, 0.0  ;;  %v497_v48 = vmax.f32 %v369_v35, 0.0  ;;  %v498_v49 = vmax.f32 %v370_v36, 0.0  ;;  %621 = vst [vmem:[%s1743_s3 + $0x288] sm:$0xff] %v493_v40  ;;  %v238_v53 = vmul.f32 %v702_v1, %v103_v37  ;;  %v118_v34 = vld [vmem:[%s1740_s0 + $0x340] sm:$0xff]  ;;  %v120_v40 = vld [vmem:[%s1740_s0 + $0x350] sm:$0xff] }
  0x49   :  { %622 = vst [vmem:[%s1743_s3 + $0x290] sm:$0xff] %v494_v41  ;;  %623 = vst [vmem:[%s1743_s3 + $0x298] sm:$0xff] %v495_v42  ;;  %v499_v52 = vmax.f32 %v371_v43, 0.0  ;;  %v239_v54 = vmul.f32 %v702_v1, %v104_v38  ;;  %v240_v55 = vmul.f32 %v702_v1, %v105_v39  ;;  %v372_v56 = vadd.f32 %v707_v2, %v237_v50  ;;  %v119_v39 = vld [vmem:[%s1740_s0 + $0x348] sm:$0xff] }
  0x4a   :  { %624 = vst [vmem:[%s1743_s3 + $0x2a0] sm:$0xff] %v496_v47  ;;  %625 = vst [vmem:[%s1743_s3 + $0x2a8] sm:$0xff] %v497_v48  ;;  %v241_v57 = vmul.f32 %v702_v1, %v106_v44  ;;  %v242_v58 = vmul.f32 %v702_v1, %v107_v45  ;;  %v243_v59 = vmul.f32 %v702_v1, %v108_v46  ;;  %v1528_v44 = vld [vmem:[%s1742_s2] ss:$0 sm:$0xff]  ;;  %v123_v46 = vld [vmem:[%s1740_s0 + $0x368] sm:$0xff] }
  0x4b   :  { %626 = vst [vmem:[%s1743_s3 + $0x2b0] sm:$0xff] %v498_v49  ;;  %627 = vst [vmem:[%s1743_s3 + $0x2b8] sm:$0xff] %v499_v52  ;;  %v373_v60 = vadd.f32 %v707_v2, %v238_v53  ;;  %v374_v61 = vadd.f32 %v707_v2, %v239_v54  ;;  %v375_v62 = vadd.f32 %v707_v2, %v240_v55  ;;  %v500_v3 = vmax.f32 %v372_v56, 0.0  ;;  %v122_v45 = vld [vmem:[%s1740_s0 + $0x360] sm:$0xff]  ;;  %v124_v47 = vld [vmem:[%s1740_s0 + $0x370] sm:$0xff] }
  0x4c   :  { %v244_v63 = vmul.f32 %v702_v1, %v109_v51  ;;  %v376_v4 = vadd.f32 %v707_v2, %v241_v57  ;;  %v377_v5 = vadd.f32 %v707_v2, %v242_v58  ;;  %v378_v6 = vadd.f32 %v707_v2, %v243_v59  ;;  %v1546_v51 = vld [vmem:[%s1741_s1] ss:$0 sm:$0xff]  ;;  %v125_v53 = vld [vmem:[%s1740_s0 + $0x378] sm:$0xff] }
  0x4d   :  { %v501_v10 = vmax.f32 %v373_v60, 0.0  ;;  %v502_v11 = vmax.f32 %v374_v61, 0.0  ;;  %v503_v12 = vmax.f32 %v375_v62, 0.0  ;;  %628 = vst [vmem:[%s1743_s3 + $0x2c0] sm:$0xff] %v500_v3  ;;  %v245_v20 = vmul.f32 %v702_v1, %v110_v0 }
  0x4e   :  { %v379_v13 = vadd.f32 %v707_v2, %v244_v63  ;;  %v504_v17 = vmax.f32 %v376_v4, 0.0  ;;  %v505_v18 = vmax.f32 %v377_v5, 0.0  ;;  %v506_v19 = vmax.f32 %v378_v6, 0.0  ;;  %v126_v4 = vld [vmem:[%s1740_s0 + $0x380] sm:$0xff] }
  0x4f   :  { %629 = vst [vmem:[%s1743_s3 + $0x2c8] sm:$0xff] %v501_v10  ;;  %630 = vst [vmem:[%s1743_s3 + $0x2d0] sm:$0xff] %v502_v11  ;;  %v246_v23 = vmul.f32 %v702_v1, %v111_v7  ;;  %v247_v24 = vmul.f32 %v702_v1, %v112_v8  ;;  %v248_v25 = vmul.f32 %v702_v1, %v113_v9  ;;  %v127_v9 = vld [vmem:[%s1740_s0 + $0x388] sm:$0xff]  ;;  %v128_v10 = vld [vmem:[%s1740_s0 + $0x390] sm:$0xff] }
  0x50   :  { %631 = vst [vmem:[%s1743_s3 + $0x2d8] sm:$0xff] %v503_v12  ;;  %v507_v22 = vmax.f32 %v379_v13, 0.0  ;;  %632 = vst [vmem:[%s1743_s3 + $0x2e0] sm:$0xff] %v504_v17  ;;  %v380_v26 = vadd.f32 %v707_v2, %v245_v20  ;;  %v249_v27 = vmul.f32 %v702_v1, %v114_v14  ;;  %v250_v28 = vmul.f32 %v702_v1, %v115_v15  ;;  %v129_v11 = vld [vmem:[%s1740_s0 + $0x398] sm:$0xff]  ;;  %v131_v17 = vld [vmem:[%s1740_s0 + $0x3a8] sm:$0xff] }
  0x51   :  { %633 = vst [vmem:[%s1743_s3 + $0x2e8] sm:$0xff] %v505_v18  ;;  %634 = vst [vmem:[%s1743_s3 + $0x2f0] sm:$0xff] %v506_v19  ;;  %v251_v29 = vmul.f32 %v702_v1, %v116_v16  ;;  %v381_v30 = vadd.f32 %v707_v2, %v246_v23  ;;  %v382_v31 = vadd.f32 %v707_v2, %v247_v24  ;;  %v130_v16 = vld [vmem:[%s1740_s0 + $0x3a0] sm:$0xff]  ;;  %v132_v18 = vld [vmem:[%s1740_s0 + $0x3b0] sm:$0xff] }
  0x52   :  { %635 = vst [vmem:[%s1743_s3 + $0x2f8] sm:$0xff] %v507_v22  ;;  %v383_v32 = vadd.f32 %v707_v2, %v248_v25  ;;  %v252_v33 = vmul.f32 %v702_v1, %v117_v21  ;;  %v508_v35 = vmax.f32 %v380_v26, 0.0  ;;  %v384_v36 = vadd.f32 %v707_v2, %v249_v27  ;;  %v121_v1 = vld [vmem:[%s1740_s0 + $0x358] sm:$0xff] }
  0x53   :  { %v385_v37 = vadd.f32 %v707_v2, %v250_v28  ;;  %v386_v38 = vadd.f32 %v707_v2, %v251_v29  ;;  %v509_v41 = vmax.f32 %v381_v30, 0.0  ;;  %v510_v42 = vmax.f32 %v382_v31, 0.0  ;;  %v133_v23 = vld [vmem:[%s1740_s0 + $0x3b8] sm:$0xff] }
  0x54   :  { %v511_v43 = vmax.f32 %v383_v32, 0.0  ;;  %v387_v2 = vadd.f32 %v1528_v44, %v252_v33  ;;  %636 = vst [vmem:[%s1743_s3 + $0x300] sm:$0xff] %v508_v35  ;;  %v512_v48 = vmax.f32 %v384_v36, 0.0  ;;  %v253_v52 = vmul.f32 %v1546_v51, %v118_v34  ;;  %v134_v36 = vld [vmem:[%s1740_s0 + $0x3c0] sm:$0xff] }
  0x55   :  { %v513_v49 = vmax.f32 %v385_v37, 0.0  ;;  %v514_v50 = vmax.f32 %v386_v38, 0.0  ;;  %637 = vst [vmem:[%s1743_s3 + $0x308] sm:$0xff] %v509_v41  ;;  %638 = vst [vmem:[%s1743_s3 + $0x310] sm:$0xff] %v510_v42  ;;  %v254_v55 = vmul.f32 %v1546_v51, %v119_v39  ;;  %v255_v56 = vmul.f32 %v1546_v51, %v120_v40  ;;  %v136_v41 = vld [vmem:[%s1740_s0 + $0x3d0] sm:$0xff]  ;;  %v137_v42 = vld [vmem:[%s1740_s0 + $0x3d8] sm:$0xff] }
  0x56   :  { %639 = vst [vmem:[%s1743_s3 + $0x318] sm:$0xff] %v511_v43  ;;  %v515_v54 = vmax.f32 %v387_v2, 0.0  ;;  %v256_v57 = vmul.f32 %v1546_v51, %v121_v1  ;;  %640 = vst [vmem:[%s1743_s3 + $0x320] sm:$0xff] %v512_v48  ;;  %v388_v58 = vadd.f32 %v1528_v44, %v253_v52  ;;  %v257_v59 = vmul.f32 %v1546_v51, %v122_v45  ;;  %v135_v1 = vld [vmem:[%s1740_s0 + $0x3c8] sm:$0xff] }
  0x57   :  { %641 = vst [vmem:[%s1743_s3 + $0x328] sm:$0xff] %v513_v49  ;;  %642 = vst [vmem:[%s1743_s3 + $0x330] sm:$0xff] %v514_v50  ;;  %v258_v60 = vmul.f32 %v1546_v51, %v123_v46  ;;  %v259_v61 = vmul.f32 %v1546_v51, %v124_v47  ;;  %v389_v62 = vadd.f32 %v1528_v44, %v254_v55  ;;  %v138_v47 = vld [vmem:[%s1740_s0 + $0x3e0] sm:$0xff]  ;;  %v139_v48 = vld [vmem:[%s1740_s0 + $0x3e8] sm:$0xff] }
  0x58   :  { %643 = vst [vmem:[%s1743_s3 + $0x338] sm:$0xff] %v515_v54  ;;  %v390_v63 = vadd.f32 %v1528_v44, %v255_v56  ;;  %v391_v0 = vadd.f32 %v1528_v44, %v256_v57  ;;  %v260_v3 = vmul.f32 %v1546_v51, %v125_v53  ;;  %v516_v5 = vmax.f32 %v388_v58, 0.0  ;;  %v140_v49 = vld [vmem:[%s1740_s0 + $0x3f0] sm:$0xff]  ;;  %v141_v55 = vld [vmem:[%s1740_s0 + $0x3f8] sm:$0xff] }
  0x59   :  { %v392_v6 = vadd.f32 %v1528_v44, %v257_v59  ;;  %v393_v7 = vadd.f32 %v1528_v44, %v258_v60  ;;  %v394_v8 = vadd.f32 %v1528_v44, %v259_v61  ;;  %v517_v12 = vmax.f32 %v389_v62, 0.0 }
  0x5a   :  { %v518_v13 = vmax.f32 %v390_v63, 0.0  ;;  %v519_v14 = vmax.f32 %v391_v0, 0.0  ;;  %v395_v15 = vadd.f32 %v1528_v44, %v260_v3  ;;  %644 = vst [vmem:[%s1743_s3 + $0x340] sm:$0xff] %v516_v5  ;;  %v261_v22 = vmul.f32 %v1546_v51, %v126_v4 }
  0x5b   :  { %v520_v19 = vmax.f32 %v392_v6, 0.0  ;;  %v521_v20 = vmax.f32 %v393_v7, 0.0  ;;  %v522_v21 = vmax.f32 %v394_v8, 0.0  ;;  %645 = vst [vmem:[%s1743_s3 + $0x348] sm:$0xff] %v517_v12  ;;  %v262_v25 = vmul.f32 %v1546_v51, %v127_v9 }
  0x5c   :  { %646 = vst [vmem:[%s1743_s3 + $0x350] sm:$0xff] %v518_v13  ;;  %647 = vst [vmem:[%s1743_s3 + $0x358] sm:$0xff] %v519_v14  ;;  %v523_v24 = vmax.f32 %v395_v15, 0.0  ;;  %v263_v26 = vmul.f32 %v1546_v51, %v128_v10  ;;  %v264_v27 = vmul.f32 %v1546_v51, %v129_v11  ;;  %v396_v28 = vadd.f32 %v1528_v44, %v261_v22 }
  0x5d   :  { %648 = vst [vmem:[%s1743_s3 + $0x360] sm:$0xff] %v520_v19  ;;  %649 = vst [vmem:[%s1743_s3 + $0x368] sm:$0xff] %v521_v20  ;;  %v265_v29 = vmul.f32 %v1546_v51, %v130_v16  ;;  %v266_v30 = vmul.f32 %v1546_v51, %v131_v17  ;;  %v267_v31 = vmul.f32 %v1546_v51, %v132_v18 }
  0x5e   :  { %650 = vst [vmem:[%s1743_s3 + $0x370] sm:$0xff] %v522_v21  ;;  %651 = vst [vmem:[%s1743_s3 + $0x378] sm:$0xff] %v523_v24  ;;  %v397_v32 = vadd.f32 %v1528_v44, %v262_v25  ;;  %v398_v33 = vadd.f32 %v1528_v44, %v263_v26  ;;  %v399_v34 = vadd.f32 %v1528_v44, %v264_v27  ;;  %v524_v37 = vmax.f32 %v396_v28, 0.0 }
  0x5f   :  { %v268_v35 = vmul.f32 %v1546_v51, %v133_v23  ;;  %v400_v38 = vadd.f32 %v1528_v44, %v265_v29  ;;  %v401_v39 = vadd.f32 %v1528_v44, %v266_v30  ;;  %v402_v40 = vadd.f32 %v1528_v44, %v267_v31 }
  0x60   :  { %v525_v43 = vmax.f32 %v397_v32, 0.0  ;;  %v526_v2 = vmax.f32 %v398_v33, 0.0  ;;  %v527_v45 = vmax.f32 %v399_v34, 0.0  ;;  %652 = vst [vmem:[%s1743_s3 + $0x380] sm:$0xff] %v524_v37  ;;  %v269_v54 = vmul.f32 %v1546_v51, %v134_v36 }
  0x61   :  { %v403_v46 = vadd.f32 %v1528_v44, %v268_v35  ;;  %v528_v50 = vmax.f32 %v400_v38, 0.0  ;;  %v529_v52 = vmax.f32 %v401_v39, 0.0  ;;  %v530_v53 = vmax.f32 %v402_v40, 0.0 }
  0x62   :  { %653 = vst [vmem:[%s1743_s3 + $0x388] sm:$0xff] %v525_v43  ;;  %654 = vst [vmem:[%s1743_s3 + $0x390] sm:$0xff] %v526_v2  ;;  %v270_v57 = vmul.f32 %v1546_v51, %v135_v1  ;;  %v271_v58 = vmul.f32 %v1546_v51, %v136_v41  ;;  %v272_v59 = vmul.f32 %v1546_v51, %v137_v42 }
  0x63   :  { %655 = vst [vmem:[%s1743_s3 + $0x398] sm:$0xff] %v527_v45  ;;  %v531_v56 = vmax.f32 %v403_v46, 0.0  ;;  %656 = vst [vmem:[%s1743_s3 + $0x3a0] sm:$0xff] %v528_v50  ;;  %v404_v60 = vadd.f32 %v1528_v44, %v269_v54  ;;  %v273_v61 = vmul.f32 %v1546_v51, %v138_v47  ;;  %v274_v62 = vmul.f32 %v1546_v51, %v139_v48 }
  0x64   :  { %657 = vst [vmem:[%s1743_s3 + $0x3a8] sm:$0xff] %v529_v52  ;;  %658 = vst [vmem:[%s1743_s3 + $0x3b0] sm:$0xff] %v530_v53  ;;  %v275_v63 = vmul.f32 %v1546_v51, %v140_v49  ;;  %v405_v0 = vadd.f32 %v1528_v44, %v270_v57  ;;  %v406_v3 = vadd.f32 %v1528_v44, %v271_v58 }
  0x65   :  { %659 = vst [vmem:[%s1743_s3 + $0x3b8] sm:$0xff] %v531_v56  ;;  %v407_v4 = vadd.f32 %v1528_v44, %v272_v59  ;;  %v276_v5 = vmul.f32 %v1546_v51, %v141_v55  ;;  %v532_v6 = vmax.f32 %v404_v60, 0.0  ;;  %v408_v7 = vadd.f32 %v1528_v44, %v273_v61 }
  0x66   :  { %v409_v8 = vadd.f32 %v1528_v44, %v274_v62  ;;  %v410_v9 = vadd.f32 %v1528_v44, %v275_v63  ;;  %v533_v10 = vmax.f32 %v405_v0, 0.0  ;;  %v534_v11 = vmax.f32 %v406_v3, 0.0 }
  0x67   :  { %v535_v12 = vmax.f32 %v407_v4, 0.0  ;;  %v411_v13 = vadd.f32 %v1528_v44, %v276_v5  ;;  %660 = vst [vmem:[%s1743_s3 + $0x3c0] sm:$0xff] %v532_v6  ;;  %v536_v14 = vmax.f32 %v408_v7, 0.0 }
  0x68   :  { %v537_v15 = vmax.f32 %v409_v8, 0.0  ;;  %v538_v16 = vmax.f32 %v410_v9, 0.0  ;;  %661 = vst [vmem:[%s1743_s3 + $0x3c8] sm:$0xff] %v533_v10  ;;  %662 = vst [vmem:[%s1743_s3 + $0x3d0] sm:$0xff] %v534_v11 }
  0x69   :  { %663 = vst [vmem:[%s1743_s3 + $0x3d8] sm:$0xff] %v535_v12  ;;  %v539_v44 = vmax.f32 %v411_v13, 0.0  ;;  %664 = vst [vmem:[%s1743_s3 + $0x3e0] sm:$0xff] %v536_v14 }
  0x6a   :  { %665 = vst [vmem:[%s1743_s3 + $0x3e8] sm:$0xff] %v537_v15  ;;  %666 = vst [vmem:[%s1743_s3 + $0x3f0] sm:$0xff] %v538_v16 }
  0x6b   :  { %667 = vst [vmem:[%s1743_s3 + $0x3f8] sm:$0xff] %v539_v44 }

// kernel: double_conv_forward.6
= control target key start
LH: loop header
LB: loop body
LE: loop exit
PB: predicated region body
PF: predicated region fallthrough
CT: control target
= control target key end

     0   :  { %s1883_s18 = smov 0   ;;  %s1885_s19 = smov 0   ;;  %s2348_s0 = inlined_call_operand.vmem [shape: f32[2,10,10,10,128], index: 0, kind: input, shape index: {}]   ;;  %s2349_s1 = inlined_call_operand.vmem [shape: f32[3,1152,128], index: 1, kind: input, shape index: {}]   ;;  %s2350_s2 = inlined_call_operand.vmem [shape: f32[1,128], index: 2, kind: input, shape index: {}]   ;;  %s2351_s3 = inlined_call_operand.vmem [shape: f32[2,8,64,128], index: 3, kind: output, shape index: {0}]   ;;  %s2352_s4 = inlined_call_operand.vmem [shape: f32[2,8,1,128], index: 4, kind: output, shape index: {1}]   ;;  %s2353_s5 = inlined_call_operand.vmem [shape: f32[2,8,1,128], index: 5, kind: output, shape index: {2}]  }
   0x1   :  { %s1887_s20 = smov 0   ;;  %s1889_s21 = smov 0  }
   0x2   :  { %s1891_s22 = smov 0   ;;  %s1893_s23 = smov 0  }
   0x3   :  { %s1895_s24 = smov 0  }
   0x4 LB: > { %s28_s25 = sadd.s32 1, %s1838_s21  ;;  %s31_s26 = sadd.s32 1, %s1842_s22  ;;  %s1850_s24 = sphi %s1895_s24, %s16_s24   ;;  %s1846_s23 = sphi %s1893_s23, %s2387_s23   ;;  %s1842_s22 = sphi %s1891_s22, %s2386_s22   ;;  %s1838_s21 = sphi %s1889_s21, %s2385_s21   ;;  %s1834_s20 = sphi %s1887_s20, %s2384_s20   ;;  %s1830_s19 = sphi %s1885_s19, %s2383_s19   ;;  %s1826_s18 = sphi %s1883_s18, %s2382_s18  }
   0x5   : > { %p29_p0 = scmp.ge.s32.totalorder %s28_s25, 3  ;;  %p1401_p1 = scmp.ge.s32.totalorder %s1850_s24, 1 }
   0x6   : > { %p227_p2 = scmp.lt.s32.totalorder %s1850_s24, 49  ;;  %s35_s27 = sadd.s32 1, %s1846_s23 }
   0x7   : > { %s2389_s25 = smov (%p29_p0, %s28_s25), 0  ;;  %s2391_s26 = smov (!%p29_p0, %s31_s26), %s1842_s22 }
   0x8   : > { %p228_p3 = pnand %p1401_p1, %p227_p2  ;;  %p33_p4 = scmp.ge.s32.totalorder %s2391_s26, 8 }
   0xa   : > { %s2393_s26 = smov (%p33_p4, %s2391_s26), 0  ;;  %s2395_s27 = smov (!%p33_p4, %s35_s27), %s1846_s23 }
   0xb   : > { %2354 = sst [smem:[#allocation3_spill]] %s2393_s26  ;;  %p37_p5 = scmp.ge.s32.totalorder %s2395_s27, 2 }
   0xc   : > { %231 = sbr.rel (%p228_p3) target bundleno = 412 (0x19c), region = 32 }
   0xd   : > { %s2397_s27 = smov (%p37_p5, %s2395_s27), 0 }
   0xe   : > { %2355 = sst [smem:[#allocation4_spill]] %s2397_s27 }
  0x11   : > { %s278_s28 = sadd.s32 %s1826_s18, %s1830_s19  ;;  %p279_p6 = scmp.lt.s32.totalorder %s1834_s20, 1 }
  0x12   : > { %p281_p7 = scmp.lt.s32.totalorder %s278_s28, 9  ;;  %p291_p8 = scmp.lt.s32.totalorder %s1830_s19, 7 }
  0x13   : > { %s2399_s20 = smov (!%p279_p6, %s1834_s20), 1  ;;  %p1408_p9 = scmp.ne.s32.totalorder %s1826_s18, 0 }
  0x14   : > { %s2401_s28 = smov (!%p281_p7, %s278_s28), 9  ;;  %s1738_s29 = smul.u32 200, %s2399_s20 }
  0x15   : > { %s1737_s30 = smul.u32 20, %s2401_s28  ;;  %s1404_s6 = sshll.u32 %s2399_s20, 6 }
  0x16   : > { %s2403_s19 = smov (!%p291_p8, %s1830_s19), 7  ;;  %s1406_s8 = sshll.u32 %s2399_s20, 3 }
  0x17   : > { %s285_s7 = sadd.s32 %s1738_s29, %s1737_s30  ;;  %s1403_s10 = sshll.u32 %s2403_s19, 3 }
  0x18   : > { %s1402_s9 = sshll.u32 %s285_s7, 3  ;;  %s295_s14 = sadd.s32 %s1404_s6, %s1403_s10 }
  0x19   : > { %s1936_s13 = scalar_lea.vmem %s2348_s0, %s1402_s9  ;;  %s1405_s15 = sshll.u32 %s295_s14, 3 }
  0x1a   : > { %s1938_s16 = sadd.s32 %s1406_s8, %s2403_s19  ;;  %s1943_s28 = scalar_lea.vmem %s2351_s3, %s1405_s15 }
  0x1b   : > { %s304_s30 = scalar_lea.vmem %s2352_s4, %s1938_s16  ;;  %s311_s9 = scalar_lea.vmem %s2353_s5, %s1938_s16 }
  0x1c   : > { %315 = sbr.rel (%p1408_p9) target bundleno = 38 (0x26), region = 36 }
  0x21   : > { %v1852_v0 = vmov 0.0  }
  0x22   : > { %316 = vst [vmem:[#allocation2 + $0x30] sm:$0xff] %v1852_v0  ;;  %317 = vst [vmem:[#allocation2] sm:$0xff] %v1852_v0 }
  0x23   : > { %318 = vst [vmem:[#allocation2 + $0x18] sm:$0xff] %v1852_v0  ;;  %319 = vst [vmem:[#allocation2 + $0x10] sm:$0xff] %v1852_v0 }
  0x24   : > { %320 = vst [vmem:[#allocation2 + $0x8] sm:$0xff] %v1852_v0  ;;  %321 = vst [vmem:[#allocation2 + $0x20] sm:$0xff] %v1852_v0 }
  0x25   : > { %322 = vst [vmem:[#allocation2 + $0x28] sm:$0xff] %v1852_v0  ;;  %323 = vst [vmem:[#allocation2 + $0x38] sm:$0xff] %v1852_v0 }
  0x26 PF: > { %s454_s19 = smul.u32 1152, %s1826_s18  ;;  %v1956_v1 = vld [vmem:[%s1936_s13 + $0x10] sm:$0xff]  ;;  %v324_v50 = vld [vmem:[%s1936_s13] sm:$0xff]  ;;  %v325_v53 = vld [vmem:[%s1936_s13 + $0x8] sm:$0x3]  ;;  %vm360_vm0 = vcmask 1046528  }
  0x27   : > { %769 = vmatprep.mubr.f32.mxu1 %v1956_v1  ;;  %v361_v60 = vrot.slane %v324_v50, 1  ;;  %v362_v61 = vrot.slane %v325_v53, 1  ;;  %vm393_vm1 = vcmask 1045504   ;;  %p1409_p10 = scmp.ne.s32.totalorder %s1826_s18, 2 }
  0x28   : > { %s1962_s6 = scalar_lea.vmem %s2349_s1, %s454_s19 }
  0x29   : > { %v487_v2 = vld [vmem:[%s1962_s6 + $0xf8] sm:$0xff]  ;;  %v486_v6 = vld [vmem:[%s1962_s6 + $0xf0] sm:$0xff]  ;;  %v485_v10 = vld [vmem:[%s1962_s6 + $0xe8] sm:$0xff] }
  0x2a   : > { %v519_v3 = vld [vmem:[%s1962_s6 + $0x1f8] sm:$0xff]  ;;  %1413 = vmatprep.subr.mxu0 %v487_v2  ;;  %v518_v7 = vld [vmem:[%s1962_s6 + $0x1f0] sm:$0xff]  ;;  %v517_v11 = vld [vmem:[%s1962_s6 + $0x1e8] sm:$0xff] }
  0x2b   : > { %v471_v4 = vld [vmem:[%s1962_s6 + $0x78] sm:$0xff]  ;;  %1469 = vmatprep.subr.mxu1 %v519_v3  ;;  %v470_v8 = vld [vmem:[%s1962_s6 + $0x70] sm:$0xff]  ;;  %v469_v12 = vld [vmem:[%s1962_s6 + $0x68] sm:$0xff]  ;;  %v394_v3 = vrot.slane %v324_v50, 2 }
  0x2c   : > { %v503_v5 = vld [vmem:[%s1962_s6 + $0x178] sm:$0xff]  ;;  %1414 = vmatpush3.msra.mxu0 %v471_v4  ;;  %v502_v9 = vld [vmem:[%s1962_s6 + $0x170] sm:$0xff]  ;;  %v501_v13 = vld [vmem:[%s1962_s6 + $0x168] sm:$0xff]  ;;  %v395_v4 = vrot.slane %v325_v53, 2 }
  0x2d   : > { %1470 = vmatpush3.msra.mxu1 %v503_v5  ;;  %1415 = vmatprep.subr.mxu0 %v486_v6  ;;  %v484_v14 = vld [vmem:[%s1962_s6 + $0xe0] sm:$0xff]  ;;  %v483_v18 = vld [vmem:[%s1962_s6 + $0xd8] sm:$0xff]  ;;  %v482_v22 = vld [vmem:[%s1962_s6 + $0xd0] sm:$0xff] }
  0x2e   : > { %1471 = vmatprep.subr.mxu1 %v518_v7  ;;  %1416 = vmatpush3.msra.mxu0 %v470_v8  ;;  %v516_v15 = vld [vmem:[%s1962_s6 + $0x1e0] sm:$0xff]  ;;  %v515_v19 = vld [vmem:[%s1962_s6 + $0x1d8] sm:$0xff]  ;;  %v514_v23 = vld [vmem:[%s1962_s6 + $0x1d0] sm:$0xff] }
  0x2f   : > { %1472 = vmatpush3.msra.mxu1 %v502_v9  ;;  %1417 = vmatprep.subr.mxu0 %v485_v10  ;;  %v468_v16 = vld [vmem:[%s1962_s6 + $0x60] sm:$0xff]  ;;  %v467_v20 = vld [vmem:[%s1962_s6 + $0x58] sm:$0xff]  ;;  %v466_v24 = vld [vmem:[%s1962_s6 + $0x50] sm:$0xff]  ;;  %v363_v9 = vsel %vm360_vm0, %v361_v60, %v362_v61 }
  0x30   : > { %1473 = vmatprep.subr.mxu1 %v517_v11  ;;  %v500_v17 = vld [vmem:[%s1962_s6 + $0x160] sm:$0xff]  ;;  %1418 = vmatpush3.msra.mxu0 %v469_v12  ;;  %v499_v21 = vld [vmem:[%s1962_s6 + $0x158] sm:$0xff]  ;;  %v498_v25 = vld [vmem:[%s1962_s6 + $0x150] sm:$0xff]  ;;  %v364_v11 = vrot.slane %v1956_v1, 1 }
  0x31   : > { %1474 = vmatpush3.msra.mxu1 %v501_v13  ;;  %1419 = vmatprep.subr.mxu0 %v484_v14  ;;  %v481_v26 = vld [vmem:[%s1962_s6 + $0xc8] sm:$0xff]  ;;  %v480_v30 = vld [vmem:[%s1962_s6 + $0xc0] sm:$0xff]  ;;  %v479_v34 = vld [vmem:[%s1962_s6 + $0xb8] sm:$0xff]  ;;  %v396_v13 = vsel %vm393_vm1, %v394_v3, %v395_v4 }
  0x32   : > { %1475 = vmatprep.subr.mxu1 %v516_v15  ;;  %1420 = vmatpush3.msra.mxu0 %v468_v16  ;;  %v513_v27 = vld [vmem:[%s1962_s6 + $0x1c8] sm:$0xff]  ;;  %v512_v31 = vld [vmem:[%s1962_s6 + $0x1c0] sm:$0xff]  ;;  %v511_v35 = vld [vmem:[%s1962_s6 + $0x1b8] sm:$0xff] }
  0x33   : > { %1476 = vmatpush3.msra.mxu1 %v500_v17  ;;  %1421 = vmatprep.subr.mxu0 %v483_v18  ;;  %v465_v28 = vld [vmem:[%s1962_s6 + $0x48] sm:$0xff]  ;;  %v464_v32 = vld [vmem:[%s1962_s6 + $0x40] sm:$0xff]  ;;  %v463_v36 = vld [vmem:[%s1962_s6 + $0x38] sm:$0xff] }
  0x34   : > { %1477 = vmatprep.subr.mxu1 %v515_v19  ;;  %1422 = vmatpush3.msra.mxu0 %v467_v20  ;;  %v497_v29 = vld [vmem:[%s1962_s6 + $0x148] sm:$0xff]  ;;  %v496_v33 = vld [vmem:[%s1962_s6 + $0x140] sm:$0xff]  ;;  %v495_v37 = vld [vmem:[%s1962_s6 + $0x138] sm:$0xff]  ;;  %v397_v20 = vrot.slane %v1956_v1, 2 }
  0x35   : > { %1478 = vmatpush3.msra.mxu1 %v499_v21  ;;  %1423 = vmatprep.subr.mxu0 %v482_v22  ;;  %v478_v38 = vld [vmem:[%s1962_s6 + $0xb0] sm:$0xff]  ;;  %v477_v42 = vld [vmem:[%s1962_s6 + $0xa8] sm:$0xff]  ;;  %v476_v46 = vld [vmem:[%s1962_s6 + $0xa0] sm:$0xff] }
  0x36   : > { %1479 = vmatprep.subr.mxu1 %v514_v23  ;;  %1424 = vmatpush3.msra.mxu0 %v466_v24  ;;  %v510_v39 = vld [vmem:[%s1962_s6 + $0x1b0] sm:$0xff]  ;;  %v509_v43 = vld [vmem:[%s1962_s6 + $0x1a8] sm:$0xff]  ;;  %v508_v47 = vld [vmem:[%s1962_s6 + $0x1a0] sm:$0xff] }
  0x37   : > { %1480 = vmatpush3.msra.mxu1 %v498_v25  ;;  %1425 = vmatprep.subr.mxu0 %v481_v26  ;;  %v462_v40 = vld [vmem:[%s1962_s6 + $0x30] sm:$0xff]  ;;  %v461_v44 = vld [vmem:[%s1962_s6 + $0x28] sm:$0xff]  ;;  %v460_v48 = vld [vmem:[%s1962_s6 + $0x20] sm:$0xff] }
  0x38   : > { %1481 = vmatprep.subr.mxu1 %v513_v27  ;;  %1426 = vmatpush3.msra.mxu0 %v465_v28  ;;  %v494_v41 = vld [vmem:[%s1962_s6 + $0x130] sm:$0xff]  ;;  %v493_v45 = vld [vmem:[%s1962_s6 + $0x128] sm:$0xff]  ;;  %v492_v49 = vld [vmem:[%s1962_s6 + $0x120] sm:$0xff] }
  0x39   : > { %1482 = vmatpush3.msra.mxu1 %v497_v29  ;;  %1427 = vmatprep.subr.mxu0 %v480_v30  ;;  %v475_v51 = vld [vmem:[%s1962_s6 + $0x98] sm:$0xff]  ;;  %v474_v56 = vld [vmem:[%s1962_s6 + $0x90] sm:$0xff]  ;;  %v473_v62 = vld [vmem:[%s1962_s6 + $0x88] sm:$0xff] }
  0x3a   : > { %1483 = vmatprep.subr.mxu1 %v512_v31  ;;  %1428 = vmatpush3.msra.mxu0 %v464_v32  ;;  %v507_v52 = vld [vmem:[%s1962_s6 + $0x198] sm:$0xff]  ;;  %v506_v57 = vld [vmem:[%s1962_s6 + $0x190] sm:$0xff]  ;;  %v505_v63 = vld [vmem:[%s1962_s6 + $0x188] sm:$0xff] }
  0x3b   : > { %1484 = vmatpush3.msra.mxu1 %v496_v33  ;;  %1429 = vmatprep.subr.mxu0 %v479_v34  ;;  %v459_v54 = vld [vmem:[%s1962_s6 + $0x18] sm:$0xff]  ;;  %v458_v58 = vld [vmem:[%s1962_s6 + $0x10] sm:$0xff]  ;;  %v457_v0 = vld [vmem:[%s1962_s6 + $0x8] sm:$0xff] }
  0x3c   : > { %1485 = vmatprep.subr.mxu1 %v511_v35  ;;  %1430 = vmatpush3.msra.mxu0 %v463_v36  ;;  %v491_v55 = vld [vmem:[%s1962_s6 + $0x118] sm:$0xff]  ;;  %v490_v59 = vld [vmem:[%s1962_s6 + $0x110] sm:$0xff]  ;;  %v489_v2 = vld [vmem:[%s1962_s6 + $0x108] sm:$0xff] }
  0x3d   : > { %1486 = vmatpush3.msra.mxu1 %v495_v37  ;;  %1431 = vmatprep.subr.mxu0 %v478_v38  ;;  %v327_v5 = vld [vmem:[%s1936_s13 + $0x18] sm:$0x3]  ;;  %v472_v6 = vld [vmem:[%s1962_s6 + $0x80] sm:$0xff]  ;;  %v550_v19 = vld [vmem:[%s1962_s6 + $0x2f0] sm:$0xff] }
  0x3e   : > { %1487 = vmatprep.subr.mxu1 %v510_v39  ;;  %1432 = vmatpush3.msra.mxu0 %v462_v40  ;;  %v504_v7 = vld [vmem:[%s1962_s6 + $0x180] sm:$0xff]  ;;  %v365_v12 = vrot.slane %v327_v5, 1  ;;  %v551_v14 = vld [vmem:[%s1962_s6 + $0x2f8] sm:$0xff]  ;;  %v398_v21 = vrot.slane %v327_v5, 2  ;;  %v329_v22 = vld [vmem:[%s1936_s13 + $0x28] sm:$0x3] }
  0x3f   : > { %1488 = vmatpush3.msra.mxu1 %v494_v41  ;;  %1433 = vmatprep.subr.mxu0 %v477_v42  ;;  %v456_v8 = vld [vmem:[%s1962_s6] sm:$0xff]  ;;  %v583_v15 = vld [vmem:[%s1962_s6 + $0x3f8] sm:$0xff]  ;;  %v582_v23 = vld [vmem:[%s1962_s6 + $0x3f0] sm:$0xff]  ;;  %v368_v28 = vrot.slane %v329_v22, 1  ;;  %v401_v37 = vrot.slane %v329_v22, 2 }
  0x40   : > { %1489 = vmatprep.subr.mxu1 %v509_v43  ;;  %1434 = vmatpush3.msra.mxu0 %v461_v44  ;;  %v488_v10 = vld [vmem:[%s1962_s6 + $0x100] sm:$0xff]  ;;  %v535_v16 = vld [vmem:[%s1962_s6 + $0x278] sm:$0xff]  ;;  %v2046_v24 = vsel %vm360_vm0, %v364_v11, %v365_v12  ;;  %v534_v25 = vld [vmem:[%s1962_s6 + $0x270] sm:$0xff]  ;;  %v2053_v29 = vsel %vm393_vm1, %v397_v20, %v398_v21 }
  0x41   : > { %1490 = vmatpush3.msra.mxu1 %v493_v45  ;;  %1435 = vmatprep.subr.mxu0 %v476_v46  ;;  %v2038_v17 = vld [vmem:[%s1936_s13 + $0x20] sm:$0xff]  ;;  %v567_v18 = vld [vmem:[%s1962_s6 + $0x378] sm:$0xff]  ;;  %v566_v26 = vld [vmem:[%s1962_s6 + $0x370] sm:$0xff] }
  0x42   : > { %1491 = vmatprep.subr.mxu1 %v508_v47  ;;  %1436 = vmatpush3.msra.mxu0 %v460_v48  ;;  %v367_v27 = vrot.slane %v2038_v17, 1  ;;  %v549_v30 = vld [vmem:[%s1962_s6 + $0x2e8] sm:$0xff]  ;;  %v2060_v33 = vld [vmem:[%s1936_s13 + $0x30] sm:$0xff]  ;;  %v548_v35 = vld [vmem:[%s1962_s6 + $0x2e0] sm:$0xff]  ;;  %v400_v36 = vrot.slane %v2038_v17, 2 }
  0x43   : > { %1492 = vmatpush3.msra.mxu1 %v492_v49  ;;  %1437 = vmatprep.subr.mxu0 %v475_v51  ;;  %v581_v31 = vld [vmem:[%s1962_s6 + $0x3e8] sm:$0xff]  ;;  %v331_v38 = vld [vmem:[%s1936_s13 + $0x38] sm:$0x3]  ;;  %v580_v39 = vld [vmem:[%s1962_s6 + $0x3e0] sm:$0xff]  ;;  %v370_v42 = vrot.slane %v2060_v33, 1  ;;  %v403_v51 = vrot.slane %v2060_v33, 2 }
  0x44   : > { %1493 = vmatprep.subr.mxu1 %v507_v52  ;;  %1438 = vmatpush3.msra.mxu0 %v459_v54  ;;  %v533_v32 = vld [vmem:[%s1962_s6 + $0x268] sm:$0xff]  ;;  %v2070_v40 = vsel %vm360_vm0, %v367_v27, %v368_v28  ;;  %v564_v41 = vld [vmem:[%s1962_s6 + $0x360] sm:$0xff]  ;;  %v371_v43 = vrot.slane %v331_v38, 1  ;;  %v2077_v44 = vsel %vm393_vm1, %v400_v36, %v401_v37  ;;  %v547_v45 = vld [vmem:[%s1962_s6 + $0x2d8] sm:$0xff]  ;;  %v404_v52 = vrot.slane %v331_v38, 2 }
  0x45   : > { %1494 = vmatpush3.msra.mxu1 %v491_v55  ;;  %1439 = vmatprep.subr.mxu0 %v474_v56  ;;  %v565_v34 = vld [vmem:[%s1962_s6 + $0x368] sm:$0xff]  ;;  %v579_v46 = vld [vmem:[%s1962_s6 + $0x3d8] sm:$0xff]  ;;  %v546_v49 = vld [vmem:[%s1962_s6 + $0x2d0] sm:$0xff] }
  0x46   : > { %1495 = vmatprep.subr.mxu1 %v506_v57  ;;  %1440 = vmatpush3.msra.mxu0 %v458_v58  ;;  %v531_v47 = vld [vmem:[%s1962_s6 + $0x258] sm:$0xff]  ;;  %v333_v53 = vld [vmem:[%s1936_s13 + $0x48] sm:$0x3]  ;;  %v578_v54 = vld [vmem:[%s1962_s6 + $0x3d0] sm:$0xff]  ;;  %v2094_v55 = vsel %vm360_vm0, %v370_v42, %v371_v43  ;;  %v2101_v60 = vsel %vm393_vm1, %v403_v51, %v404_v52 }
  0x47   : > { %1496 = vmatpush3.msra.mxu1 %v490_v59  ;;  %1441 = vmatprep.subr.mxu0 %v473_v62  ;;  %v563_v48 = vld [vmem:[%s1962_s6 + $0x358] sm:$0xff]  ;;  %v530_v56 = vld [vmem:[%s1962_s6 + $0x250] sm:$0xff]  ;;  %v374_v59 = vrot.slane %v333_v53, 1  ;;  %v545_v61 = vld [vmem:[%s1962_s6 + $0x2c8] sm:$0xff]  ;;  %v407_v5 = vrot.slane %v333_v53, 2 }
  0x48   : > { %1497 = vmatprep.subr.mxu1 %v505_v63  ;;  %1442 = vmatpush3.msra.mxu0 %v457_v0  ;;  %v562_v57 = vld [vmem:[%s1962_s6 + $0x350] sm:$0xff]  ;;  %v577_v62 = vld [vmem:[%s1962_s6 + $0x3c8] sm:$0xff]  ;;  %v2135_v20 = vld [vmem:[%s1936_s13 + $0x60] sm:$0xff] }
  0x49   : > { %1498 = vmatpush3.msra.mxu1 %v489_v2  ;;  %1443 = vmatprep.subr.mxu0 %v472_v6  ;;  %v529_v63 = vld [vmem:[%s1962_s6 + $0x248] sm:$0xff]  ;;  %v544_v2 = vld [vmem:[%s1962_s6 + $0x2c0] sm:$0xff]  ;;  %v2111_v3 = vld [vmem:[%s1936_s13 + $0x50] sm:$0xff] }
  0x4a   : > { %1499 = vmatprep.subr.mxu1 %v504_v7  ;;  %1444 = vmatpush3.msra.mxu0 %v456_v8  ;;  %v561_v0 = vld [vmem:[%s1962_s6 + $0x348] sm:$0xff]  ;;  %v335_v6 = vld [vmem:[%s1936_s13 + $0x58] sm:$0x3]  ;;  %v576_v7 = vld [vmem:[%s1962_s6 + $0x3c0] sm:$0xff]  ;;  %v376_v11 = vrot.slane %v2111_v3, 1  ;;  %v409_v21 = vrot.slane %v2111_v3, 2 }
  0x4b   : > { %664 = vmatprep.mubr.f32.mxu0 %v363_v9  ;;  %1500 = vmatpush3.msra.mxu1 %v488_v10  ;;  %v528_v9 = vld [vmem:[%s1962_s6 + $0x240] sm:$0xff]  ;;  %v377_v12 = vrot.slane %v335_v6, 1  ;;  %v410_v22 = vrot.slane %v335_v6, 2  ;;  %v526_v27 = vld [vmem:[%s1962_s6 + $0x230] sm:$0xff]  ;;  %v525_v36 = vld [vmem:[%s1962_s6 + $0x228] sm:$0xff] }
  0x4c   : > { %665 = vmatmul.mubr.f32.vlgmr.msra.gmra.mxu0 %v324_v50  ;;  %770 = vmatmul.mubr.f32.vlgmr.msra.gmra.mxu1 %v396_v13  ;;  %v2087_v50 = vld [vmem:[%s1936_s13 + $0x40] sm:$0xff]  ;;  %v558_v28 = vld [vmem:[%s1962_s6 + $0x330] sm:$0xff]  ;;  %v557_v37 = vld [vmem:[%s1962_s6 + $0x328] sm:$0xff] }
  0x4d   : > { %1525 = vmatprep.subr.mxu0 %v551_v14  ;;  %1581 = vmatprep.subr.mxu1 %v583_v15  ;;  %v373_v58 = vrot.slane %v2087_v50, 1  ;;  %v406_v4 = vrot.slane %v2087_v50, 2  ;;  %v560_v10 = vld [vmem:[%s1962_s6 + $0x340] sm:$0xff]  ;;  %v543_v14 = vld [vmem:[%s1962_s6 + $0x2b8] sm:$0xff]  ;;  %v569_v6 = vld [vmem:[%s1962_s6 + $0x388] sm:$0xff] }
  0x4e   : > { %1526 = vmatpush3.msra.mxu0 %v535_v16  ;;  %1582 = vmatpush3.msra.mxu1 %v567_v18  ;;  %v575_v15 = vld [vmem:[%s1962_s6 + $0x3b8] sm:$0xff]  ;;  %v540_v38 = vld [vmem:[%s1962_s6 + $0x2a0] sm:$0xff] }
  0x4f   : > { %1527 = vmatprep.subr.mxu0 %v550_v19  ;;  %1583 = vmatprep.subr.mxu1 %v582_v23  ;;  %v2118_v8 = vsel %vm360_vm0, %v373_v58, %v374_v59  ;;  %v2125_v13 = vsel %vm393_vm1, %v406_v4, %v407_v5  ;;  %v527_v16 = vld [vmem:[%s1962_s6 + $0x238] sm:$0xff]  ;;  %v542_v19 = vld [vmem:[%s1962_s6 + $0x2b0] sm:$0xff]  ;;  %v337_v23 = vld [vmem:[%s1936_s13 + $0x68] sm:$0x3] }
  0x50   : > { %669 = vmatprep.mubr.f32.mxu0 %v2046_v24  ;;  %774 = vmatprep.mubr.f32.mxu1 %v2038_v17  ;;  %v559_v18 = vld [vmem:[%s1962_s6 + $0x338] sm:$0xff]  ;;  %v572_v43 = vld [vmem:[%s1962_s6 + $0x3a0] sm:$0xff]  ;;  %v537_v5 = vld [vmem:[%s1962_s6 + $0x288] sm:$0xff] }
  0x51   : > { %1528 = vmatpush3.msra.mxu0 %v534_v25  ;;  %1584 = vmatpush3.msra.mxu1 %v566_v26  ;;  %v574_v25 = vld [vmem:[%s1962_s6 + $0x3b0] sm:$0xff]  ;;  %v2142_v26 = vsel %vm360_vm0, %v376_v11, %v377_v12  ;;  %v339_v42 = vld [vmem:[%s1936_s13 + $0x78] sm:$0x3]  ;;  %v568_v11 = vld [vmem:[%s1962_s6 + $0x380] sm:$0xff] }
  0x52   : > { %670 = vmatmul.mubr.f32.gmra.mxu0 %v1956_v1  ;;  %775 = vmatmul.mubr.f32.gmra.mxu1 %v2053_v29  ;;  %v532_v1 = vld [vmem:[%s1962_s6 + $0x260] sm:$0xff]  ;;  %v539_v52 = vld [vmem:[%s1962_s6 + $0x298] sm:$0xff]  ;;  %v416_v59 = vrot.slane %v339_v42, 2 }
  0x53   : > { %1529 = vmatprep.subr.mxu0 %v549_v30  ;;  %1585 = vmatprep.subr.mxu1 %v581_v31  ;;  %v379_v30 = vrot.slane %v2135_v20, 1  ;;  %v380_v31 = vrot.slane %v337_v23, 1  ;;  %v571_v53 = vld [vmem:[%s1962_s6 + $0x398] sm:$0xff]  ;;  %v520_v12 = vld [vmem:[%s1962_s6 + $0x200] sm:$0xff] }
  0x54   : > { %1530 = vmatpush3.msra.mxu0 %v533_v32  ;;  %1586 = vmatpush3.msra.mxu1 %v565_v34  ;;  %v2149_v32 = vsel %vm393_vm1, %v409_v21, %v410_v22  ;;  %v541_v34 = vld [vmem:[%s1962_s6 + $0x2a8] sm:$0xff]  ;;  %v342_v22 = vld [vmem:[%s1936_s13 + $0x90] sm:$0xff] }
  0x55   : > { %1531 = vmatprep.subr.mxu0 %v548_v35  ;;  %1587 = vmatprep.subr.mxu1 %v580_v39  ;;  %v573_v35 = vld [vmem:[%s1962_s6 + $0x3a8] sm:$0xff]  ;;  %v2159_v39 = vld [vmem:[%s1936_s13 + $0x70] sm:$0xff] }
  0x56   : > { %674 = vmatprep.mubr.f32.mxu0 %v2070_v40  ;;  %779 = vmatprep.mubr.f32.mxu1 %v2060_v33  ;;  %v415_v58 = vrot.slane %v2159_v39, 2 }
  0x57   : > { %1532 = vmatpush3.msra.mxu0 %v532_v1  ;;  %1588 = vmatpush3.msra.mxu1 %v564_v41  ;;  %v412_v1 = vrot.slane %v2135_v20, 2  ;;  %v413_v41 = vrot.slane %v337_v23, 2  ;;  %v343_v23 = vld [vmem:[%s1936_s13 + $0x98] sm:$0x3] }
  0x58   : > { %675 = vmatmul.mubr.f32.gmra.mxu0 %v2038_v17  ;;  %780 = vmatmul.mubr.f32.gmra.mxu1 %v2077_v44  ;;  %v2195_v4 = vsel %vm393_vm1, %v415_v58, %v416_v59 }
  0x59   : > { %1533 = vmatprep.subr.mxu0 %v547_v45  ;;  %1589 = vmatprep.subr.mxu1 %v579_v46  ;;  %v2166_v45 = vsel %vm360_vm0, %v379_v30, %v380_v31  ;;  %v524_v46 = vld [vmem:[%s1962_s6 + $0x220] sm:$0xff]  ;;  %v2173_v51 = vsel %vm393_vm1, %v412_v1, %v413_v41  ;;  %v438_v30 = vrot.slane %v342_v22, 1  ;;  %v439_v31 = vrot.slane %v343_v23, 1 }
  0x5a   : > { %1534 = vmatpush3.msra.mxu0 %v531_v47  ;;  %1590 = vmatpush3.msra.mxu1 %v563_v48  ;;  %v556_v47 = vld [vmem:[%s1962_s6 + $0x320] sm:$0xff]  ;;  %v382_v48 = vrot.slane %v2159_v39, 1  ;;  %v443_v1 = vrot.slane %v343_v23, 2 }
  0x5b   : > { %1535 = vmatprep.subr.mxu0 %v546_v49  ;;  %1591 = vmatprep.subr.mxu1 %v578_v54  ;;  %v383_v49 = vrot.slane %v339_v42, 1  ;;  %v523_v54 = vld [vmem:[%s1962_s6 + $0x218] sm:$0xff] }
  0x5c   : > { %679 = vmatprep.mubr.f32.mxu0 %v2094_v55  ;;  %784 = vmatprep.mubr.f32.mxu1 %v2087_v50 }
  0x5d   : > { %1536 = vmatpush3.msra.mxu0 %v530_v56  ;;  %1592 = vmatpush3.msra.mxu1 %v562_v57  ;;  %v555_v56 = vld [vmem:[%s1962_s6 + $0x318] sm:$0xff]  ;;  %v538_v57 = vld [vmem:[%s1962_s6 + $0x290] sm:$0xff] }
  0x5e   : > { %680 = vmatmul.mubr.f32.gmra.mxu0 %v2060_v33  ;;  %785 = vmatmul.mubr.f32.gmra.mxu1 %v2101_v60 }
  0x5f   : > { %1537 = vmatprep.subr.mxu0 %v545_v61  ;;  %1593 = vmatprep.subr.mxu1 %v577_v62  ;;  %v570_v61 = vld [vmem:[%s1962_s6 + $0x390] sm:$0xff]  ;;  %v2186_v62 = vsel %vm360_vm0, %v382_v48, %v383_v49 }
  0x60   : > { %1538 = vmatpush3.msra.mxu0 %v529_v63  ;;  %1594 = vmatpush3.msra.mxu1 %v561_v0  ;;  %v2189_v63 = vld [vmem:[%s1936_s13 + $0x80] sm:$0xff]  ;;  %v522_v0 = vld [vmem:[%s1962_s6 + $0x210] sm:$0xff] }
  0x61   : > { %1539 = vmatprep.subr.mxu0 %v544_v2  ;;  %1595 = vmatprep.subr.mxu1 %v576_v7  ;;  %v554_v2 = vld [vmem:[%s1962_s6 + $0x310] sm:$0xff]  ;;  %v521_v7 = vld [vmem:[%s1962_s6 + $0x208] sm:$0xff] }
  0x62   : > { %684 = vmatprep.mubr.f32.mxu0 %v2118_v8  ;;  %789 = vmatprep.mubr.f32.mxu1 %v2111_v3 }
  0x63   : > { %1540 = vmatpush3.msra.mxu0 %v528_v9  ;;  %1596 = vmatpush3.msra.mxu1 %v560_v10  ;;  %v553_v9 = vld [vmem:[%s1962_s6 + $0x308] sm:$0xff]  ;;  %v536_v10 = vld [vmem:[%s1962_s6 + $0x280] sm:$0xff] }
  0x64   : > { %685 = vmatmul.mubr.f32.gmra.mxu0 %v2087_v50  ;;  %790 = vmatmul.mubr.f32.gmra.mxu1 %v2125_v13 }
  0x65   : > { %1541 = vmatprep.subr.mxu0 %v543_v14  ;;  %1597 = vmatprep.subr.mxu1 %v575_v15  ;;  %v552_v14 = vld [vmem:[%s1962_s6 + $0x300] sm:$0xff]  ;;  %v599_v15 = vld [vmem:[%s1962_s6 + $0x478] sm:$0xff] }
  0x66   : > { %1542 = vmatpush3.msra.mxu0 %v527_v16  ;;  %1598 = vmatpush3.msra.mxu1 %v559_v18  ;;  %v598_v16 = vld [vmem:[%s1962_s6 + $0x470] sm:$0xff]  ;;  %v597_v18 = vld [vmem:[%s1962_s6 + $0x468] sm:$0xff] }
  0x67   : > { %1543 = vmatprep.subr.mxu0 %v542_v19  ;;  %1599 = vmatprep.subr.mxu1 %v574_v25  ;;  %v428_v19 = vrot.slane %v2189_v63, 1 }
  0x68   : > { %689 = vmatprep.mubr.f32.mxu0 %v2142_v26  ;;  %794 = vmatprep.mubr.f32.mxu1 %v2135_v20 }
  0x69   : > { %1544 = vmatpush3.msra.mxu0 %v526_v27  ;;  %1600 = vmatpush3.msra.mxu1 %v558_v28  ;;  %v587_v28 = vld [vmem:[%s1962_s6 + $0x418] sm:$0xff] }
  0x6a   : > { %690 = vmatmul.mubr.f32.gmra.mxu0 %v2111_v3  ;;  %795 = vmatmul.mubr.f32.gmra.mxu1 %v2149_v32 }
  0x6b   : > { %1545 = vmatprep.subr.mxu0 %v541_v34  ;;  %1601 = vmatprep.subr.mxu1 %v573_v35  ;;  %v586_v34 = vld [vmem:[%s1962_s6 + $0x410] sm:$0xff] }
  0x6c   : > { %1546 = vmatpush3.msra.mxu0 %v525_v36  ;;  %1602 = vmatpush3.msra.mxu1 %v557_v37  ;;  %v440_v36 = vsel %vm360_vm0, %v438_v30, %v439_v31  ;;  %v585_v37 = vld [vmem:[%s1962_s6 + $0x408] sm:$0xff] }
  0x6d   : > { %1547 = vmatprep.subr.mxu0 %v540_v38  ;;  %1603 = vmatprep.subr.mxu1 %v572_v43  ;;  %v584_v38 = vld [vmem:[%s1962_s6 + $0x400] sm:$0xff] }
  0x6e   : > { %694 = vmatprep.mubr.f32.mxu0 %v2166_v45  ;;  %799 = vmatprep.mubr.f32.mxu1 %v2159_v39 }
  0x6f   : > { %1548 = vmatpush3.msra.mxu0 %v524_v46  ;;  %1604 = vmatpush3.msra.mxu1 %v556_v47 }
  0x70   : > { %695 = vmatmul.mubr.f32.gmra.mxu0 %v2135_v20  ;;  %800 = vmatmul.mubr.f32.gmra.mxu1 %v2173_v51 }
  0x71   : > { %1549 = vmatprep.subr.mxu0 %v539_v52  ;;  %1605 = vmatprep.subr.mxu1 %v571_v53 }
  0x72   : > { %1550 = vmatpush3.msra.mxu0 %v523_v54  ;;  %1606 = vmatpush3.msra.mxu1 %v555_v56 }
  0x73   : > { %1551 = vmatprep.subr.mxu0 %v538_v57  ;;  %1607 = vmatprep.subr.mxu1 %v570_v61 }
  0x74   : > { %699 = vmatprep.mubr.f32.mxu0 %v2186_v62  ;;  %804 = vmatprep.mubr.f32.mxu1 %v2189_v63 }
  0x75   : > { %1552 = vmatpush3.msra.mxu0 %v522_v0  ;;  %1608 = vmatpush3.msra.mxu1 %v554_v2 }
  0x76   : > { %700 = vmatmul.mubr.f32.gmra.mxu0 %v2159_v39  ;;  %805 = vmatmul.mubr.f32.gmra.mxu1 %v2195_v4 }
  0x77   : > { %1553 = vmatprep.subr.mxu0 %v537_v5  ;;  %1609 = vmatprep.subr.mxu1 %v569_v6 }
  0x78   : > { %1554 = vmatpush3.msra.mxu0 %v521_v7  ;;  %1610 = vmatpush3.msra.mxu1 %v553_v9 }
  0x79   : > { %1555 = vmatprep.subr.mxu0 %v536_v10  ;;  %1611 = vmatprep.subr.mxu1 %v568_v11 }
  0x7a   : > { %1556 = vmatpush3.msra.mxu0 %v520_v12  ;;  %874 = vmatprep.mubr.f32.mxu0 %v2053_v29  ;;  %v594_v29 = vld [vmem:[%s1962_s6 + $0x450] sm:$0xff] }
  0x7b   : > { %1612 = vmatpush3.msra.mxu1 %v552_v14  ;;  %979 = vmatprep.mubr.f32.mxu1 %v2070_v40 }
  0x7c   : > { %875 = vmatmul.mubr.f32.vlgmr.msra.gmra.mxu0 %v2046_v24  ;;  %980 = vmatmul.mubr.f32.vlgmr.msra.gmra.mxu1 %v2038_v17  ;;  %v596_v24 = vld [vmem:[%s1962_s6 + $0x460] sm:$0xff]  ;;  %v595_v17 = vld [vmem:[%s1962_s6 + $0x458] sm:$0xff] }
  0x7d   : > { %1661 = vmatprep.subr.mxu0 %v599_v15  ;;  %1705 = vmatprep.subr.mxu1 %v599_v15 }
  0x7e   : > { %1662 = vmatpush3.msra.mxu0 %v599_v15  ;;  %1721 = vmatpush3.msra.mxu1 %v599_v15 }
  0x7f   : > { %1663 = vmatprep.subr.mxu0 %v598_v16  ;;  %1706 = vmatprep.subr.mxu1 %v598_v16 }
  0x80   : > { %879 = vmatprep.mubr.f32.mxu0 %v2077_v44  ;;  %984 = vmatprep.mubr.f32.mxu1 %v2094_v55 }
  0x81   : > { %1664 = vmatpush3.msra.mxu0 %v598_v16  ;;  %1722 = vmatpush3.msra.mxu1 %v598_v16 }
  0x82   : > { %880 = vmatmul.mubr.f32.gmra.mxu0 %v2070_v40  ;;  %985 = vmatmul.mubr.f32.gmra.mxu1 %v2060_v33  ;;  %v593_v33 = vld [vmem:[%s1962_s6 + $0x448] sm:$0xff]  ;;  %v592_v40 = vld [vmem:[%s1962_s6 + $0x440] sm:$0xff] }
  0x83   : > { %1665 = vmatprep.subr.mxu0 %v597_v18  ;;  %1707 = vmatprep.subr.mxu1 %v597_v18 }
  0x84   : > { %1666 = vmatpush3.msra.mxu0 %v597_v18  ;;  %1723 = vmatpush3.msra.mxu1 %v597_v18 }
  0x85   : > { %1667 = vmatprep.subr.mxu0 %v596_v24  ;;  %1708 = vmatprep.subr.mxu1 %v596_v24 }
  0x86   : > { %884 = vmatprep.mubr.f32.mxu0 %v2101_v60  ;;  %989 = vmatprep.mubr.f32.mxu1 %v2118_v8 }
  0x87   : > { %1668 = vmatpush3.msra.mxu0 %v596_v24  ;;  %1724 = vmatpush3.msra.mxu1 %v596_v24 }
  0x88   : > { %885 = vmatmul.mubr.f32.gmra.mxu0 %v2094_v55  ;;  %990 = vmatmul.mubr.f32.gmra.mxu1 %v2087_v50  ;;  %v591_v50 = vld [vmem:[%s1962_s6 + $0x438] sm:$0xff]  ;;  %v590_v55 = vld [vmem:[%s1962_s6 + $0x430] sm:$0xff] }
  0x89   : > { %1669 = vmatprep.subr.mxu0 %v595_v17  ;;  %1709 = vmatprep.subr.mxu1 %v595_v17 }
  0x8a   : > { %1670 = vmatpush3.msra.mxu0 %v595_v17  ;;  %1725 = vmatpush3.msra.mxu1 %v595_v17 }
  0x8b   : > { %1671 = vmatprep.subr.mxu0 %v594_v29  ;;  %1710 = vmatprep.subr.mxu1 %v594_v29 }
  0x8c   : > { %889 = vmatprep.mubr.f32.mxu0 %v2125_v13  ;;  %994 = vmatprep.mubr.f32.mxu1 %v2142_v26 }
  0x8d   : > { %1672 = vmatpush3.msra.mxu0 %v594_v29  ;;  %1726 = vmatpush3.msra.mxu1 %v594_v29 }
  0x8e   : > { %890 = vmatmul.mubr.f32.gmra.mxu0 %v2118_v8  ;;  %995 = vmatmul.mubr.f32.gmra.mxu1 %v2111_v3  ;;  %v341_v3 = vld [vmem:[%s1936_s13 + $0x88] sm:$0x3] }
  0x8f   : > { %1673 = vmatprep.subr.mxu0 %v593_v33  ;;  %1711 = vmatprep.subr.mxu1 %v593_v33  ;;  %v589_v8 = vld [vmem:[%s1962_s6 + $0x428] sm:$0xff]  ;;  %v429_v21 = vrot.slane %v341_v3, 1  ;;  %v433_v27 = vrot.slane %v341_v3, 2 }
  0x90   : > { %1674 = vmatpush3.msra.mxu0 %v593_v33  ;;  %1727 = vmatpush3.msra.mxu1 %v593_v33 }
  0x91   : > { %1675 = vmatprep.subr.mxu0 %v592_v40  ;;  %1712 = vmatprep.subr.mxu1 %v592_v40  ;;  %v430_v25 = vsel %vm360_vm0, %v428_v19, %v429_v21 }
  0x92   : > { %894 = vmatprep.mubr.f32.mxu0 %v2149_v32  ;;  %999 = vmatprep.mubr.f32.mxu1 %v2166_v45 }
  0x93   : > { %1676 = vmatpush3.msra.mxu0 %v592_v40  ;;  %1728 = vmatpush3.msra.mxu1 %v592_v40 }
  0x94   : > { %895 = vmatmul.mubr.f32.gmra.mxu0 %v2142_v26  ;;  %1000 = vmatmul.mubr.f32.gmra.mxu1 %v2135_v20  ;;  %v588_v20 = vld [vmem:[%s1962_s6 + $0x420] sm:$0xff]  ;;  %v432_v26 = vrot.slane %v2189_v63, 2 }
  0x95   : > { %1677 = vmatprep.subr.mxu0 %v591_v50  ;;  %1713 = vmatprep.subr.mxu1 %v591_v50 }
  0x96   : > { %1678 = vmatpush3.msra.mxu0 %v591_v50  ;;  %1729 = vmatpush3.msra.mxu1 %v591_v50  ;;  %v434_v35 = vsel %vm393_vm1, %v432_v26, %v433_v27 }
  0x97   : > { %1679 = vmatprep.subr.mxu0 %v590_v55  ;;  %1714 = vmatprep.subr.mxu1 %v590_v55 }
  0x98   : > { %899 = vmatprep.mubr.f32.mxu0 %v2173_v51  ;;  %1004 = vmatprep.mubr.f32.mxu1 %v2186_v62 }
  0x99   : > { %1680 = vmatpush3.msra.mxu0 %v590_v55  ;;  %1730 = vmatpush3.msra.mxu1 %v590_v55 }
  0x9a   : > { %900 = vmatmul.mubr.f32.gmra.mxu0 %v2166_v45  ;;  %1005 = vmatmul.mubr.f32.gmra.mxu1 %v2159_v39  ;;  %v442_v39 = vrot.slane %v342_v22, 2 }
  0x9b   : > { %1681 = vmatprep.subr.mxu0 %v589_v8  ;;  %1715 = vmatprep.subr.mxu1 %v589_v8 }
  0x9c   : > { %1682 = vmatpush3.msra.mxu0 %v589_v8  ;;  %1731 = vmatpush3.msra.mxu1 %v589_v8  ;;  %v444_v41 = vsel %vm393_vm1, %v442_v39, %v443_v1 }
  0x9d   : > { %1683 = vmatprep.subr.mxu0 %v588_v20  ;;  %1716 = vmatprep.subr.mxu1 %v588_v20 }
  0x9e   : > { %904 = vmatprep.mubr.f32.mxu0 %v2195_v4  ;;  %1009 = vmatprep.mubr.f32.mxu1 %v430_v25 }
  0x9f   : > { %1684 = vmatpush3.msra.mxu0 %v588_v20  ;;  %1732 = vmatpush3.msra.mxu1 %v588_v20 }
  0xa0   : > { %905 = vmatmul.mubr.f32.gmra.mxu0 %v2186_v62  ;;  %1010 = vmatmul.mubr.f32.gmra.mxu1 %v2189_v63 }
  0xa1   : > { %1685 = vmatprep.subr.mxu0 %v587_v28  ;;  %1717 = vmatprep.subr.mxu1 %v587_v28 }
  0xa2   : > { %1686 = vmatpush3.msra.mxu0 %v587_v28  ;;  %1733 = vmatpush3.msra.mxu1 %v587_v28 }
  0xa3   : > { %1687 = vmatprep.subr.mxu0 %v586_v34  ;;  %1718 = vmatprep.subr.mxu1 %v586_v34 }
  0xa4   : > { %909 = vmatprep.mubr.f32.mxu0 %v434_v35  ;;  %1014 = vmatprep.mubr.f32.mxu1 %v440_v36 }
  0xa5   : > { %1688 = vmatpush3.msra.mxu0 %v586_v34  ;;  %1734 = vmatpush3.msra.mxu1 %v586_v34 }
  0xa6   : > { %910 = vmatmul.mubr.f32.gmra.mxu0 %v430_v25  ;;  %1015 = vmatmul.mubr.f32.gmra.mxu1 %v342_v22 }
  0xa7   : > { %1689 = vmatprep.subr.mxu0 %v585_v37  ;;  %1719 = vmatprep.subr.mxu1 %v585_v37 }
  0xa8   : > { %1690 = vmatpush3.msra.mxu0 %v585_v37  ;;  %1735 = vmatpush3.msra.mxu1 %v585_v37 }
  0xa9   : > { %1691 = vmatprep.subr.mxu0 %v584_v38  ;;  %1720 = vmatprep.subr.mxu1 %v584_v38 }
  0xaa   : > { %1692 = vmatpush3.msra.mxu0 %v584_v38  ;;  %1736 = vmatpush3.msra.mxu1 %v584_v38 }
  0xab   : > { %1693 = vmatprep.mubr.f32.mxu0 %v2077_v44  ;;  %1699 = vmatprep.mubr.f32.mxu1 %v2173_v51 }
  0xac   : > { %1694 = vmatmul.mubr.f32.vlgmr.msra.gmra.mxu0 %v2101_v60  ;;  %1700 = vmatmul.mubr.f32.vlgmr.msra.gmra.mxu1 %v2195_v4 }
  0xad   : > { %1696 = vmatprep.mubr.f32.mxu0 %v2125_v13  ;;  %1702 = vmatprep.mubr.f32.mxu1 %v434_v35 }
  0xb0   : > { %1697 = vmatmul.mubr.f32.gmra.mxu0 %v2149_v32  ;;  %1703 = vmatmul.mubr.f32.gmra.mxu1 %v444_v41 }
 0x10c   : > { %v1445_v42 = vpop.f32.mrf.mxu0  ;;  %v1501_v43 = vpop.f32.mrf.mxu1 }
 0x10e   : > { %v1446_v45 = vpop.f32.mrf.mxu0  ;;  %v1502_v46 = vpop.f32.mrf.mxu1 }
 0x10f   : > { %v1447_v35 = vadd.f32 %v1446_v45, %v1445_v42  ;;  %v1503_v36 = vadd.f32 %v1502_v46, %v1501_v43 }
 0x112   : > { %v1448_v47 = vpop.f32.mrf.mxu0  ;;  %v1504_v44 = vpop.f32.mrf.mxu1 }
 0x114   : > { %v1449_v48 = vpop.f32.mrf.mxu0  ;;  %v1505_v49 = vpop.f32.mrf.mxu1 }
 0x115   : > { %v1450_v37 = vadd.f32 %v1449_v48, %v1448_v47  ;;  %v1506_v38 = vadd.f32 %v1505_v49, %v1504_v44 }
 0x118   : > { %v2266_v51 = vpop.f32.mrf.mxu0  ;;  %v2268_v60 = vpop.f32.mrf.mxu1 }
 0x119   : > { %2356 = vst [vmem:[#allocation5_spill] sm:$0xff] %v2266_v51  ;;  %2357 = vst [vmem:[#allocation6_spill] sm:$0xff] %v2268_v60  ;;  %v777_v51 = vadd.f32 %v1506_v38, %v1450_v37 }
 0x11a   : > { %v2270_v52 = vpop.f32.mrf.mxu0  ;;  %v2272_v13 = vpop.f32.mrf.mxu1 }
 0x11b   : > { %2358 = vst [vmem:[#allocation7_spill] sm:$0xff] %v2270_v52  ;;  %2359 = vst [vmem:[#allocation8_spill] sm:$0xff] %v2272_v13  ;;  %v772_v52 = vadd.f32 %v1503_v36, %v1447_v35 }
 0x11e   : > { %v1454_v53 = vpop.f32.mrf.mxu0  ;;  %v1510_v54 = vpop.f32.mrf.mxu1 }
 0x120   : > { %v1455_v32 = vpop.f32.mrf.mxu0  ;;  %v1511_v56 = vpop.f32.mrf.mxu1  ;;  %v2368_v43 = vld [vmem:[#allocation5_spill] sm:$0xff]  ;;  %v2370_v47 = vld [vmem:[#allocation6_spill] sm:$0xff] }
 0x121   : > { %v1456_v1 = vadd.f32 %v1455_v32, %v1454_v53 }
 0x122   : > { %v2369_v45 = vld [vmem:[#allocation7_spill] sm:$0xff]  ;;  %v2371_v44 = vld [vmem:[#allocation8_spill] sm:$0xff] }
 0x123   : > { %v1453_v46 = vadd.f32 %v2369_v45, %v2368_v43  ;;  %v1509_v48 = vadd.f32 %v2371_v44, %v2370_v47 }
 0x124   : > { %v1457_v57 = vpop.f32.mrf.mxu0  ;;  %v1513_v58 = vpop.f32.mrf.mxu1 }
 0x126   : > { %v1458_v59 = vpop.f32.mrf.mxu0  ;;  %v1514_v61 = vpop.f32.mrf.mxu1 }
 0x12a   : > { %v1460_v62 = vpop.f32.mrf.mxu0  ;;  %v1516_v63 = vpop.f32.mrf.mxu1 }
 0x12c   : > { %v1461_v0 = vpop.f32.mrf.mxu0  ;;  %v1517_v2 = vpop.f32.mrf.mxu1 }
 0x12d   : > { %v1462_v41 = vadd.f32 %v1461_v0, %v1460_v62 }
 0x130   : > { %v2274_v4 = vpop.f32.mrf.mxu0  ;;  %v2276_v5 = vpop.f32.mrf.mxu1 }
 0x131   : > { %2360 = vst [vmem:[#allocation9_spill] sm:$0xff] %v2274_v4  ;;  %2361 = vst [vmem:[#allocation10_spill] sm:$0xff] %v2276_v5 }
 0x132   : > { %v1464_v6 = vpop.f32.mrf.mxu0  ;;  %v1520_v7 = vpop.f32.mrf.mxu1 }
 0x136   : > { %v1466_v9 = vpop.f32.mrf.mxu0  ;;  %v1522_v10 = vpop.f32.mrf.mxu1 }
 0x138   : > { %v1467_v11 = vpop.f32.mrf.mxu0  ;;  %v1523_v12 = vpop.f32.mrf.mxu1 }
 0x139   : > { %v1468_v4 = vadd.f32 %v1467_v11, %v1466_v9  ;;  %v1524_v13 = vadd.f32 %v1523_v12, %v1522_v10 }
 0x13c   : > { %v1557_v14 = vpop.f32.mrf.mxu0  ;;  %v2278_v15 = vpop.f32.mrf.mxu1 }
 0x13d   : > { %2362 = vst [vmem:[#allocation11_spill] sm:$0xff] %v2278_v15 }
 0x13e   : > { %v1558_v16 = vpop.f32.mrf.mxu0  ;;  %v2280_v18 = vpop.f32.mrf.mxu1 }
 0x13f   : > { %2363 = vst [vmem:[#allocation12_spill] sm:$0xff] %v2280_v18  ;;  %v1515_v18 = vadd.f32 %v1514_v61, %v1513_v58  ;;  %v1559_v42 = vadd.f32 %v1558_v16, %v1557_v14  ;;  %v2372_v61 = vld [vmem:[#allocation9_spill] sm:$0xff] }
 0x140   : > { %v1465_v62 = vadd.f32 %v1464_v6, %v2372_v61  ;;  %v448_v61 = vld [vmem:[#allocation2 + $0x18] sm:$0xff] }
 0x141   : > { %v877_v11 = vadd.f32 %v1559_v42, %v772_v52  ;;  %v450_v42 = vld [vmem:[#allocation2 + $0x8] sm:$0xff] }
 0x142   : > { %v1560_v24 = vpop.f32.mrf.mxu0  ;;  %v1616_v17 = vpop.f32.mrf.mxu1 }
 0x144   : > { %v1561_v29 = vpop.f32.mrf.mxu0  ;;  %v1617_v33 = vpop.f32.mrf.mxu1 }
 0x145   : > { %v1562_v15 = vadd.f32 %v1561_v29, %v1560_v24  ;;  %v1618_v12 = vadd.f32 %v1617_v33, %v1616_v17  ;;  %v782_v29 = vadd.f32 %v1509_v48, %v1453_v46  ;;  %v449_v48 = vld [vmem:[#allocation2 + $0x10] sm:$0xff] }
 0x148   : > { %v1563_v40 = vpop.f32.mrf.mxu0  ;;  %v2282_v50 = vpop.f32.mrf.mxu1 }
 0x149   : > { %2364 = vst [vmem:[#allocation13_spill] sm:$0xff] %v2282_v50 }
 0x14a   : > { %v1564_v55 = vpop.f32.mrf.mxu0  ;;  %v2284_v3 = vpop.f32.mrf.mxu1 }
 0x14b   : > { %2365 = vst [vmem:[#allocation14_spill] sm:$0xff] %v2284_v3  ;;  %v1518_v3 = vadd.f32 %v1517_v2, %v1516_v63  ;;  %v2373_v63 = vld [vmem:[#allocation10_spill] sm:$0xff]  ;;  %v807_v2 = vadd.f32 %v1524_v13, %v1468_v4  ;;  %v1565_v14 = vadd.f32 %v1564_v55, %v1563_v40 }
 0x14c   : > { %v1521_v0 = vadd.f32 %v1520_v7, %v2373_v63 }
 0x14d   : > { %v797_v49 = vadd.f32 %v1518_v3, %v1462_v41  ;;  %v887_v17 = vadd.f32 %v1565_v14, %v782_v29 }
 0x14e   : > { %v1566_v8 = vpop.f32.mrf.mxu0  ;;  %v2286_v19 = vpop.f32.mrf.mxu1 }
 0x14f   : > { %2366 = vst [vmem:[#allocation15_spill] sm:$0xff] %v2286_v19  ;;  %v1459_v19 = vadd.f32 %v1458_v59, %v1457_v57  ;;  %v882_v57 = vadd.f32 %v1562_v15, %v777_v51  ;;  %v2375_v51 = vld [vmem:[#allocation12_spill] sm:$0xff] }
 0x150   : > { %v1567_v21 = vpop.f32.mrf.mxu0  ;;  %v2288_v20 = vpop.f32.mrf.mxu1  ;;  %v2378_v38 = vld [vmem:[#allocation13_spill] sm:$0xff] }
 0x151   : > { %2367 = vst [vmem:[#allocation16_spill] sm:$0xff] %v2288_v20  ;;  %v1512_v20 = vadd.f32 %v1511_v56, %v1510_v54  ;;  %v792_v56 = vadd.f32 %v1515_v18, %v1459_v19  ;;  %v1568_v58 = vadd.f32 %v1567_v21, %v1566_v8  ;;  %v2374_v18 = vld [vmem:[#allocation11_spill] sm:$0xff]  ;;  %v987_v6 = vadd.f32 %v1618_v12, %v882_v57 }
 0x152   : > { %v1615_v15 = vadd.f32 %v2375_v51, %v2374_v18  ;;  %v802_v21 = vadd.f32 %v1521_v0, %v1465_v62 }
 0x153   : > { %v787_v54 = vadd.f32 %v1512_v20, %v1456_v1 }
 0x154   : > { %v1569_v22 = vpop.f32.mrf.mxu0  ;;  %v1625_v23 = vpop.f32.mrf.mxu1 }
 0x155   : > { %v892_v8 = vadd.f32 %v1568_v58, %v787_v54  ;;  %v453_v54 = vld [vmem:[#allocation2 + $0x38] sm:$0xff] }
 0x156   : > { %v1570_v25 = vpop.f32.mrf.mxu0  ;;  %v1626_v26 = vpop.f32.mrf.mxu1  ;;  %v2376_v33 = vld [vmem:[#allocation15_spill] sm:$0xff] }
 0x157   : > { %v1571_v53 = vadd.f32 %v1570_v25, %v1569_v22  ;;  %v1627_v7 = vadd.f32 %v1626_v26, %v1625_v23  ;;  %v2379_v23 = vld [vmem:[#allocation14_spill] sm:$0xff] }
 0x158   : > { %v2377_v40 = vld [vmem:[#allocation16_spill] sm:$0xff]  ;;  %v1621_v26 = vadd.f32 %v2379_v23, %v2378_v38 }
 0x159   : > { %v897_v3 = vadd.f32 %v1571_v53, %v792_v56  ;;  %v1624_v55 = vadd.f32 %v2377_v40, %v2376_v33 }
 0x15a   : > { %v1572_v27 = vpop.f32.mrf.mxu0  ;;  %v1628_v28 = vpop.f32.mrf.mxu1  ;;  %v992_v57 = vadd.f32 %v1621_v26, %v887_v17 }
 0x15b   : > { %v1002_v36 = vadd.f32 %v1627_v7, %v897_v3  ;;  %v997_v45 = vadd.f32 %v1624_v55, %v892_v8 }
 0x15c   : > { %v1573_v30 = vpop.f32.mrf.mxu0  ;;  %v1629_v31 = vpop.f32.mrf.mxu1 }
 0x15d   : > { %v1574_v60 = vadd.f32 %v1573_v30, %v1572_v27  ;;  %v1630_v22 = vadd.f32 %v1629_v31, %v1628_v28  ;;  %v451_v27 = vld [vmem:[#allocation2 + $0x20] sm:$0xff] }
 0x15f   : > { %v902_v9 = vadd.f32 %v1574_v60, %v797_v49  ;;  %v447_v60 = vld [vmem:[#allocation2] sm:$0xff] }
 0x160   : > { %v1575_v34 = vpop.f32.mrf.mxu0  ;;  %v2290_v39 = vpop.f32.mrf.mxu1 }
 0x161   : > { %v1007_v52 = vadd.f32 %v1630_v22, %v902_v9 }
 0x162   : > { %v1576_v50 = vpop.f32.mrf.mxu0  ;;  %v1632_v5 = vpop.f32.mrf.mxu1 }
 0x163   : > { %v1577_v20 = vadd.f32 %v1576_v50, %v1575_v34  ;;  %v982_v50 = vadd.f32 %v1615_v15, %v877_v11  ;;  %v446_v34 = vld [vmem:[#allocation2 + $0x30] sm:$0xff]  ;;  %v1633_v46 = vadd.f32 %v1632_v5, %v2290_v39  ;;  %v452_v5 = vld [vmem:[#allocation2 + $0x28] sm:$0xff] }
 0x165   : > { %v907_v30 = vadd.f32 %v1577_v20, %v802_v21 }
 0x166   : > { %v1578_v32 = vpop.f32.mrf.mxu0  ;;  %v1634_v59 = vpop.f32.mrf.mxu1 }
 0x167   : > { %v1012_v63 = vadd.f32 %v1633_v46, %v907_v30 }
 0x168   : > { %v1579_v10 = vpop.f32.mrf.mxu0  ;;  %v1635_v24 = vpop.f32.mrf.mxu1 }
 0x169   : > { %v1580_v16 = vadd.f32 %v1579_v10, %v1578_v32  ;;  %v1636_v13 = vadd.f32 %v1635_v24, %v1634_v59 }
 0x16b   : > { %v912_v19 = vadd.f32 %v1580_v16, %v807_v2 }
 0x16c   : > { %v1695_v4 = vpop.f32.mrf.mxu0  ;;  %v1701_v28 = vpop.f32.mrf.mxu1 }
 0x16d   : > { %v1092_v25 = vadd.f32 %v1695_v4, %v987_v6  ;;  %v1112_v31 = vadd.f32 %v1701_v28, %v1007_v52  ;;  %v1017_v37 = vadd.f32 %v1636_v13, %v912_v19 }
 0x16e   : > { %v1086_v35 = vpop.f32.mrf.mxu0  ;;  %v1106_v43 = vpop.f32.mrf.mxu1 }
 0x16f   : > { %v1126_v1 = vadd.f32 %v1092_v25, %v447_v60  ;;  %v1087_v41 = vadd.f32 %v1086_v35, %v982_v50  ;;  %v1130_v47 = vadd.f32 %v1112_v31, %v451_v27  ;;  %v1107_v44 = vadd.f32 %v1106_v43, %v1002_v36 }
 0x170   : > { %v1698_v49 = vpop.f32.mrf.mxu0  ;;  %v1704_v56 = vpop.f32.mrf.mxu1 }
 0x171   : > { %1134 = vst [vmem:[#allocation2] sm:$0xff] %v1126_v1  ;;  %v1125_v53 = vadd.f32 %v1087_v41, %v446_v34  ;;  %v1102_v32 = vadd.f32 %v1698_v49, %v997_v45  ;;  %1138 = vst [vmem:[#allocation2 + $0x20] sm:$0xff] %v1130_v47  ;;  %v1129_v58 = vadd.f32 %v1107_v44, %v450_v42 }
 0x172   : > { %v1122_v59 = vadd.f32 %v1704_v56, %v1017_v37  ;;  %v1096_v62 = vpop.f32.mrf.mxu0  ;;  %v1116_v39 = vpop.f32.mrf.mxu1 }
 0x173   : > { %1133 = vst [vmem:[#allocation2 + $0x30] sm:$0xff] %v1125_v53  ;;  %v1128_v0 = vadd.f32 %v1102_v32, %v449_v48  ;;  %v1097_v2 = vadd.f32 %v1096_v62, %v992_v57  ;;  %1137 = vst [vmem:[#allocation2 + $0x8] sm:$0xff] %v1129_v58  ;;  %v1117_v10 = vadd.f32 %v1116_v39, %v1012_v63  ;;  %1144 = sbr.rel (%p1409_p10) target bundleno = 412 (0x19c), region = 40 }
 0x174   : > { %v1132_v9 = vadd.f32 %v1122_v59, %v453_v54 }
 0x175   : > { %1136 = vst [vmem:[#allocation2 + $0x10] sm:$0xff] %v1128_v0  ;;  %v1127_v11 = vadd.f32 %v1097_v2, %v448_v61  ;;  %v1131_v12 = vadd.f32 %v1117_v10, %v452_v5 }
 0x176   : > { %1140 = vst [vmem:[#allocation2 + $0x38] sm:$0xff] %v1132_v9 }
 0x177   : > { %1135 = vst [vmem:[#allocation2 + $0x18] sm:$0xff] %v1127_v11  ;;  %1139 = vst [vmem:[#allocation2 + $0x28] sm:$0xff] %v1131_v12 }
 0x178   : > { %v1410_v16 = vld [vmem:[%s2350_s2] ss:$0 sm:$0xff] }
 0x179   : > { %v1146_v24 = vld [vmem:[#allocation2] sm:$0xff] }
 0x17a   : > { %v1145_v14 = vld [vmem:[#allocation2 + $0x30] sm:$0xff]  ;;  %v1161_v3 = vadd.f32 %v1410_v16, %v1146_v24  ;;  %v1149_v18 = vld [vmem:[#allocation2 + $0x8] sm:$0xff]  ;;  %v1150_v19 = vld [vmem:[#allocation2 + $0x20] sm:$0xff] }
 0x17b   : > { %v1160_v29 = vadd.f32 %v1410_v16, %v1145_v14  ;;  %v1164_v8 = vadd.f32 %v1410_v16, %v1149_v18  ;;  %v1165_v4 = vadd.f32 %v1410_v16, %v1150_v19 }
 0x17c   : > { %v1148_v20 = vld [vmem:[#allocation2 + $0x10] sm:$0xff]  ;;  %1169 = vst [vmem:[%s1943_s28 + $0x8] sm:$0xff] %v1161_v3  ;;  %v1191_v60 = vmul.f32 %v1161_v3, %v1161_v3 }
 0x17d   : > { %v1163_v15 = vadd.f32 %v1410_v16, %v1148_v20  ;;  %v1152_v21 = vld [vmem:[#allocation2 + $0x38] sm:$0xff]  ;;  %1168 = vst [vmem:[%s1943_s28] sm:$0xff] %v1160_v29  ;;  %v1190_v7 = vmul.f32 %v1160_v29, %v1160_v29  ;;  %v1176_v13 = vadd.f32 %v1161_v3, %v1160_v29  ;;  %1172 = vst [vmem:[%s1943_s28 + $0x20] sm:$0xff] %v1164_v8 }
 0x17e   : > { %v1147_v22 = vld [vmem:[#allocation2 + $0x18] sm:$0xff]  ;;  %v1151_v6 = vld [vmem:[#allocation2 + $0x28] sm:$0xff]  ;;  %1173 = vst [vmem:[%s1943_s28 + $0x28] sm:$0xff] %v1165_v4  ;;  %v1167_v25 = vadd.f32 %v1410_v16, %v1152_v21  ;;  %v1194_v50 = vmul.f32 %v1164_v8, %v1164_v8  ;;  %v1195_v34 = vmul.f32 %v1165_v4, %v1165_v4 }
 0x17f   : > { %v1162_v51 = vadd.f32 %v1410_v16, %v1147_v22  ;;  %1171 = vst [vmem:[%s1943_s28 + $0x18] sm:$0xff] %v1163_v15  ;;  %v1166_v17 = vadd.f32 %v1410_v16, %v1151_v6  ;;  %v1198_v33 = vadd.f32 %v1191_v60, %v1190_v7  ;;  %v1193_v55 = vmul.f32 %v1163_v15, %v1163_v15 }
 0x180   : > { %1175 = vst [vmem:[%s1943_s28 + $0x38] sm:$0xff] %v1167_v25  ;;  %v1197_v23 = vmul.f32 %v1167_v25, %v1167_v25 }
 0x181   : > { %1170 = vst [vmem:[%s1943_s28 + $0x10] sm:$0xff] %v1162_v51  ;;  %v1192_v52 = vmul.f32 %v1162_v51, %v1162_v51  ;;  %v1177_v40 = vadd.f32 %v1176_v13, %v1162_v51  ;;  %1174 = vst [vmem:[%s1943_s28 + $0x30] sm:$0xff] %v1166_v17  ;;  %v1196_v37 = vmul.f32 %v1166_v17, %v1166_v17 }
 0x183   : > { %v1199_v27 = vadd.f32 %v1198_v33, %v1192_v52  ;;  %v1178_v28 = vadd.f32 %v1177_v40, %v1163_v15 }
 0x185   : > { %v1200_v30 = vadd.f32 %v1199_v27, %v1193_v55  ;;  %v1179_v31 = vadd.f32 %v1178_v28, %v1164_v8 }
 0x187   : > { %v1201_v35 = vadd.f32 %v1200_v30, %v1194_v50  ;;  %v1180_v36 = vadd.f32 %v1179_v31, %v1165_v4 }
 0x189   : > { %v1181_v38 = vadd.f32 %v1180_v36, %v1166_v17  ;;  %v1202_v26 = vadd.f32 %v1201_v35, %v1195_v34 }
 0x18b   : > { %v1182_v1 = vadd.f32 %v1181_v38, %v1167_v25  ;;  %v1203_v41 = vadd.f32 %v1202_v26, %v1196_v37 }
 0x18d   : > { %v1183_v42 = vrot.slane %v1182_v1, 4  ;;  %v1204_v43 = vadd.f32 %v1203_v41, %v1197_v23 }
 0x18f   : > { %v1184_v45 = vadd.f32 %v1183_v42, %v1182_v1  ;;  %v1205_v46 = vrot.slane %v1204_v43, 4 }
 0x191   : > { %v1185_v47 = vrot.slane %v1184_v45, 2  ;;  %v1206_v44 = vadd.f32 %v1205_v46, %v1204_v43 }
 0x193   : > { %v1186_v48 = vadd.f32 %v1185_v47, %v1184_v45  ;;  %v1207_v49 = vrot.slane %v1206_v44, 2 }
 0x195   : > { %v1187_v53 = vrot.slane %v1186_v48, 1  ;;  %v1208_v32 = vadd.f32 %v1207_v49, %v1206_v44 }
 0x197   : > { %v1188_v54 = vadd.f32 %v1187_v53, %v1186_v48  ;;  %v1209_v56 = vrot.slane %v1208_v32, 1 }
 0x199   : > { %1189 = vst [vmem:[%s304_s30] sm:$0x1] %v1188_v54  ;;  %v1210_v57 = vadd.f32 %v1209_v56, %v1208_v32 }
 0x19b   : > { %1211 = vst [vmem:[%s311_s9] sm:$0x1] %v1210_v57 }
 0x19c PF: > { %s16_s24 = sadd.s32 1, %s1850_s24   ;;  %s2380_s14 = sld [smem:[#allocation3_spill]] }
 0x19d   : > { %p13_p11 = scmp.ge.s32.totalorder %s16_s24, 50   ;;  %s2381_s15 = sld [smem:[#allocation4_spill]] }
 0x19e   : > { %s2382_s18 = smov %s1838_s21  ;;  %s2383_s19 = smov %s1842_s22 }
 0x19f   : > { %s2384_s20 = smov %s1846_s23  ;;  %s2385_s21 = smov %s2389_s25 }
 0x1a0   :  { %15 = sbr.rel (!%p13_p11) target bundleno = 4 (0x4), region = 95 }
 0x1a2   : > { %s2386_s22 = smov %s2380_s14 }
 0x1a3   : > { %s2387_s23 = smov %s2381_s15 }

</bundles_post_ra>
